<compile_context>
chip_gen: v5e
topology: v5e:2x2
jax: 0.10.0
libtpu: 0.0.40
codegen_flags: <defaults>
</compile_context>

<pallas_src>
import jax
import jax.numpy as jnp
from jax.experimental import pallas as pl
from jax.experimental.pallas import tpu as pltpu
import numpy as np


def _pad_hw1(a):
    """Zero-pad a (H, W, C) value by 1 on both spatial axes, in-register."""
    H, W, C = a.shape
    zr = jnp.zeros((1, W, C), a.dtype)
    a = jnp.concatenate([zr, a, zr], axis=0)          # (H+2, W,   C)
    zc = jnp.zeros((H + 2, 1, C), a.dtype)
    return jnp.concatenate([zc, a, zc], axis=1)       # (H+2, W+2, C)


def _im2col3x3(apad, H, W):
    """(H+2, W+2, C) padded activation -> (H*W, 9*C) im2col patches.

    Tap order (kh, kw, cin) matches HWIO weights reshaped to (9*C, Cout).
    """
    cols = [apad[dy:dy + H, dx:dx + W, :] for dy in range(3) for dx in range(3)]
    return jnp.concatenate(cols, axis=-1).reshape(H * W, -1)


def basic_block_kernel(x_ref, w1_ref, w2_ref, o_ref):
    # x_ref:  (1, H, W, Cin)   activations (bf16 or f32)
    # w1_ref: (9*Cin, Cout)    conv1 weights, im2col layout
    # w2_ref: (9*Cout, Cout)   conv2 weights, im2col layout
    # o_ref:  (1, H, W, Cout)  f32 output
    _, H, W, Cin = x_ref.shape
    Cout = w1_ref.shape[-1]

    x = x_ref[0]                                      # (H, W, Cin)

    # conv1: single fused K = 9*Cin matmul on the MXU, f32 accumulation.
    p1 = _im2col3x3(_pad_hw1(x), H, W)                # (H*W, 9*Cin)
    h1 = jnp.dot(p1, w1_ref[...], preferred_element_type=jnp.float32)
    h1 = jnp.maximum(h1, 0.0)                         # ReLU in f32

    # conv2: same structure, feeding conv1's activation in the compute dtype.
    h1c = h1.astype(x.dtype).reshape(H, W, Cout)
    p2 = _im2col3x3(_pad_hw1(h1c), H, W)              # (H*W, 9*Cout)
    acc2 = jnp.dot(p2, w2_ref[...], preferred_element_type=jnp.float32)

    # identity residual + final ReLU, in f32.
    out = acc2 + x.reshape(H * W, Cin).astype(jnp.float32)
    o_ref[0] = jnp.maximum(out, 0.0).reshape(H, W, Cout).astype(o_ref.dtype)


def resnet_basic_block(x_nchw, w1_oihw, w2_oihw, *, compute_dtype=jnp.bfloat16):
    """Forward of ResNetBasicBlock (stride=1, no downsample): relu(x + conv2(relu(conv1(x))))."""
    N, Cin, H, W = x_nchw.shape
    Cout = w1_oihw.shape[0]
    assert Cin == Cout, "identity residual requires inplanes == planes"

    # NCHW -> NHWC (channels on the lane axis), cast to the MXU compute dtype.
    x = jnp.transpose(x_nchw, (0, 2, 3, 1)).astype(compute_dtype)
    # OIHW -> HWIO -> (9*Cin, Cout) im2col weight layout.
    w1 = jnp.transpose(w1_oihw, (2, 3, 1, 0)).reshape(9 * Cin, Cout).astype(compute_dtype)
    w2 = jnp.transpose(w2_oihw, (2, 3, 1, 0)).reshape(9 * Cout, Cout).astype(compute_dtype)

    # Grid over the batch axis: one NHWC image per step (pipelined, megacore
    # parallel). Weights use a constant index_map so they stay VMEM-resident.
    # NOTE: for large spatial extents, additionally tile H rows with a 1-row halo.
    out_nhwc = pl.pallas_call(
        basic_block_kernel,
        out_shape=jax.ShapeDtypeStruct((N, H, W, Cout), jnp.float32),
        grid=(N,),
        in_specs=[
            pl.BlockSpec((1, H, W, Cin), lambda n: (n, 0, 0, 0)),
            pl.BlockSpec((9 * Cin, Cout), lambda n: (0, 0)),
            pl.BlockSpec((9 * Cout, Cout), lambda n: (0, 0)),
        ],
        out_specs=pl.BlockSpec((1, H, W, Cout), lambda n: (n, 0, 0, 0)),
        compiler_params=pltpu.CompilerParams(
            dimension_semantics=("parallel",)),
    )(x, w1, w2)

    return jnp.transpose(out_nhwc, (0, 3, 1, 2))      # NHWC -> NCHW


def reference_block(x_nchw, w1_oihw, w2_oihw):
    dn = ('NCHW', 'OIHW', 'NCHW')
    conv = lambda a, w: jax.lax.conv_general_dilated(
        a, w, window_strides=(1, 1), padding=((1, 1), (1, 1)),
        dimension_numbers=dn)
    h = jnp.maximum(conv(x_nchw, w1_oihw), 0.0)
    o = conv(h, w2_oihw) + x_nchw
    return jnp.maximum(o, 0.0)


if __name__ == "__main__":
    # small shapes consistent with the module: inplanes = planes = 8, stride = 1
    N, C, H, W = 2, 8, 16, 16
    key = jax.random.PRNGKey(0)
    kx, k1, k2 = jax.random.split(key, 3)

    x = jax.random.normal(kx, (N, C, H, W), dtype=jnp.float32)
    # PyTorch Conv2d weight shape: (Cout, Cin, 3, 3)
    w1 = 0.1 * jax.random.normal(k1, (C, C, 3, 3), dtype=jnp.float32)
    w2 = 0.1 * jax.random.normal(k2, (C, C, 3, 3), dtype=jnp.float32)

    ref = jax.block_until_ready(reference_block(x, w1, w2))

    # Exact-precision path: tight agreement with the f32 reference.
    out_f32 = jax.block_until_ready(
        resnet_basic_block(x, w1, w2, compute_dtype=jnp.float32))
    np.testing.assert_allclose(np.asarray(out_f32), np.asarray(ref),
                               rtol=1e-4, atol=1e-4)

    # Fast path: bf16 activations/weights on the MXU, f32 accumulation.
    out_bf16 = jax.block_until_ready(
        resnet_basic_block(x, w1, w2, compute_dtype=jnp.bfloat16))
    np.testing.assert_allclose(np.asarray(out_bf16), np.asarray(ref),
                               rtol=1e-1, atol=1e-1)

    print("KERNEL_OK")
</pallas_src>

<mosaic_0001>
module attributes {stable_mosaic.version = 11 : i64} {
  func.func @basic_block_kernel(%arg0: i32, %arg1: memref<1x16x16x8xf32, #tpu.memory_space<vmem>>, %arg2: memref<72x8xf32, #tpu.memory_space<vmem>>, %arg3: memref<72x8xf32, #tpu.memory_space<vmem>>, %arg4: memref<1x16x16x8xf32, #tpu.memory_space<vmem>>) attributes {dimension_semantics = [#tpu.dimension_semantics<parallel>], iteration_bounds = array<i64: 2>, scalar_prefetch = 0 : i64, scratch_operands = 0 : i64, tpu.core_type = #tpu.core_type<tc>, window_params = [{transform_indices = @transform_0, window_bounds = array<i64: 1, 16, 16, 8>}, {pipeline_mode = #tpu.pipeline_mode<synchronous>, transform_indices = @transform_1, window_bounds = array<i64: 72, 8>}, {pipeline_mode = #tpu.pipeline_mode<synchronous>, transform_indices = @transform_2, window_bounds = array<i64: 72, 8>}, {transform_indices = @transform_3, window_bounds = array<i64: 1, 16, 16, 8>}]} {
    %c0 = arith.constant 0 : index
    %c0_0 = arith.constant 0 : index
    %c0_1 = arith.constant 0 : index
    %c0_2 = arith.constant 0 : index
    %0 = vector.load %arg1[%c0, %c0_0, %c0_1, %c0_2] : memref<1x16x16x8xf32, #tpu.memory_space<vmem>>, vector<1x16x16x8xf32>
    %1 = vector.shape_cast %0 : vector<1x16x16x8xf32> to vector<16x16x8xf32>
    %cst = arith.constant 0.000000e+00 : f32
    %2 = vector.broadcast %cst : f32 to vector<1x16x8xf32>
    %3 = tpu.concatenate %2, %1, %2 in 0 : vector<1x16x8xf32>, vector<16x16x8xf32>, vector<1x16x8xf32> -> vector<18x16x8xf32>
    %cst_3 = arith.constant 0.000000e+00 : f32
    %4 = vector.broadcast %cst_3 : f32 to vector<18x1x8xf32>
    %5 = tpu.concatenate %4, %3, %4 in 1 : vector<18x1x8xf32>, vector<18x16x8xf32>, vector<18x1x8xf32> -> vector<18x18x8xf32>
    %6 = vector.extract_strided_slice %5 {offsets = [0, 0, 0], sizes = [16, 16, 8], strides = [1, 1, 1]} : vector<18x18x8xf32> to vector<16x16x8xf32>
    %7 = vector.extract_strided_slice %5 {offsets = [0, 1, 0], sizes = [16, 16, 8], strides = [1, 1, 1]} : vector<18x18x8xf32> to vector<16x16x8xf32>
    %8 = vector.extract_strided_slice %5 {offsets = [0, 2, 0], sizes = [16, 16, 8], strides = [1, 1, 1]} : vector<18x18x8xf32> to vector<16x16x8xf32>
    %9 = vector.extract_strided_slice %5 {offsets = [1, 0, 0], sizes = [16, 16, 8], strides = [1, 1, 1]} : vector<18x18x8xf32> to vector<16x16x8xf32>
    %10 = vector.extract_strided_slice %5 {offsets = [1, 1, 0], sizes = [16, 16, 8], strides = [1, 1, 1]} : vector<18x18x8xf32> to vector<16x16x8xf32>
    %11 = vector.extract_strided_slice %5 {offsets = [1, 2, 0], sizes = [16, 16, 8], strides = [1, 1, 1]} : vector<18x18x8xf32> to vector<16x16x8xf32>
    %12 = vector.extract_strided_slice %5 {offsets = [2, 0, 0], sizes = [16, 16, 8], strides = [1, 1, 1]} : vector<18x18x8xf32> to vector<16x16x8xf32>
    %13 = vector.extract_strided_slice %5 {offsets = [2, 1, 0], sizes = [16, 16, 8], strides = [1, 1, 1]} : vector<18x18x8xf32> to vector<16x16x8xf32>
    %14 = vector.extract_strided_slice %5 {offsets = [2, 2, 0], sizes = [16, 16, 8], strides = [1, 1, 1]} : vector<18x18x8xf32> to vector<16x16x8xf32>
    %15 = tpu.concatenate %6, %7, %8, %9, %10, %11, %12, %13, %14 in 2 : vector<16x16x8xf32>, vector<16x16x8xf32>, vector<16x16x8xf32>, vector<16x16x8xf32>, vector<16x16x8xf32>, vector<16x16x8xf32>, vector<16x16x8xf32>, vector<16x16x8xf32>, vector<16x16x8xf32> -> vector<16x16x72xf32>
    %16 = vector.shape_cast %15 : vector<16x16x72xf32> to vector<256x72xf32>
    %c0_4 = arith.constant 0 : index
    %c0_5 = arith.constant 0 : index
    %17 = vector.load %arg2[%c0_4, %c0_5] : memref<72x8xf32, #tpu.memory_space<vmem>>, vector<72x8xf32>
    %cst_6 = arith.constant dense<0.000000e+00> : vector<256x8xf32>
    %18 = tpu.matmul %16, %17, %cst_6 {dimension_numbers = #tpu.dot_dimension_numbers<[1], [0], [0], [1], [0, 0, 1, 1], [], []>} : vector<256x72xf32>, vector<72x8xf32>, vector<256x8xf32> -> vector<256x8xf32>
    %cst_7 = arith.constant 0.000000e+00 : f32
    %19 = vector.broadcast %cst_7 : f32 to vector<256x8xf32>
    %20 = arith.maximumf %18, %19 : vector<256x8xf32>
    %21 = vector.shape_cast %20 : vector<256x8xf32> to vector<16x16x8xf32>
    %cst_8 = arith.constant 0.000000e+00 : f32
    %22 = vector.broadcast %cst_8 : f32 to vector<1x16x8xf32>
    %23 = tpu.concatenate %22, %21, %22 in 0 : vector<1x16x8xf32>, vector<16x16x8xf32>, vector<1x16x8xf32> -> vector<18x16x8xf32>
    %cst_9 = arith.constant 0.000000e+00 : f32
    %24 = vector.broadcast %cst_9 : f32 to vector<18x1x8xf32>
    %25 = tpu.concatenate %24, %23, %24 in 1 : vector<18x1x8xf32>, vector<18x16x8xf32>, vector<18x1x8xf32> -> vector<18x18x8xf32>
    %26 = vector.extract_strided_slice %25 {offsets = [0, 0, 0], sizes = [16, 16, 8], strides = [1, 1, 1]} : vector<18x18x8xf32> to vector<16x16x8xf32>
    %27 = vector.extract_strided_slice %25 {offsets = [0, 1, 0], sizes = [16, 16, 8], strides = [1, 1, 1]} : vector<18x18x8xf32> to vector<16x16x8xf32>
    %28 = vector.extract_strided_slice %25 {offsets = [0, 2, 0], sizes = [16, 16, 8], strides = [1, 1, 1]} : vector<18x18x8xf32> to vector<16x16x8xf32>
    %29 = vector.extract_strided_slice %25 {offsets = [1, 0, 0], sizes = [16, 16, 8], strides = [1, 1, 1]} : vector<18x18x8xf32> to vector<16x16x8xf32>
    %30 = vector.extract_strided_slice %25 {offsets = [1, 1, 0], sizes = [16, 16, 8], strides = [1, 1, 1]} : vector<18x18x8xf32> to vector<16x16x8xf32>
    %31 = vector.extract_strided_slice %25 {offsets = [1, 2, 0], sizes = [16, 16, 8], strides = [1, 1, 1]} : vector<18x18x8xf32> to vector<16x16x8xf32>
    %32 = vector.extract_strided_slice %25 {offsets = [2, 0, 0], sizes = [16, 16, 8], strides = [1, 1, 1]} : vector<18x18x8xf32> to vector<16x16x8xf32>
    %33 = vector.extract_strided_slice %25 {offsets = [2, 1, 0], sizes = [16, 16, 8], strides = [1, 1, 1]} : vector<18x18x8xf32> to vector<16x16x8xf32>
    %34 = vector.extract_strided_slice %25 {offsets = [2, 2, 0], sizes = [16, 16, 8], strides = [1, 1, 1]} : vector<18x18x8xf32> to vector<16x16x8xf32>
    %35 = tpu.concatenate %26, %27, %28, %29, %30, %31, %32, %33, %34 in 2 : vector<16x16x8xf32>, vector<16x16x8xf32>, vector<16x16x8xf32>, vector<16x16x8xf32>, vector<16x16x8xf32>, vector<16x16x8xf32>, vector<16x16x8xf32>, vector<16x16x8xf32>, vector<16x16x8xf32> -> vector<16x16x72xf32>
    %36 = vector.shape_cast %35 : vector<16x16x72xf32> to vector<256x72xf32>
    %c0_10 = arith.constant 0 : index
    %c0_11 = arith.constant 0 : index
    %37 = vector.load %arg3[%c0_10, %c0_11] : memref<72x8xf32, #tpu.memory_space<vmem>>, vector<72x8xf32>
    %cst_12 = arith.constant dense<0.000000e+00> : vector<256x8xf32>
    %38 = tpu.matmul %36, %37, %cst_12 {dimension_numbers = #tpu.dot_dimension_numbers<[1], [0], [0], [1], [0, 0, 1, 1], [], []>} : vector<256x72xf32>, vector<72x8xf32>, vector<256x8xf32> -> vector<256x8xf32>
    %39 = vector.shape_cast %1 : vector<16x16x8xf32> to vector<256x8xf32>
    %40 = arith.addf %38, %39 : vector<256x8xf32>
    %cst_13 = arith.constant 0.000000e+00 : f32
    %41 = vector.broadcast %cst_13 : f32 to vector<256x8xf32>
    %42 = arith.maximumf %40, %41 : vector<256x8xf32>
    %43 = vector.shape_cast %42 : vector<256x8xf32> to vector<16x16x8xf32>
    %c0_14 = arith.constant 0 : index
    %c0_15 = arith.constant 0 : index
    %c0_16 = arith.constant 0 : index
    %c0_17 = arith.constant 0 : index
    %44 = vector.load %arg4[%c0_14, %c0_15, %c0_16, %c0_17] : memref<1x16x16x8xf32, #tpu.memory_space<vmem>>, vector<1x16x16x8xf32>
    %45 = vector.shape_cast %44 : vector<1x16x16x8xf32> to vector<16x16x8xf32>
    %46 = vector.shape_cast %43 : vector<16x16x8xf32> to vector<1x16x16x8xf32>
    tpu.vector_store %arg4[%c0_14, %c0_15, %c0_16, %c0_17], %46 {strides = array<i32>} : memref<1x16x16x8xf32, #tpu.memory_space<vmem>>, vector<1x16x16x8xf32>,
    return
  }
  func.func @transform_0(%arg0: i32) -> (i32, i32, i32, i32) {
    %c0_i32 = arith.constant 0 : i32
    %c0_i32_0 = arith.constant 0 : i32
    %c0_i32_1 = arith.constant 0 : i32
    %c0_i32_2 = arith.constant 0 : i32
    return %arg0, %c0_i32, %c0_i32_0, %c0_i32_1 : i32, i32, i32, i32
  }
  func.func @transform_1(%arg0: i32) -> (i32, i32) {
    %c0_i32 = arith.constant 0 : i32
    %c0_i32_0 = arith.constant 0 : i32
    %c0_i32_1 = arith.constant 0 : i32
    return %c0_i32, %c0_i32_0 : i32, i32
  }
  func.func @transform_2(%arg0: i32) -> (i32, i32) {
    %c0_i32 = arith.constant 0 : i32
    %c0_i32_0 = arith.constant 0 : i32
    %c0_i32_1 = arith.constant 0 : i32
    return %c0_i32, %c0_i32_0 : i32, i32
  }
  func.func @transform_3(%arg0: i32) -> (i32, i32, i32, i32) {
    %c0_i32 = arith.constant 0 : i32
    %c0_i32_0 = arith.constant 0 : i32
    %c0_i32_1 = arith.constant 0 : i32
    %c0_i32_2 = arith.constant 0 : i32
    return %arg0, %c0_i32, %c0_i32_0, %c0_i32_1 : i32, i32, i32, i32
  }
}

</mosaic_0001>

<bundles_post_ra>
// kernel: tpu_custom_call.1
= control target key start
LH: loop header
LB: loop body
LE: loop exit
PB: predicated region body
PF: predicated region fallthrough
CT: control target
= control target key end

     0   :  { %s3743_s12 = smov 0   ;;  %s7668_s0 = inlined_call_operand.vmem [shape: f32[2,16,16,8], index: 0, kind: input, shape index: {}]   ;;  %s7669_s1 = inlined_call_operand.vmem [shape: f32[72,8], index: 1, kind: input, shape index: {}]   ;;  %s7670_s2 = inlined_call_operand.vmem [shape: f32[72,8], index: 2, kind: input, shape index: {}]   ;;  %s7671_s3 = inlined_call_operand.vmem [shape: f32[2,16,16,8], index: 3, kind: output, shape index: {}]  }
   0x1 LB: > { %s3537_s13 = sadd.s32 4294967295, %s3712_s12   ;;  %p3541_p0 = scmp.ge.s32.totalorder %s3712_s12, 1  ;;  %s3712_s12 = sphi %s3743_s12, %s13_s12  }
   0x2   : > { %p137_p1 = scmp.lt.s32.totalorder %s3712_s12, 3 }
   0x4   : > { %p138_p2 = pnand %p3541_p0, %p137_p1 }
   0x6   : > { %141 = sbr.rel (%p138_p2) target bundleno = 1841 (0x731), region = 32 }
   0xb   : > { %vm236_vm0 = vcmask 1040384   ;;  %p161_p3 = scmp.lt.s32.totalorder %s3537_s13, 1  ;;  %v3714_v0 = vmov 0.0   ;;  %vm402_vm1 = vcmask 1046528   ;;  %s3715_s18 = smov 8   ;;  %vm579_vm2 = vcmask 1045504  }
   0xc   : > { %v3751_v1 = vrot.slane %v3714_v0, 7  ;;  %s3716_s19 = smov 16   ;;  %s3717_s20 = smov 24   ;;  %vm1344_vm3 = vcmask 64512   ;;  %vm1410_vm4 = vcmask 195584   ;;  %vm1377_vm5 = vcmask 130048  }
   0xd   : > { %s8799_s13 = smov (!%p161_p3, %s3537_s13), 1  ;;  %s3718_s21 = smov 32   ;;  %vm1443_vm6 = vcmask 261120   ;;  %vm1509_vm7 = vcmask 392192   ;;  %vm1476_vm8 = vcmask 326656   ;;  %vm1542_vm9 = vcmask 457728  }
   0xe   : > { %7914 = vst [vmem:[#allocation2_spill] sm:$0xff] %v3751_v1  ;;  %v3757_v2 = vsel %vm236_vm0, 0.0, %v3751_v1  ;;  %v3761_v3 = vsel %vm236_vm0, %v3751_v1, 0.0  ;;  %v404_v4 = vrot.slane %v3751_v1, 1  ;;  %s3612_s14 = sshll.u32 %s8799_s13, 8  ;;  %s3719_s22 = smov 40  }
   0xf   : > { %7915 = vst [vmem:[#allocation3_spill] sm:$0xff] %v3757_v2  ;;  %v403_v5 = vrot.slane %v3757_v2, 1  ;;  %v406_v6 = vrot.slane %v3761_v3, 1  ;;  %s3772_s17 = scalar_lea.vmem %s7668_s0, %s3612_s14  ;;  %s3720_s23 = smov 48   ;;  %vm1617_vm10 = vcmask 588800   ;;  %vm1575_vm11 = vcmask 523264  }
  0x10   : > { %v173_v9 = vld [vmem:[%s3772_s17 + $0x10] sm:$0xff]  ;;  %v174_v10 = vld [vmem:[%s3772_s17 + $0x18] sm:$0xff]  ;;  %v171_v11 = vld [vmem:[%s3772_s17] sm:$0xff]  ;;  %s3721_s24 = smov 56   ;;  %s3722_s25 = smov 64  }
  0x11   : > { %v405_v7 = vsel %vm402_vm1, %v403_v5, %v404_v4  ;;  %v407_v8 = vsel %vm402_vm1, %v404_v4, %v406_v6  ;;  %v242_v13 = vrot.slane %v173_v9, 7  ;;  %v243_v14 = vrot.slane %v174_v10, 7  ;;  %v172_v15 = vld [vmem:[%s3772_s17 + $0x8] sm:$0xff]  ;;  %v175_v16 = vld [vmem:[%s3772_s17 + $0x20] sm:$0xff]  ;;  %v177_v29 = vld [vmem:[%s3772_s17 + $0x30] sm:$0xff] }
  0x12   : > { %v3779_v12 = vpack.i.bf16 %v407_v8, %v405_v7  ;;  %v176_v17 = vld [vmem:[%s3772_s17 + $0x28] sm:$0xff]  ;;  %v239_v18 = vrot.slane %v171_v11, 7  ;;  %v240_v19 = vrot.slane %v172_v15, 7  ;;  %v245_v20 = vrot.slane %v175_v16, 7  ;;  %v178_v37 = vld [vmem:[%s3772_s17 + $0x38] sm:$0xff]  ;;  %v179_v46 = vld [vmem:[%s3772_s17 + $0x40] sm:$0xff] }
  0x13   : > { %v246_v21 = vrot.slane %v176_v17, 7  ;;  %v3787_v22 = vsel %vm236_vm0, %v242_v13, %v243_v14  ;;  %v3790_v23 = vsel %vm236_vm0, %v243_v14, 0.0  ;;  %v3793_v24 = vsel %vm236_vm0, 0.0, %v242_v13  ;;  %v180_v47 = vld [vmem:[%s3772_s17 + $0x48] sm:$0xff]  ;;  %v181_v56 = vld [vmem:[%s3772_s17 + $0x50] sm:$0xff]  ;;  %v182_v57 = vld [vmem:[%s3772_s17 + $0x58] sm:$0xff] }
  0x14   : > { %7916 = vst [vmem:[#allocation4_spill] sm:$0xff] %v3779_v12  ;;  %3650 = vrot.lane.b32.xlu0 %v3779_v12, %s3715_s18  ;;  %v414_v25 = vrot.slane %v3787_v22, 1  ;;  %v416_v26 = vrot.slane %v3790_v23, 1  ;;  %v3798_v27 = vsel %vm236_vm0, %v239_v18, %v240_v19  ;;  %v3801_v28 = vsel %vm236_vm0, %v240_v19, 0.0  ;;  %v183_v13 = vld [vmem:[%s3772_s17 + $0x60] sm:$0xff]  ;;  %v184_v14 = vld [vmem:[%s3772_s17 + $0x68] sm:$0xff] }
  0x15   : > { %7917 = vst [vmem:[#allocation5_spill] sm:$0xff] %v3798_v27  ;;  %v409_v30 = vrot.slane %v3798_v27, 1  ;;  %v411_v31 = vrot.slane %v3801_v28, 1  ;;  %v3807_v32 = vsel %vm236_vm0, 0.0, %v239_v18  ;;  %v3810_v33 = vsel %vm236_vm0, %v245_v20, %v246_v21 }
  0x16   : > { %7918 = vst [vmem:[#allocation6_spill] sm:$0xff] %v3807_v32  ;;  %v3813_v34 = vsel %vm402_vm1, %v414_v25, %v416_v26  ;;  %v408_v35 = vrot.slane %v3807_v32, 1  ;;  %v3817_v36 = vsel %vm236_vm0, 0.0, %v245_v20  ;;  %v248_v39 = vrot.slane %v177_v29, 7  ;;  %v186_v26 = vld [vmem:[%s3772_s17 + $0x78] sm:$0xff] }
  0x17   : > { %493 = vrot.lane.b32.xlu2 %v3813_v34, %s3715_s18  ;;  %v3823_v38 = vsel %vm402_vm1, %v409_v30, %v411_v31  ;;  %v418_v41 = vrot.slane %v3817_v36, 1  ;;  %v419_v42 = vrot.slane %v3810_v33, 1  ;;  %v413_v43 = vrot.slane %v3793_v24, 1 }
  0x18   : > { %489 = vrot.lane.b32.xlu1 %v3823_v38, %s3715_s18  ;;  %v3828_v40 = vsel %vm402_vm1, %v408_v35, %v409_v30  ;;  %v3834_v44 = vsel %vm236_vm0, %v246_v21, 0.0  ;;  %v249_v45 = vrot.slane %v178_v37, 7  ;;  %v3848_v51 = vsel %vm236_vm0, 0.0, %v248_v39 }
  0x19   : > { %v3841_v48 = vsel %vm402_vm1, %v418_v41, %v419_v42  ;;  %v3844_v49 = vsel %vm402_vm1, %v413_v43, %v414_v25  ;;  %v421_v50 = vrot.slane %v3834_v44, 1  ;;  %v251_v54 = vrot.slane %v179_v46, 7  ;;  %v185_v25 = vld [vmem:[%s3772_s17 + $0x70] sm:$0xff] }
  0x1a   : > { %v3851_v52 = vsel %vm236_vm0, %v248_v39, %v249_v45  ;;  %v3854_v53 = vsel %vm236_vm0, %v249_v45, 0.0  ;;  %v252_v55 = vrot.slane %v180_v47, 7  ;;  %v423_v61 = vrot.slane %v3848_v51, 1  ;;  %v188_v45 = vld [vmem:[%s3772_s17 + $0x88] sm:$0xff] }
  0x1b   : > { %7919 = vst [vmem:[#allocation7_spill] sm:$0xff] %v3851_v52  ;;  %v3863_v58 = vsel %vm402_vm1, %v419_v42, %v421_v50  ;;  %v424_v59 = vrot.slane %v3851_v52, 1  ;;  %v426_v60 = vrot.slane %v3854_v53, 1  ;;  %v3872_v63 = vsel %vm236_vm0, 0.0, %v251_v54  ;;  %v187_v42 = vld [vmem:[%s3772_s17 + $0x80] sm:$0xff] }
  0x1c   : > { %487 = vrot.lane.b32.xlu0 %v3828_v40, %s3715_s18  ;;  %v3869_v62 = vsel %vm236_vm0, %v251_v54, %v252_v55  ;;  %7921 = vst [vmem:[#allocation9_spill] sm:$0xff] %v3872_v63  ;;  %v254_v0 = vrot.slane %v181_v56, 7  ;;  %v255_v4 = vrot.slane %v182_v57, 7  ;;  %v428_v6 = vrot.slane %v3872_v63, 1 }
  0x1d   : > { %7920 = vst [vmem:[#allocation8_spill] sm:$0xff] %v3869_v62  ;;  %v3877_v5 = vsel %vm402_vm1, %v424_v59, %v426_v60  ;;  %v429_v7 = vrot.slane %v3869_v62, 1  ;;  %v3882_v8 = vsel %vm402_vm1, %v423_v61, %v424_v59  ;;  %v3891_v11 = vsel %vm236_vm0, %v252_v55, 0.0 }
  0x1e   : > { %7922 = vst [vmem:[#allocation10_spill] sm:$0xff] %v3882_v8  ;;  %v3885_v9 = vsel %vm236_vm0, %v254_v0, %v255_v4  ;;  %v3888_v10 = vsel %vm236_vm0, 0.0, %v254_v0  ;;  %v431_v18 = vrot.slane %v3891_v11, 1  ;;  %v3906_v19 = vsel %vm236_vm0, %v255_v4, 0.0 }
  0x1f   : > { %495 = vrot.lane.b32.xlu2 %v3841_v48, %s3715_s18  ;;  %7923 = vst [vmem:[#allocation11_spill] sm:$0xff] %v3885_v9  ;;  %v3900_v15 = vsel %vm402_vm1, %v428_v6, %v429_v7  ;;  %v433_v16 = vrot.slane %v3888_v10, 1  ;;  %v434_v17 = vrot.slane %v3885_v9, 1  ;;  %v257_v20 = vrot.slane %v183_v13, 7 }
  0x20   : > { %491 = vrot.lane.b32.xlu1 %v3844_v49, %s3715_s18  ;;  %7924 = vst [vmem:[#allocation12_spill] sm:$0xff] %v3888_v10  ;;  %v258_v21 = vrot.slane %v184_v14, 7  ;;  %v3916_v30 = vsel %vm402_vm1, %v429_v7, %v431_v18  ;;  %v436_v31 = vrot.slane %v3906_v19, 1  ;;  %v260_v39 = vrot.slane %v185_v25, 7  ;;  %v189_v14 = vld [vmem:[%s3772_s17 + $0x90] sm:$0xff] }
  0x21   : > { %7925 = vst [vmem:[#allocation13_spill] sm:$0xff] %v3900_v15  ;;  %v3913_v29 = vsel %vm402_vm1, %v433_v16, %v434_v17  ;;  %v261_v41 = vrot.slane %v186_v26, 7  ;;  %v3927_v43 = vsel %vm236_vm0, 0.0, %v257_v20  ;;  %v263_v54 = vrot.slane %v187_v42, 7  ;;  %v190_v16 = vld [vmem:[%s3772_s17 + $0x98] sm:$0xff] }
  0x22   : > { %7926 = vst [vmem:[#allocation14_spill] sm:$0xff] %v3913_v29  ;;  %v3920_v35 = vsel %vm236_vm0, %v257_v20, %v258_v21  ;;  %v3923_v37 = vsel %vm236_vm0, %v258_v21, 0.0  ;;  %v3935_v46 = vsel %vm402_vm1, %v434_v17, %v436_v31  ;;  %v438_v55 = vrot.slane %v3927_v43, 1 }
  0x23   : > { %7927 = vst [vmem:[#allocation15_spill] sm:$0xff] %v3916_v30  ;;  %v439_v47 = vrot.slane %v3920_v35, 1  ;;  %v441_v50 = vrot.slane %v3923_v37, 1  ;;  %v3941_v56 = vsel %vm236_vm0, %v260_v39, %v261_v41  ;;  %v3944_v57 = vsel %vm236_vm0, 0.0, %v260_v39  ;;  %v191_v39 = vld [vmem:[%s3772_s17 + $0xa0] sm:$0xff] }
  0x24   : > { %497 = vrot.lane.b32.xlu0 %v3863_v58, %s3715_s18  ;;  %7928 = vst [vmem:[#allocation16_spill] sm:$0xff] %v3920_v35  ;;  %v264_v59 = vrot.slane %v188_v45, 7  ;;  %v443_v61 = vrot.slane %v3944_v57, 1  ;;  %v444_v0 = vrot.slane %v3941_v56, 1  ;;  %v3960_v7 = vsel %vm236_vm0, 0.0, %v263_v54 }
  0x25   : > { %7929 = vst [vmem:[#allocation17_spill] sm:$0xff] %v3927_v43  ;;  %v3949_v60 = vsel %vm402_vm1, %v439_v47, %v441_v50  ;;  %v3954_v4 = vsel %vm402_vm1, %v438_v55, %v439_v47  ;;  %v3963_v13 = vsel %vm236_vm0, %v261_v41, 0.0  ;;  %v448_v18 = vrot.slane %v3960_v7, 1  ;;  %v192_v41 = vld [vmem:[%s3772_s17 + $0xa8] sm:$0xff] }
  0x26   : > { %7930 = vst [vmem:[#allocation18_spill] sm:$0xff] %v3935_v46  ;;  %v3957_v6 = vsel %vm236_vm0, %v263_v54, %v264_v59  ;;  %v3972_v17 = vsel %vm402_vm1, %v443_v61, %v444_v0  ;;  %v3977_v21 = vsel %vm236_vm0, %v264_v59, 0.0  ;;  %v446_v25 = vrot.slane %v3963_v13, 1 }
  0x27   : > { %501 = vrot.lane.b32.xlu2 %v3877_v5, %s3715_s18  ;;  %7931 = vst [vmem:[#allocation19_spill] sm:$0xff] %v3949_v60  ;;  %v449_v20 = vrot.slane %v3957_v6, 1  ;;  %v266_v26 = vrot.slane %v189_v14, 7  ;;  %v267_v31 = vrot.slane %v190_v16, 7  ;;  %v451_v42 = vrot.slane %v3977_v21, 1  ;;  %v193_v14 = vld [vmem:[%s3772_s17 + $0xb0] sm:$0xff] }
  0x28   : > { %499 = vrot.lane.b32.xlu1 %v3882_v8, %s3715_s18  ;;  %7932 = vst [vmem:[#allocation20_spill] sm:$0xff] %v3954_v4  ;;  %v269_v47 = vrot.slane %v191_v39, 7  ;;  %v270_v50 = vrot.slane %v192_v41, 7  ;;  %v3989_v54 = vsel %vm402_vm1, %v444_v0, %v446_v25  ;;  %v194_v16 = vld [vmem:[%s3772_s17 + $0xb8] sm:$0xff]  ;;  %v272_v41 = vrot.slane %v193_v14, 7 }
  0x29   : > { %7933 = vst [vmem:[#allocation21_spill] sm:$0xff] %v3972_v17  ;;  %v3986_v45 = vsel %vm402_vm1, %v448_v18, %v449_v20  ;;  %v3992_v55 = vsel %vm236_vm0, %v266_v26, %v267_v31  ;;  %v3995_v59 = vsel %vm236_vm0, %v267_v31, 0.0  ;;  %v3998_v61 = vsel %vm236_vm0, 0.0, %v266_v26 }
  0x2a   : > { %7934 = vst [vmem:[#allocation22_spill] sm:$0xff] %v3986_v45  ;;  %v4005_v18 = vsel %vm402_vm1, %v449_v20, %v451_v42  ;;  %v454_v0 = vrot.slane %v3992_v55, 1  ;;  %v456_v25 = vrot.slane %v3995_v59, 1  ;;  %v4012_v31 = vsel %vm236_vm0, %v269_v47, %v270_v50 }
  0x2b   : > { %7935 = vst [vmem:[#allocation23_spill] sm:$0xff] %v3989_v54  ;;  %v4015_v26 = vsel %vm236_vm0, 0.0, %v269_v47  ;;  %v453_v39 = vrot.slane %v3998_v61, 1  ;;  %v273_v20 = vrot.slane %v194_v16, 7  ;;  %v583_v42 = vrot.slane %v3761_v3, 2 }
  0x2c   : > { %503 = vrot.lane.b32.xlu0 %v3900_v15, %s3715_s18  ;;  %7936 = vst [vmem:[#allocation24_spill] sm:$0xff] %v3992_v55  ;;  %v458_v12 = vrot.slane %v4015_v26, 1  ;;  %v4027_v47 = vsel %vm236_vm0, %v270_v50, 0.0  ;;  %v581_v14 = vrot.slane %v3751_v1, 2 }
  0x2d   : > { %7937 = vst [vmem:[#allocation25_spill] sm:$0xff] %v4005_v18  ;;  %v4032_v3 = vsel %vm402_vm1, %v453_v39, %v454_v0  ;;  %v4035_v16 = vsel %vm236_vm0, %v272_v41, %v273_v20  ;;  %v461_v39 = vrot.slane %v4027_v47, 1 }
  0x2e   : > { %7938 = vst [vmem:[#allocation26_spill] sm:$0xff] %v4012_v31 }
  0x2f   : > { %507 = vrot.lane.b32.xlu2 %v3913_v29, %s3715_s18  ;;  %7939 = vst [vmem:[#allocation27_spill] sm:$0xff] %v4015_v26  ;;  %v200_v29 = vld [vmem:[%s3772_s17 + $0xe8] sm:$0xff] }
  0x30   : > { %505 = vrot.lane.b32.xlu1 %v3916_v30, %s3715_s18  ;;  %7941 = vst [vmem:[#allocation29_spill] sm:$0xff] %v4032_v3 }
  0x31   : > { %7942 = vst [vmem:[#allocation30_spill] sm:$0xff] %v4035_v16 }
  0x34   : > { %509 = vrot.lane.b32.xlu0 %v3935_v46, %s3715_s18 }
  0x37   : > { %513 = vrot.lane.b32.xlu2 %v3949_v60, %s3715_s18  ;;  %v584_v60 = vsel %vm579_vm2, %v581_v14, %v583_v42 }
  0x38   : > { %511 = vrot.lane.b32.xlu1 %v3954_v4, %s3715_s18  ;;  %v196_v4 = vld [vmem:[%s3772_s17 + $0xc8] sm:$0xff] }
  0x3c   : > { %515 = vrot.lane.b32.xlu0 %v3972_v17, %s3715_s18  ;;  %v580_v17 = vrot.slane %v3757_v2, 2  ;;  %v4057_v2 = vsel %vm236_vm0, %v273_v20, 0.0 }
  0x3e   : > { %v582_v50 = vsel %vm579_vm2, %v580_v17, %v581_v14  ;;  %v464_v17 = vrot.slane %v4035_v16, 1  ;;  %v276_v14 = vrot.slane %v196_v4, 7 }
  0x3f   : > { %519 = vrot.lane.b32.xlu2 %v3986_v45, %s3715_s18  ;;  %v4024_v45 = vsel %vm402_vm1, %v454_v0, %v456_v25  ;;  %v195_v25 = vld [vmem:[%s3772_s17 + $0xc0] sm:$0xff]  ;;  %v4050_v1 = vpack.i.bf16 %v584_v60, %v582_v50 }
  0x40   : > { %517 = vrot.lane.b32.xlu1 %v3989_v54, %s3715_s18  ;;  %v459_v54 = vrot.slane %v4012_v31, 1  ;;  %7940 = vst [vmem:[#allocation28_spill] sm:$0xff] %v4024_v45  ;;  %v275_v42 = vrot.slane %v195_v25, 7  ;;  %v4074_v4 = vsel %vm236_vm0, %v276_v14, 0.0 }
  0x41   : > { %7945 = vst [vmem:[#allocation33_spill] sm:$0xff] %v4050_v1 }
  0x42   : > { %v4047_v0 = vsel %vm402_vm1, %v458_v12, %v459_v54  ;;  %v197_v12 = vld [vmem:[%s3772_s17 + $0xd0] sm:$0xff]  ;;  %v4067_v50 = vsel %vm402_vm1, %v459_v54, %v461_v39  ;;  %v4071_v46 = vsel %vm236_vm0, %v275_v42, %v276_v14  ;;  %v4077_v20 = vsel %vm236_vm0, 0.0, %v275_v42 }
  0x43   : > { %7944 = vst [vmem:[#allocation32_spill] sm:$0xff] %v4047_v0  ;;  %v278_v25 = vrot.slane %v197_v12, 7  ;;  %v469_v39 = vrot.slane %v4071_v46, 1  ;;  %v468_v42 = vrot.slane %v4077_v20, 1 }
  0x44   : > { %521 = vrot.lane.b32.xlu0 %v4005_v18, %s3715_s18  ;;  %v4038_v18 = vsel %vm236_vm0, 0.0, %v272_v41  ;;  %7947 = vst [vmem:[#allocation35_spill] sm:$0xff] %v4067_v50 }
  0x45   : > { %7943 = vst [vmem:[#allocation31_spill] sm:$0xff] %v4038_v18  ;;  %v463_v41 = vrot.slane %v4038_v18, 1  ;;  %v4105_v15 = vsel %vm402_vm1, %v468_v42, %v469_v39 }
  0x46   : > { %7948 = vst [vmem:[#allocation36_spill] sm:$0xff] %v4071_v46 }
  0x47   : > { %525 = vrot.lane.b32.xlu2 %v4024_v45, %s3715_s18  ;;  %v198_v45 = vld [vmem:[%s3772_s17 + $0xd8] sm:$0xff]  ;;  %v4064_v60 = vsel %vm402_vm1, %v463_v41, %v464_v17  ;;  %7949 = vst [vmem:[#allocation37_spill] sm:$0xff] %v4077_v20  ;;  %v471_v41 = vrot.slane %v4074_v4, 1 }
  0x48   : > { %523 = vrot.lane.b32.xlu1 %v4032_v3, %s3715_s18  ;;  %7946 = vst [vmem:[#allocation34_spill] sm:$0xff] %v4064_v60  ;;  %v466_v3 = vrot.slane %v4057_v2, 1  ;;  %v279_v30 = vrot.slane %v198_v45, 7  ;;  %v4095_v45 = vsel %vm236_vm0, 0.0, %v278_v25 }
  0x49   : > { %7952 = vst [vmem:[#allocation40_spill] sm:$0xff] %v4095_v45 }
  0x4a   : > { %v4086_v54 = vsel %vm402_vm1, %v464_v17, %v466_v3  ;;  %v4092_v14 = vsel %vm236_vm0, %v278_v25, %v279_v30  ;;  %v4100_v3 = vsel %vm402_vm1, %v469_v39, %v471_v41  ;;  %v473_v17 = vrot.slane %v4095_v45, 1  ;;  %7954 = vst [vmem:[#allocation42_spill] sm:$0xff] %v4105_v15 }
  0x4b   : > { %7950 = vst [vmem:[#allocation38_spill] sm:$0xff] %v4086_v54 }
  0x4c   : > { %527 = vrot.lane.b32.xlu0 %v4047_v0, %s3715_s18  ;;  %v199_v0 = vld [vmem:[%s3772_s17 + $0xe0] sm:$0xff]  ;;  %7951 = vst [vmem:[#allocation39_spill] sm:$0xff] %v4092_v14 }
  0x4d   : > { %v281_v12 = vrot.slane %v199_v0, 7  ;;  %7953 = vst [vmem:[#allocation41_spill] sm:$0xff] %v4100_v3 }
  0x4f   : > { %531 = vrot.lane.b32.xlu2 %v4064_v60, %s3715_s18  ;;  %v282_v60 = vrot.slane %v200_v29, 7  ;;  %v4111_v25 = vsel %vm236_vm0, 0.0, %v281_v12  ;;  %v4114_v29 = vsel %vm236_vm0, %v279_v30, 0.0 }
  0x50   : > { %529 = vrot.lane.b32.xlu1 %v4067_v50, %s3715_s18  ;;  %v474_v50 = vrot.slane %v4092_v14, 1  ;;  %7956 = vst [vmem:[#allocation44_spill] sm:$0xff] %v4111_v25  ;;  %v478_v39 = vrot.slane %v4111_v25, 1  ;;  %v476_v42 = vrot.slane %v4114_v29, 1 }
  0x51   : > { %v4108_v8 = vsel %vm236_vm0, %v281_v12, %v282_v60  ;;  %v4127_v12 = vsel %vm236_vm0, %v282_v60, 0.0 }
  0x52   : > { %7955 = vst [vmem:[#allocation43_spill] sm:$0xff] %v4108_v8  ;;  %v4121_v0 = vsel %vm402_vm1, %v473_v17, %v474_v50  ;;  %v479_v41 = vrot.slane %v4108_v8, 1  ;;  %v4136_v17 = vsel %vm402_vm1, %v474_v50, %v476_v42  ;;  %v588_v50 = vrot.slane %v3801_v28, 2 }
  0x53   : > { %7957 = vst [vmem:[#allocation45_spill] sm:$0xff] %v4121_v0  ;;  %v593_v42 = vrot.slane %v3790_v23, 2 }
  0x54   : > { %533 = vrot.lane.b32.xlu0 %v4086_v54, %s3715_s18  ;;  %v4132_v30 = vsel %vm402_vm1, %v478_v39, %v479_v41  ;;  %7959 = vst [vmem:[#allocation47_spill] sm:$0xff] %v4136_v17 }
  0x55   : > { %7958 = vst [vmem:[#allocation46_spill] sm:$0xff] %v4132_v30 }
  0x57   : > { %537 = vrot.lane.b32.xlu2 %v4100_v3, %s3715_s18  ;;  %v585_v3 = vrot.slane %v3807_v32, 2 }
  0x58   : > { %535 = vrot.lane.b32.xlu1 %v4105_v15, %s3715_s18  ;;  %v481_v15 = vrot.slane %v4127_v12, 1 }
  0x5a   : > { %v4143_v60 = vsel %vm402_vm1, %v479_v41, %v481_v15  ;;  %v591_v41 = vrot.slane %v3787_v22, 2 }
  0x5b   : > { %7960 = vst [vmem:[#allocation48_spill] sm:$0xff] %v4143_v60 }
  0x5c   : > { %539 = vrot.lane.b32.xlu0 %v4121_v0, %s3715_s18  ;;  %v586_v0 = vrot.slane %v3798_v27, 2  ;;  %v4166_v28 = vsel %vm579_vm2, %v591_v41, %v593_v42 }
  0x5d   : > { %7963 = vst [vmem:[#allocation51_spill] sm:$0xff] %v4166_v28 }
  0x5e   : > { %v4150_v39 = vsel %vm579_vm2, %v585_v3, %v586_v0  ;;  %v4158_v15 = vsel %vm579_vm2, %v586_v0, %v588_v50  ;;  %v595_v3 = vrot.slane %v3817_v36, 2  ;;  %v600_v0 = vrot.slane %v3848_v51, 2 }
  0x5f   : > { %543 = vrot.lane.b32.xlu2 %v4132_v30, %s3715_s18  ;;  %7961 = vst [vmem:[#allocation49_spill] sm:$0xff] %v4150_v39  ;;  %v601_v50 = vrot.slane %v3851_v52, 2 }
  0x60   : > { %541 = vrot.lane.b32.xlu1 %v4136_v17, %s3715_s18  ;;  %7962 = vst [vmem:[#allocation50_spill] sm:$0xff] %v4158_v15 }
  0x64   : > { %545 = vrot.lane.b32.xlu0 %v4143_v60, %s3715_s18  ;;  %v590_v60 = vrot.slane %v3793_v24, 2 }
  0x67   : > { %664 = vrot.lane.b32.xlu2 %v4150_v39, %s3716_s19  ;;  %v596_v39 = vrot.slane %v3810_v33, 2 }
  0x68   : > { %3655 = vrot.lane.b32.xlu1 %v4050_v1, %s3716_s19  ;;  %v4171_v1 = vsel %vm579_vm2, %v590_v60, %v591_v41  ;;  %v4188_v60 = vsel %vm579_vm2, %v600_v0, %v601_v50  ;;  %v603_v41 = vrot.slane %v3854_v53, 2  ;;  %v605_v53 = vrot.slane %v3872_v63, 2 }
  0x69   : > { %v4178_v23 = vsel %vm579_vm2, %v595_v3, %v596_v39  ;;  %7966 = vst [vmem:[#allocation54_spill] sm:$0xff] %v4188_v60 }
  0x6a   : > { %7964 = vst [vmem:[#allocation52_spill] sm:$0xff] %v4178_v23  ;;  %v4199_v3 = vsel %vm579_vm2, %v601_v50, %v603_v41  ;;  %v615_v41 = vrot.slane %v3927_v43, 2 }
  0x6b   : > { %7968 = vst [vmem:[#allocation56_spill] sm:$0xff] %v4199_v3 }
  0x6c   : > { %666 = vrot.lane.b32.xlu0 %v4158_v15, %s3716_s19  ;;  %v598_v15 = vrot.slane %v3834_v44, 2  ;;  %v606_v44 = vrot.slane %v3869_v62, 2 }
  0x6e   : > { %v4214_v50 = vsel %vm579_vm2, %v605_v53, %v606_v44  ;;  %v618_v53 = vrot.slane %v3923_v37, 2  ;;  %v620_v37 = vrot.slane %v3944_v57, 2 }
  0x6f   : > { %670 = vrot.lane.b32.xlu2 %v4166_v28, %s3716_s19  ;;  %v4192_v28 = vsel %vm579_vm2, %v596_v39, %v598_v15  ;;  %v610_v15 = vrot.slane %v3888_v10, 2  ;;  %7971 = vst [vmem:[#allocation59_spill] sm:$0xff] %v4214_v50 }
  0x70   : > { %668 = vrot.lane.b32.xlu1 %v4171_v1, %s3716_s19  ;;  %7967 = vst [vmem:[#allocation55_spill] sm:$0xff] %v4192_v28 }
  0x71   : > { %v4182_v42 = vpop.permute.xlu2 %493 }
  0x72   : > { %7965 = vst [vmem:[#allocation53_spill] sm:$0xff] %v4182_v42  ;;  %v608_v42 = vrot.slane %v3891_v11, 2 }
  0x74   : > { %672 = vrot.lane.b32.xlu0 %v4178_v23, %s3716_s19  ;;  %v4209_v39 = vsel %vm579_vm2, %v606_v44, %v608_v42  ;;  %v616_v42 = vrot.slane %v3920_v35, 2 }
  0x75   : > { %7970 = vst [vmem:[#allocation58_spill] sm:$0xff] %v4209_v39 }
  0x76   : > { %v4231_v44 = vsel %vm579_vm2, %v615_v41, %v616_v42  ;;  %v623_v41 = vrot.slane %v3963_v13, 2 }
  0x77   : > { %676 = vrot.lane.b32.xlu2 %v4188_v60, %s3716_s19  ;;  %v611_v60 = vrot.slane %v3885_v9, 2  ;;  %7974 = vst [vmem:[#allocation62_spill] sm:$0xff] %v4231_v44 }
  0x78   : > { %674 = vrot.lane.b32.xlu1 %v4192_v28, %s3716_s19 }
  0x79   : > { %v4203_v0 = vpop.permute.xlu2 %495  ;;  %v4221_v11 = vsel %vm579_vm2, %v610_v15, %v611_v60 }
  0x7a   : > { %7969 = vst [vmem:[#allocation57_spill] sm:$0xff] %v4203_v0 }
  0x7b   : > { %7972 = vst [vmem:[#allocation60_spill] sm:$0xff] %v4221_v11 }
  0x7c   : > { %678 = vrot.lane.b32.xlu0 %v4199_v3, %s3716_s19  ;;  %v613_v3 = vrot.slane %v3906_v19, 2  ;;  %v4244_v19 = vsel %vm579_vm2, %v616_v42, %v618_v53  ;;  %v626_v42 = vrot.slane %v3957_v6, 2 }
  0x7d   : > { %7977 = vst [vmem:[#allocation65_spill] sm:$0xff] %v4244_v19 }
  0x7e   : > { %v4237_v15 = vsel %vm579_vm2, %v611_v60, %v613_v3  ;;  %v625_v3 = vrot.slane %v3960_v7, 2 }
  0x7f   : > { %682 = vrot.lane.b32.xlu2 %v4209_v39, %s3716_s19  ;;  %7976 = vst [vmem:[#allocation64_spill] sm:$0xff] %v4237_v15 }
  0x80   : > { %680 = vrot.lane.b32.xlu1 %v4214_v50, %s3716_s19 }
  0x81   : > { %v4225_v0 = vpop.permute.xlu2 %501 }
  0x82   : > { %7973 = vst [vmem:[#allocation61_spill] sm:$0xff] %v4225_v0  ;;  %v621_v0 = vrot.slane %v3941_v56, 2 }
  0x84   : > { %684 = vrot.lane.b32.xlu0 %v4221_v11, %s3716_s19  ;;  %v4256_v60 = vsel %vm579_vm2, %v621_v0, %v623_v41  ;;  %v4263_v13 = vsel %vm579_vm2, %v620_v37, %v621_v0  ;;  %v630_v41 = vrot.slane %v3998_v61, 2  ;;  %v633_v37 = vrot.slane %v3995_v59, 2 }
  0x85   : > { %7980 = vst [vmem:[#allocation68_spill] sm:$0xff] %v4256_v60  ;;  %v635_v59 = vrot.slane %v4015_v26, 2 }
  0x86   : > { %v4234_v39 = vpop.permute.xlu0 %3650  ;;  %7982 = vst [vmem:[#allocation70_spill] sm:$0xff] %v4263_v13 }
  0x87   : > { %7975 = vst [vmem:[#allocation63_spill] sm:$0xff] %v4234_v39  ;;  %688 = vrot.lane.b32.xlu2 %v4231_v44, %s3716_s19 }
  0x88   : > { %686 = vrot.lane.b32.xlu1 %v4237_v15, %s3716_s19 }
  0x89   : > { %v4248_v11 = vpop.permute.xlu2 %507 }
  0x8a   : > { %7978 = vst [vmem:[#allocation66_spill] sm:$0xff] %v4248_v11  ;;  %v4251_v39 = vpop.permute.xlu1 %489  ;;  %v4270_v11 = vsel %vm579_vm2, %v625_v3, %v626_v42 }
  0x8b   : > { %7979 = vst [vmem:[#allocation67_spill] sm:$0xff] %v4251_v39  ;;  %v631_v39 = vrot.slane %v3992_v55, 2 }
  0x8c   : > { %690 = vrot.lane.b32.xlu0 %v4244_v19, %s3716_s19  ;;  %7983 = vst [vmem:[#allocation71_spill] sm:$0xff] %v4270_v11 }
  0x8d   : > { %v4282_v0 = vsel %vm579_vm2, %v630_v41, %v631_v39  ;;  %v638_v41 = vrot.slane %v4027_v47, 2 }
  0x8e   : > { %v4260_v53 = vpop.permute.xlu0 %487  ;;  %7986 = vst [vmem:[#allocation74_spill] sm:$0xff] %v4282_v0 }
  0x8f   : > { %7981 = vst [vmem:[#allocation69_spill] sm:$0xff] %v4260_v53  ;;  %694 = vrot.lane.b32.xlu2 %v4256_v60, %s3716_s19  ;;  %v628_v53 = vrot.slane %v3977_v21, 2  ;;  %v4295_v21 = vsel %vm579_vm2, %v631_v39, %v633_v37  ;;  %v641_v39 = vrot.slane %v4035_v16, 2 }
  0x90   : > { %692 = vrot.lane.b32.xlu1 %v4263_v13, %s3716_s19  ;;  %7989 = vst [vmem:[#allocation77_spill] sm:$0xff] %v4295_v21 }
  0x91   : > { %v4274_v19 = vpop.permute.xlu2 %513  ;;  %v4288_v60 = vsel %vm579_vm2, %v626_v42, %v628_v53  ;;  %v640_v53 = vrot.slane %v4038_v18, 2 }
  0x92   : > { %7984 = vst [vmem:[#allocation72_spill] sm:$0xff] %v4274_v19  ;;  %v4277_v44 = vpop.permute.xlu1 %491  ;;  %v636_v19 = vrot.slane %v4012_v31, 2 }
  0x93   : > { %7985 = vst [vmem:[#allocation73_spill] sm:$0xff] %v4277_v44 }
  0x94   : > { %696 = vrot.lane.b32.xlu0 %v4270_v11, %s3716_s19  ;;  %7988 = vst [vmem:[#allocation76_spill] sm:$0xff] %v4288_v60  ;;  %v4307_v42 = vsel %vm579_vm2, %v636_v19, %v638_v41  ;;  %v4314_v47 = vsel %vm579_vm2, %v635_v59, %v636_v19  ;;  %v645_v41 = vrot.slane %v4077_v20, 2  ;;  %v648_v59 = vrot.slane %v4074_v4, 2 }
  0x95   : > { %7992 = vst [vmem:[#allocation80_spill] sm:$0xff] %v4307_v42  ;;  %v650_v4 = vrot.slane %v4095_v45, 2 }
  0x96   : > { %v4285_v3 = vpop.permute.xlu0 %497 }
  0x97   : > { %7987 = vst [vmem:[#allocation75_spill] sm:$0xff] %v4285_v3  ;;  %700 = vrot.lane.b32.xlu2 %v4282_v0, %s3716_s19 }
  0x98   : > { %698 = vrot.lane.b32.xlu1 %v4288_v60, %s3716_s19 }
  0x99   : > { %v4299_v44 = vpop.permute.xlu2 %519 }
  0x9a   : > { %7990 = vst [vmem:[#allocation78_spill] sm:$0xff] %v4299_v44  ;;  %v4302_v3 = vpop.permute.xlu1 %499  ;;  %v646_v44 = vrot.slane %v4071_v46, 2 }
  0x9b   : > { %7991 = vst [vmem:[#allocation79_spill] sm:$0xff] %v4302_v3  ;;  %v4321_v3 = vsel %vm579_vm2, %v640_v53, %v641_v39 }
  0x9c   : > { %702 = vrot.lane.b32.xlu0 %v4295_v21, %s3716_s19  ;;  %v4333_v19 = vsel %vm579_vm2, %v645_v41, %v646_v44  ;;  %v653_v41 = vrot.slane %v4114_v29, 2 }
  0x9d   : > { %7996 = vst [vmem:[#allocation84_spill] sm:$0xff] %v4333_v19 }
  0x9e   : > { %v4311_v37 = vpop.permute.xlu0 %503 }
  0x9f   : > { %7993 = vst [vmem:[#allocation81_spill] sm:$0xff] %v4311_v37  ;;  %706 = vrot.lane.b32.xlu2 %v4307_v42, %s3716_s19  ;;  %v643_v37 = vrot.slane %v4057_v2, 2  ;;  %v4346_v2 = vsel %vm579_vm2, %v646_v44, %v648_v59  ;;  %v656_v44 = vrot.slane %v4108_v8, 2 }
  0xa0   : > { %704 = vrot.lane.b32.xlu1 %v4314_v47, %s3716_s19  ;;  %7999 = vst [vmem:[#allocation87_spill] sm:$0xff] %v4346_v2 }
  0xa1   : > { %v4325_v21 = vpop.permute.xlu2 %525  ;;  %v4339_v42 = vsel %vm579_vm2, %v641_v39, %v643_v37  ;;  %v655_v37 = vrot.slane %v4111_v25, 2 }
  0xa2   : > { %7994 = vst [vmem:[#allocation82_spill] sm:$0xff] %v4325_v21  ;;  %v4328_v0 = vpop.permute.xlu1 %505 }
  0xa3   : > { %7995 = vst [vmem:[#allocation83_spill] sm:$0xff] %v4328_v0  ;;  %v651_v0 = vrot.slane %v4092_v14, 2 }
  0xa4   : > { %708 = vrot.lane.b32.xlu0 %v4321_v3, %s3716_s19  ;;  %7998 = vst [vmem:[#allocation86_spill] sm:$0xff] %v4339_v42 }
  0xa5   : > { %v4358_v39 = vsel %vm579_vm2, %v651_v0, %v653_v41  ;;  %v4365_v29 = vsel %vm579_vm2, %v650_v4, %v651_v0 }
  0xa6   : > { %v4336_v53 = vpop.permute.xlu0 %509  ;;  %8002 = vst [vmem:[#allocation90_spill] sm:$0xff] %v4358_v39 }
  0xa7   : > { %7997 = vst [vmem:[#allocation85_spill] sm:$0xff] %v4336_v53  ;;  %712 = vrot.lane.b32.xlu2 %v4333_v19, %s3716_s19 }
  0xa8   : > { %710 = vrot.lane.b32.xlu1 %v4339_v42, %s3716_s19  ;;  %8004 = vst [vmem:[#allocation92_spill] sm:$0xff] %v4365_v29 }
  0xa9   : > { %v4350_v21 = vpop.permute.xlu2 %531 }
  0xaa   : > { %8000 = vst [vmem:[#allocation88_spill] sm:$0xff] %v4350_v21  ;;  %v4353_v53 = vpop.permute.xlu1 %511  ;;  %v658_v21 = vrot.slane %v4127_v12, 2 }
  0xab   : > { %8001 = vst [vmem:[#allocation89_spill] sm:$0xff] %v4353_v53  ;;  %v4372_v53 = vsel %vm579_vm2, %v655_v37, %v656_v44 }
  0xac   : > { %714 = vrot.lane.b32.xlu0 %v4346_v2, %s3716_s19  ;;  %v4384_v4 = vsel %vm579_vm2, %v656_v44, %v658_v21 }
  0xae   : > { %v4362_v59 = vpop.permute.xlu0 %515 }
  0xaf   : > { %8003 = vst [vmem:[#allocation91_spill] sm:$0xff] %v4362_v59  ;;  %718 = vrot.lane.b32.xlu2 %v4358_v39, %s3716_s19 }
  0xb0   : > { %716 = vrot.lane.b32.xlu1 %v4365_v29, %s3716_s19 }
  0xb1   : > { %v4374_v41 = vpop.permute.xlu2 %537 }
  0xb2   : > { %8005 = vst [vmem:[#allocation93_spill] sm:$0xff] %v4374_v41  ;;  %v4377_v2 = vpop.permute.xlu1 %517 }
  0xb3   : > { %8006 = vst [vmem:[#allocation94_spill] sm:$0xff] %v4377_v2 }
  0xb4   : > { %720 = vrot.lane.b32.xlu0 %v4372_v53, %s3716_s19 }
  0xb6   : > { %v4381_v0 = vpop.permute.xlu0 %521 }
  0xb7   : > { %8007 = vst [vmem:[#allocation95_spill] sm:$0xff] %v4381_v0  ;;  %757 = vrot.lane.b32.xlu2 %v3807_v32, %s3717_s20 }
  0xb8   : > { %722 = vrot.lane.b32.xlu1 %v4384_v4, %s3716_s19 }
  0xb9   : > { %v4390_v37 = vpop.permute.xlu2 %543 }
  0xba   : > { %8008 = vst [vmem:[#allocation96_spill] sm:$0xff] %v4390_v37  ;;  %v4392_v12 = vpop.permute.xlu1 %523 }
  0xbb   : > { %8009 = vst [vmem:[#allocation97_spill] sm:$0xff] %v4392_v12 }
  0xbc   : > { %759 = vrot.lane.b32.xlu0 %v3798_v27, %s3717_s20 }
  0xbe   : > { %v4396_v41 = vpop.permute.xlu0 %527 }
  0xbf   : > { %8010 = vst [vmem:[#allocation98_spill] sm:$0xff] %v4396_v41  ;;  %763 = vrot.lane.b32.xlu2 %v3787_v22, %s3717_s20 }
  0xc0   : > { %761 = vrot.lane.b32.xlu1 %v3793_v24, %s3717_s20 }
  0xc1   : > { %v4402_v21 = vpop.permute.xlu2 %664 }
  0xc2   : > { %8011 = vst [vmem:[#allocation99_spill] sm:$0xff] %v4402_v21  ;;  %v4404_v44 = vpop.permute.xlu1 %529  ;;  %v4502_v21 = vld [vmem:[%s3772_s17 + $0xf8] sm:$0xff] }
  0xc3   : > { %8012 = vst [vmem:[#allocation100_spill] sm:$0xff] %v4404_v44 }
  0xc4   : > { %765 = vrot.lane.b32.xlu0 %v3817_v36, %s3717_s20 }
  0xc6   : > { %v4408_v37 = vpop.permute.xlu0 %533 }
  0xc7   : > { %8013 = vst [vmem:[#allocation101_spill] sm:$0xff] %v4408_v37  ;;  %769 = vrot.lane.b32.xlu2 %v3848_v51, %s3717_s20 }
  0xc8   : > { %767 = vrot.lane.b32.xlu1 %v3810_v33, %s3717_s20 }
  0xc9   : > { %v4414_v41 = vpop.permute.xlu2 %670 }
  0xca   : > { %8014 = vst [vmem:[#allocation102_spill] sm:$0xff] %v4414_v41  ;;  %v4416_v12 = vpop.permute.xlu1 %535 }
  0xcb   : > { %8015 = vst [vmem:[#allocation103_spill] sm:$0xff] %v4416_v12 }
  0xcc   : > { %771 = vrot.lane.b32.xlu0 %v3851_v52, %s3717_s20 }
  0xce   : > { %v4420_v0 = vpop.permute.xlu0 %539 }
  0xcf   : > { %8016 = vst [vmem:[#allocation104_spill] sm:$0xff] %v4420_v0  ;;  %775 = vrot.lane.b32.xlu2 %v3869_v62, %s3717_s20 }
  0xd0   : > { %773 = vrot.lane.b32.xlu1 %v3872_v63, %s3717_s20 }
  0xd1   : > { %v4426_v37 = vpop.permute.xlu2 %676 }
  0xd2   : > { %8017 = vst [vmem:[#allocation105_spill] sm:$0xff] %v4426_v37  ;;  %v4428_v44 = vpop.permute.xlu1 %541 }
  0xd3   : > { %8018 = vst [vmem:[#allocation106_spill] sm:$0xff] %v4428_v44 }
  0xd4   : > { %777 = vrot.lane.b32.xlu0 %v3888_v10, %s3717_s20 }
  0xd6   : > { %v4432_v2 = vpop.permute.xlu0 %545 }
  0xd7   : > { %8019 = vst [vmem:[#allocation107_spill] sm:$0xff] %v4432_v2  ;;  %781 = vrot.lane.b32.xlu2 %v3927_v43, %s3717_s20 }
  0xd8   : > { %779 = vrot.lane.b32.xlu1 %v3885_v9, %s3717_s20 }
  0xd9   : > { %v4438_v0 = vpop.permute.xlu2 %682 }
  0xda   : > { %8020 = vst [vmem:[#allocation108_spill] sm:$0xff] %v4438_v0  ;;  %v4440_v12 = vpop.permute.xlu1 %3655 }
  0xdb   : > { %8021 = vst [vmem:[#allocation109_spill] sm:$0xff] %v4440_v12 }
  0xdc   : > { %783 = vrot.lane.b32.xlu0 %v3920_v35, %s3717_s20 }
  0xde   : > { %v4444_v37 = vpop.permute.xlu0 %666 }
  0xdf   : > { %8022 = vst [vmem:[#allocation110_spill] sm:$0xff] %v4444_v37  ;;  %787 = vrot.lane.b32.xlu2 %v3941_v56, %s3717_s20 }
  0xe0   : > { %785 = vrot.lane.b32.xlu1 %v3944_v57, %s3717_s20 }
  0xe1   : > { %v4450_v2 = vpop.permute.xlu2 %688 }
  0xe2   : > { %8023 = vst [vmem:[#allocation111_spill] sm:$0xff] %v4450_v2  ;;  %v4452_v44 = vpop.permute.xlu1 %668 }
  0xe3   : > { %8024 = vst [vmem:[#allocation112_spill] sm:$0xff] %v4452_v44 }
  0xe4   : > { %789 = vrot.lane.b32.xlu0 %v3960_v7, %s3717_s20 }
  0xe6   : > { %v4456_v0 = vpop.permute.xlu0 %672 }
  0xe7   : > { %8025 = vst [vmem:[#allocation113_spill] sm:$0xff] %v4456_v0  ;;  %793 = vrot.lane.b32.xlu2 %v3998_v61, %s3717_s20 }
  0xe8   : > { %791 = vrot.lane.b32.xlu1 %v3957_v6, %s3717_s20 }
  0xe9   : > { %v4462_v41 = vpop.permute.xlu2 %694 }
  0xea   : > { %8026 = vst [vmem:[#allocation114_spill] sm:$0xff] %v4462_v41  ;;  %v4464_v37 = vpop.permute.xlu1 %674 }
  0xeb   : > { %8027 = vst [vmem:[#allocation115_spill] sm:$0xff] %v4464_v37 }
  0xec   : > { %795 = vrot.lane.b32.xlu0 %v3992_v55, %s3717_s20 }
  0xee   : > { %v4468_v2 = vpop.permute.xlu0 %678 }
  0xef   : > { %8028 = vst [vmem:[#allocation116_spill] sm:$0xff] %v4468_v2  ;;  %799 = vrot.lane.b32.xlu2 %v4012_v31, %s3717_s20 }
  0xf0   : > { %797 = vrot.lane.b32.xlu1 %v4015_v26, %s3717_s20 }
  0xf1   : > { %v4474_v0 = vpop.permute.xlu2 %700 }
  0xf2   : > { %8029 = vst [vmem:[#allocation117_spill] sm:$0xff] %v4474_v0  ;;  %v4476_v44 = vpop.permute.xlu1 %680 }
  0xf3   : > { %8030 = vst [vmem:[#allocation118_spill] sm:$0xff] %v4476_v44  ;;  %v201_v44 = vld [vmem:[%s3772_s17 + $0xf0] sm:$0xff] }
  0xf4   : > { %801 = vrot.lane.b32.xlu0 %v4038_v18, %s3717_s20 }
  0xf6   : > { %v4480_v37 = vpop.permute.xlu0 %684 }
  0xf7   : > { %8031 = vst [vmem:[#allocation119_spill] sm:$0xff] %v4480_v37  ;;  %805 = vrot.lane.b32.xlu2 %v4077_v20, %s3717_s20  ;;  %v284_v37 = vrot.slane %v201_v44, 7 }
  0xf8   : > { %803 = vrot.lane.b32.xlu1 %v4035_v16, %s3717_s20 }
  0xf9   : > { %v4486_v2 = vpop.permute.xlu2 %706 }
  0xfa   : > { %8032 = vst [vmem:[#allocation120_spill] sm:$0xff] %v4486_v2  ;;  %v4488_v41 = vpop.permute.xlu1 %686 }
  0xfb   : > { %8033 = vst [vmem:[#allocation121_spill] sm:$0xff] %v4488_v41  ;;  %v4509_v41 = vsel %vm236_vm0, 0.0, %v284_v37 }
  0xfc   : > { %807 = vrot.lane.b32.xlu0 %v4071_v46, %s3717_s20 }
  0xfe   : > { %v4492_v0 = vpop.permute.xlu0 %690 }
  0xff   : > { %8034 = vst [vmem:[#allocation122_spill] sm:$0xff] %v4492_v0  ;;  %811 = vrot.lane.b32.xlu2 %v4092_v14, %s3717_s20  ;;  %v7747_v0 = vrot.slane %v4502_v21, 7 }
 0x100   : > { %809 = vrot.lane.b32.xlu1 %v4095_v45, %s3717_s20 }
 0x101   : > { %v4499_v27 = vpop.permute.xlu2 %712  ;;  %v4521_v44 = vsel %vm236_vm0, %v284_v37, %v7747_v0 }
 0x102   : > { %8035 = vst [vmem:[#allocation123_spill] sm:$0xff] %v4499_v27  ;;  %v4504_v2 = vpop.permute.xlu1 %692 }
 0x103   : > { %8036 = vst [vmem:[#allocation124_spill] sm:$0xff] %v4504_v2 }
 0x104   : > { %813 = vrot.lane.b32.xlu0 %v4111_v25, %s3717_s20 }
 0x106   : > { %v4512_v32 = vpop.permute.xlu0 %696 }
 0x107   : > { %8037 = vst [vmem:[#allocation125_spill] sm:$0xff] %v4512_v32  ;;  %817 = vrot.lane.b32.xlu2 %v4509_v41, %s3717_s20 }
 0x108   : > { %815 = vrot.lane.b32.xlu1 %v4108_v8, %s3717_s20 }
 0x109   : > { %v4523_v27 = vpop.permute.xlu2 %718 }
 0x10a   : > { %8038 = vst [vmem:[#allocation126_spill] sm:$0xff] %v4523_v27  ;;  %v4525_v2 = vpop.permute.xlu1 %698 }
 0x10b   : > { %8039 = vst [vmem:[#allocation127_spill] sm:$0xff] %v4525_v2  ;;  %v8050_v2 = vld [vmem:[#allocation13_spill] sm:$0xff] }
 0x10c   : > { %819 = vrot.lane.b32.xlu0 %v4521_v44, %s3717_s20 }
 0x10e   : > { %v4529_v59 = vpop.permute.xlu0 %702 }
 0x10f   : > { %8040 = vst [vmem:[#allocation128_spill] sm:$0xff] %v4529_v59  ;;  %861 = vrot.lane.b32.xlu2 %v3823_v38, %s3718_s21 }
 0x110   : > { %859 = vrot.lane.b32.xlu1 %v3828_v40, %s3718_s21 }
 0x111   : > { %v4535_v32 = vpop.permute.xlu2 %757 }
 0x112   : > { %8041 = vst [vmem:[#allocation129_spill] sm:$0xff] %v4535_v32  ;;  %v4537_v37 = vpop.permute.xlu1 %704 }
 0x113   : > { %8042 = vst [vmem:[#allocation130_spill] sm:$0xff] %v4537_v37 }
 0x114   : > { %863 = vrot.lane.b32.xlu0 %v3844_v49, %s3718_s21 }
 0x116   : > { %v4541_v0 = vpop.permute.xlu0 %708 }
 0x117   : > { %8043 = vst [vmem:[#allocation131_spill] sm:$0xff] %v4541_v0  ;;  %867 = vrot.lane.b32.xlu2 %v3841_v48, %s3718_s21  ;;  %v8047_v0 = vld [vmem:[#allocation10_spill] sm:$0xff] }
 0x118   : > { %865 = vrot.lane.b32.xlu1 %v3813_v34, %s3718_s21 }
 0x119   : > { %v4547_v27 = vpop.permute.xlu2 %763 }
 0x11a   : > { %8044 = vst [vmem:[#allocation132_spill] sm:$0xff] %v4547_v27  ;;  %v4549_v38 = vpop.permute.xlu1 %710 }
 0x11b   : > { %8045 = vst [vmem:[#allocation133_spill] sm:$0xff] %v4549_v38  ;;  %v8052_v38 = vld [vmem:[#allocation14_spill] sm:$0xff] }
 0x11c   : > { %869 = vrot.lane.b32.xlu0 %v3863_v58, %s3718_s21 }
 0x11e   : > { %v4553_v40 = vpop.permute.xlu0 %714 }
 0x11f   : > { %8046 = vst [vmem:[#allocation134_spill] sm:$0xff] %v4553_v40  ;;  %873 = vrot.lane.b32.xlu2 %v3877_v5, %s3718_s21  ;;  %v8053_v40 = vld [vmem:[#allocation15_spill] sm:$0xff] }
 0x120   : > { %871 = vrot.lane.b32.xlu1 %v8047_v0, %s3718_s21  ;;  %v8056_v0 = vld [vmem:[#allocation18_spill] sm:$0xff] }
 0x121   : > { %v4559_v37 = vpop.permute.xlu2 %769 }
 0x122   : > { %8048 = vst [vmem:[#allocation135_spill] sm:$0xff] %v4559_v37  ;;  %v4561_v59 = vpop.permute.xlu1 %716 }
 0x123   : > { %8049 = vst [vmem:[#allocation136_spill] sm:$0xff] %v4561_v59  ;;  %v8058_v59 = vld [vmem:[#allocation19_spill] sm:$0xff] }
 0x124   : > { %875 = vrot.lane.b32.xlu0 %v8050_v2, %s3718_s21 }
 0x126   : > { %v4565_v27 = vpop.permute.xlu0 %720 }
 0x127   : > { %8051 = vst [vmem:[#allocation137_spill] sm:$0xff] %v4565_v27  ;;  %879 = vrot.lane.b32.xlu2 %v8052_v38, %s3718_s21  ;;  %v8059_v27 = vld [vmem:[#allocation20_spill] sm:$0xff] }
 0x128   : > { %877 = vrot.lane.b32.xlu1 %v8053_v40, %s3718_s21  ;;  %v8062_v40 = vld [vmem:[#allocation21_spill] sm:$0xff] }
 0x129   : > { %v4571_v32 = vpop.permute.xlu2 %775 }
 0x12a   : > { %8054 = vst [vmem:[#allocation138_spill] sm:$0xff] %v4571_v32  ;;  %v4573_v12 = vpop.permute.xlu1 %722 }
 0x12b   : > { %8055 = vst [vmem:[#allocation139_spill] sm:$0xff] %v4573_v12  ;;  %v8064_v12 = vld [vmem:[#allocation22_spill] sm:$0xff] }
 0x12c   : > { %881 = vrot.lane.b32.xlu0 %v8056_v0, %s3718_s21 }
 0x12e   : > { %v4577_v37 = vpop.permute.xlu0 %759 }
 0x12f   : > { %8057 = vst [vmem:[#allocation140_spill] sm:$0xff] %v4577_v37  ;;  %885 = vrot.lane.b32.xlu2 %v8058_v59, %s3718_s21  ;;  %v8065_v37 = vld [vmem:[#allocation23_spill] sm:$0xff] }
 0x130   : > { %883 = vrot.lane.b32.xlu1 %v8059_v27, %s3718_s21  ;;  %v8068_v27 = vld [vmem:[#allocation25_spill] sm:$0xff] }
 0x131   : > { %v4583_v2 = vpop.permute.xlu2 %781 }
 0x132   : > { %8060 = vst [vmem:[#allocation141_spill] sm:$0xff] %v4583_v2  ;;  %v4585_v38 = vpop.permute.xlu1 %761 }
 0x133   : > { %8061 = vst [vmem:[#allocation142_spill] sm:$0xff] %v4585_v38  ;;  %v8070_v38 = vld [vmem:[#allocation28_spill] sm:$0xff] }
 0x134   : > { %887 = vrot.lane.b32.xlu0 %v8062_v40, %s3718_s21 }
 0x136   : > { %v4589_v32 = vpop.permute.xlu0 %765 }
 0x137   : > { %8063 = vst [vmem:[#allocation143_spill] sm:$0xff] %v4589_v32  ;;  %891 = vrot.lane.b32.xlu2 %v8064_v12, %s3718_s21  ;;  %v8071_v32 = vld [vmem:[#allocation29_spill] sm:$0xff] }
 0x138   : > { %889 = vrot.lane.b32.xlu1 %v8065_v37, %s3718_s21  ;;  %v8074_v37 = vld [vmem:[#allocation32_spill] sm:$0xff] }
 0x139   : > { %v4595_v0 = vpop.permute.xlu2 %787 }
 0x13a   : > { %8066 = vst [vmem:[#allocation144_spill] sm:$0xff] %v4595_v0  ;;  %v4597_v59 = vpop.permute.xlu1 %767 }
 0x13b   : > { %8067 = vst [vmem:[#allocation145_spill] sm:$0xff] %v4597_v59  ;;  %v8076_v59 = vld [vmem:[#allocation34_spill] sm:$0xff] }
 0x13c   : > { %893 = vrot.lane.b32.xlu0 %v8068_v27, %s3718_s21 }
 0x13e   : > { %v4601_v2 = vpop.permute.xlu0 %771 }
 0x13f   : > { %8069 = vst [vmem:[#allocation146_spill] sm:$0xff] %v4601_v2  ;;  %897 = vrot.lane.b32.xlu2 %v8070_v38, %s3718_s21  ;;  %v8077_v2 = vld [vmem:[#allocation35_spill] sm:$0xff] }
 0x140   : > { %895 = vrot.lane.b32.xlu1 %v8071_v32, %s3718_s21 }
 0x141   : > { %v4607_v40 = vpop.permute.xlu2 %793 }
 0x142   : > { %8072 = vst [vmem:[#allocation29_spill] sm:$0xff] %v4607_v40  ;;  %v4609_v12 = vpop.permute.xlu1 %773 }
 0x143   : > { %8073 = vst [vmem:[#allocation147_spill] sm:$0xff] %v4609_v12  ;;  %v8081_v12 = vld [vmem:[#allocation41_spill] sm:$0xff] }
 0x144   : > { %899 = vrot.lane.b32.xlu0 %v8074_v37, %s3718_s21 }
 0x146   : > { %v4613_v0 = vpop.permute.xlu0 %777 }
 0x147   : > { %8075 = vst [vmem:[#allocation148_spill] sm:$0xff] %v4613_v0  ;;  %903 = vrot.lane.b32.xlu2 %v8076_v59, %s3718_s21  ;;  %v8082_v0 = vld [vmem:[#allocation42_spill] sm:$0xff] }
 0x148   : > { %901 = vrot.lane.b32.xlu1 %v8077_v2, %s3718_s21  ;;  %v8085_v2 = vld [vmem:[#allocation45_spill] sm:$0xff] }
 0x149   : > { %v4619_v27 = vpop.permute.xlu2 %799 }
 0x14a   : > { %8078 = vst [vmem:[#allocation149_spill] sm:$0xff] %v4619_v27  ;;  %v4621_v38 = vpop.permute.xlu1 %779 }
 0x14b   : > { %8079 = vst [vmem:[#allocation150_spill] sm:$0xff] %v4621_v38  ;;  %v8087_v38 = vrot.slane %v4502_v21, 7  ;;  %v8090_v21 = vld [vmem:[#allocation48_spill] sm:$0xff] }
 0x14c   : > { %905 = vrot.lane.b32.xlu0 %v4086_v54, %s3718_s21 }
 0x14d   : > { %v4642_v54 = vsel %vm236_vm0, %v8087_v38, 0.0 }
 0x14e   : > { %v4625_v40 = vpop.permute.xlu0 %783 }
 0x14f   : > { %8080 = vst [vmem:[#allocation151_spill] sm:$0xff] %v4625_v40  ;;  %909 = vrot.lane.b32.xlu2 %v8081_v12, %s3718_s21  ;;  %v855_v40 = vrot.slane %v4521_v44, 1 }
 0x150   : > { %907 = vrot.lane.b32.xlu1 %v8082_v0, %s3718_s21 }
 0x151   : > { %v4631_v37 = vpop.permute.xlu2 %805 }
 0x152   : > { %8083 = vst [vmem:[#allocation41_spill] sm:$0xff] %v4631_v37  ;;  %v4633_v59 = vpop.permute.xlu1 %785 }
 0x153   : > { %8084 = vst [vmem:[#allocation42_spill] sm:$0xff] %v4633_v59  ;;  %v857_v59 = vrot.slane %v4642_v54, 1 }
 0x154   : > { %911 = vrot.lane.b32.xlu0 %v8085_v2, %s3718_s21  ;;  %v854_v2 = vrot.slane %v4509_v41, 1 }
 0x155   : > { %v4658_v38 = vsel %vm402_vm1, %v855_v40, %v857_v59 }
 0x156   : > { %v4637_v27 = vpop.permute.xlu0 %789 }
 0x157   : > { %8086 = vst [vmem:[#allocation152_spill] sm:$0xff] %v4637_v27  ;;  %915 = vrot.lane.b32.xlu2 %v4132_v30, %s3718_s21 }
 0x158   : > { %913 = vrot.lane.b32.xlu1 %v4136_v17, %s3718_s21  ;;  %v4663_v17 = vsel %vm402_vm1, %v854_v2, %v855_v40  ;;  %v8096_v2 = vld [vmem:[#allocation50_spill] sm:$0xff] }
 0x159   : > { %v4650_v37 = vpop.permute.xlu2 %811 }
 0x15a   : > { %8088 = vst [vmem:[#allocation153_spill] sm:$0xff] %v4650_v37  ;;  %v4653_v27 = vpop.permute.xlu1 %791 }
 0x15b   : > { %8089 = vst [vmem:[#allocation154_spill] sm:$0xff] %v4653_v27 }
 0x15c   : > { %917 = vrot.lane.b32.xlu0 %v8090_v21, %s3718_s21  ;;  %v8094_v21 = vld [vmem:[#allocation49_spill] sm:$0xff] }
 0x15e   : > { %v4660_v30 = vpop.permute.xlu0 %795 }
 0x15f   : > { %8091 = vst [vmem:[#allocation155_spill] sm:$0xff] %v4660_v30  ;;  %921 = vrot.lane.b32.xlu2 %v4658_v38, %s3718_s21 }
 0x160   : > { %919 = vrot.lane.b32.xlu1 %v4663_v17, %s3718_s21 }
 0x161   : > { %v4669_v37 = vpop.permute.xlu2 %817 }
 0x162   : > { %8092 = vst [vmem:[#allocation156_spill] sm:$0xff] %v4669_v37  ;;  %v4671_v27 = vpop.permute.xlu1 %797  ;;  %v8099_v37 = vld [vmem:[#allocation51_spill] sm:$0xff] }
 0x163   : > { %8093 = vst [vmem:[#allocation157_spill] sm:$0xff] %v4671_v27 }
 0x164   : > { %960 = vrot.lane.b32.xlu0 %v8094_v21, %s3719_s22 }
 0x166   : > { %v4675_v59 = vpop.permute.xlu0 %801 }
 0x167   : > { %8095 = vst [vmem:[#allocation49_spill] sm:$0xff] %v4675_v59  ;;  %964 = vrot.lane.b32.xlu2 %v4171_v1, %s3719_s22 }
 0x168   : > { %962 = vrot.lane.b32.xlu1 %v8096_v2, %s3719_s22  ;;  %v8103_v2 = vld [vmem:[#allocation54_spill] sm:$0xff] }
 0x169   : > { %v4681_v40 = vpop.permute.xlu2 %861 }
 0x16a   : > { %8097 = vst [vmem:[#allocation50_spill] sm:$0xff] %v4681_v40  ;;  %v4683_v30 = vpop.permute.xlu1 %803 }
 0x16b   : > { %8098 = vst [vmem:[#allocation158_spill] sm:$0xff] %v4683_v30 }
 0x16c   : > { %966 = vrot.lane.b32.xlu0 %v8099_v37, %s3719_s22 }
 0x16e   : > { %v4687_v27 = vpop.permute.xlu0 %807 }
 0x16f   : > { %8100 = vst [vmem:[#allocation51_spill] sm:$0xff] %v4687_v27  ;;  %970 = vrot.lane.b32.xlu2 %v4192_v28, %s3719_s22  ;;  %v8105_v27 = vld [vmem:[#allocation56_spill] sm:$0xff] }
 0x170   : > { %968 = vrot.lane.b32.xlu1 %v4178_v23, %s3719_s22  ;;  %v8108_v23 = vld [vmem:[#allocation58_spill] sm:$0xff] }
 0x171   : > { %v4693_v21 = vpop.permute.xlu2 %867 }
 0x172   : > { %8101 = vst [vmem:[#allocation159_spill] sm:$0xff] %v4693_v21  ;;  %v4695_v59 = vpop.permute.xlu1 %809 }
 0x173   : > { %8102 = vst [vmem:[#allocation160_spill] sm:$0xff] %v4695_v59 }
 0x174   : > { %972 = vrot.lane.b32.xlu0 %v8103_v2, %s3719_s22 }
 0x176   : > { %v4699_v40 = vpop.permute.xlu0 %813 }
 0x177   : > { %8104 = vst [vmem:[#allocation54_spill] sm:$0xff] %v4699_v40  ;;  %976 = vrot.lane.b32.xlu2 %v4214_v50, %s3719_s22  ;;  %v8110_v40 = vld [vmem:[#allocation60_spill] sm:$0xff] }
 0x178   : > { %974 = vrot.lane.b32.xlu1 %v8105_v27, %s3719_s22  ;;  %v8113_v27 = vld [vmem:[#allocation62_spill] sm:$0xff] }
 0x179   : > { %v4705_v30 = vpop.permute.xlu2 %873 }
 0x17a   : > { %8106 = vst [vmem:[#allocation161_spill] sm:$0xff] %v4705_v30  ;;  %v4707_v28 = vpop.permute.xlu1 %815 }
 0x17b   : > { %8107 = vst [vmem:[#allocation162_spill] sm:$0xff] %v4707_v28 }
 0x17c   : > { %978 = vrot.lane.b32.xlu0 %v8108_v23, %s3719_s22 }
 0x17e   : > { %v4711_v21 = vpop.permute.xlu0 %819 }
 0x17f   : > { %8109 = vst [vmem:[#allocation58_spill] sm:$0xff] %v4711_v21  ;;  %982 = vrot.lane.b32.xlu2 %v4237_v15, %s3719_s22  ;;  %v8115_v21 = vld [vmem:[#allocation65_spill] sm:$0xff] }
 0x180   : > { %980 = vrot.lane.b32.xlu1 %v8110_v40, %s3719_s22  ;;  %v8118_v40 = vld [vmem:[#allocation68_spill] sm:$0xff] }
 0x181   : > { %v4717_v59 = vpop.permute.xlu2 %879 }
 0x182   : > { %8111 = vst [vmem:[#allocation163_spill] sm:$0xff] %v4717_v59  ;;  %v4719_v50 = vpop.permute.xlu1 %859 }
 0x183   : > { %8112 = vst [vmem:[#allocation164_spill] sm:$0xff] %v4719_v50 }
 0x184   : > { %984 = vrot.lane.b32.xlu0 %v8113_v27, %s3719_s22 }
 0x186   : > { %v4723_v30 = vpop.permute.xlu0 %863 }
 0x187   : > { %8114 = vst [vmem:[#allocation62_spill] sm:$0xff] %v4723_v30  ;;  %988 = vrot.lane.b32.xlu2 %v4263_v13, %s3719_s22  ;;  %v8122_v13 = vld [vmem:[#allocation74_spill] sm:$0xff] }
 0x188   : > { %986 = vrot.lane.b32.xlu1 %v8115_v21, %s3719_s22 }
 0x189   : > { %v4729_v28 = vpop.permute.xlu2 %885 }
 0x18a   : > { %8116 = vst [vmem:[#allocation65_spill] sm:$0xff] %v4729_v28  ;;  %v4731_v15 = vpop.permute.xlu1 %865 }
 0x18b   : > { %8117 = vst [vmem:[#allocation165_spill] sm:$0xff] %v4731_v15 }
 0x18c   : > { %990 = vrot.lane.b32.xlu0 %v8118_v40, %s3719_s22 }
 0x18e   : > { %v4735_v59 = vpop.permute.xlu0 %869 }
 0x18f   : > { %8119 = vst [vmem:[#allocation68_spill] sm:$0xff] %v4735_v59  ;;  %994 = vrot.lane.b32.xlu2 %v4288_v60, %s3719_s22  ;;  %v8124_v59 = vld [vmem:[#allocation77_spill] sm:$0xff] }
 0x190   : > { %992 = vrot.lane.b32.xlu1 %v4270_v11, %s3719_s22  ;;  %v8127_v11 = vld [vmem:[#allocation80_spill] sm:$0xff] }
 0x191   : > { %v4741_v30 = vpop.permute.xlu2 %891 }
 0x192   : > { %8120 = vst [vmem:[#allocation166_spill] sm:$0xff] %v4741_v30  ;;  %v4743_v50 = vpop.permute.xlu1 %871 }
 0x193   : > { %8121 = vst [vmem:[#allocation167_spill] sm:$0xff] %v4743_v50 }
 0x194   : > { %996 = vrot.lane.b32.xlu0 %v8122_v13, %s3719_s22 }
 0x196   : > { %v4747_v28 = vpop.permute.xlu0 %875 }
 0x197   : > { %8123 = vst [vmem:[#allocation74_spill] sm:$0xff] %v4747_v28  ;;  %1000 = vrot.lane.b32.xlu2 %v4314_v47, %s3719_s22 }
 0x198   : > { %998 = vrot.lane.b32.xlu1 %v8124_v59, %s3719_s22 }
 0x199   : > { %v4753_v15 = vpop.permute.xlu2 %897 }
 0x19a   : > { %8125 = vst [vmem:[#allocation77_spill] sm:$0xff] %v4753_v15  ;;  %v4755_v60 = vpop.permute.xlu1 %877 }
 0x19b   : > { %8126 = vst [vmem:[#allocation168_spill] sm:$0xff] %v4755_v60 }
 0x19c   : > { %1002 = vrot.lane.b32.xlu0 %v8127_v11, %s3719_s22 }
 0x19e   : > { %v4759_v30 = vpop.permute.xlu0 %881 }
 0x19f   : > { %8128 = vst [vmem:[#allocation80_spill] sm:$0xff] %v4759_v30  ;;  %1006 = vrot.lane.b32.xlu2 %v4339_v42, %s3719_s22  ;;  %v8132_v30 = vld [vmem:[#allocation87_spill] sm:$0xff] }
 0x1a0   : > { %1004 = vrot.lane.b32.xlu1 %v4321_v3, %s3719_s22 }
 0x1a1   : > { %v4765_v28 = vpop.permute.xlu2 %903 }
 0x1a2   : > { %8129 = vst [vmem:[#allocation169_spill] sm:$0xff] %v4765_v28  ;;  %v4767_v50 = vpop.permute.xlu1 %883  ;;  %v956_v28 = vrot.slane %v4521_v44, 2 }
 0x1a3   : > { %8130 = vst [vmem:[#allocation170_spill] sm:$0xff] %v4767_v50  ;;  %v955_v50 = vrot.slane %v4509_v41, 2 }
 0x1a4   : > { %1008 = vrot.lane.b32.xlu0 %v4333_v19, %s3719_s22 }
 0x1a6   : > { %v4771_v15 = vpop.permute.xlu0 %887 }
 0x1a7   : > { %8131 = vst [vmem:[#allocation171_spill] sm:$0xff] %v4771_v15  ;;  %1012 = vrot.lane.b32.xlu2 %v4365_v29, %s3719_s22  ;;  %v4792_v15 = vsel %vm579_vm2, %v955_v50, %v956_v28 }
 0x1a8   : > { %1010 = vrot.lane.b32.xlu1 %v8132_v30, %s3719_s22 }
 0x1a9   : > { %v4777_v60 = vpop.permute.xlu2 %909 }
 0x1aa   : > { %8133 = vst [vmem:[#allocation87_spill] sm:$0xff] %v4777_v60  ;;  %v4779_v42 = vpop.permute.xlu1 %889 }
 0x1ab   : > { %8134 = vst [vmem:[#allocation172_spill] sm:$0xff] %v4779_v42  ;;  %v958_v42 = vrot.slane %v4642_v54, 2 }
 0x1ac   : > { %1014 = vrot.lane.b32.xlu0 %v4358_v39, %s3719_s22 }
 0x1ae   : > { %v4785_v19 = vpop.permute.xlu0 %893 }
 0x1af   : > { %8135 = vst [vmem:[#allocation173_spill] sm:$0xff] %v4785_v19  ;;  %1018 = vrot.lane.b32.xlu2 %v4384_v4, %s3719_s22  ;;  %v4804_v19 = vsel %vm579_vm2, %v956_v28, %v958_v42 }
 0x1b0   : > { %1016 = vrot.lane.b32.xlu1 %v4372_v53, %s3719_s22 }
 0x1b1   : > { %v4794_v60 = vpop.permute.xlu2 %915 }
 0x1b2   : > { %8136 = vst [vmem:[#allocation174_spill] sm:$0xff] %v4794_v60  ;;  %v4797_v29 = vpop.permute.xlu1 %895 }
 0x1b4   : > { %1020 = vrot.lane.b32.xlu0 %v4792_v15, %s3719_s22 }
 0x1b6   : > { %v4801_v39 = vpop.permute.xlu0 %899 }
 0x1b7   : > { %8137 = vst [vmem:[#allocation175_spill] sm:$0xff] %v4801_v39  ;;  %1056 = vrot.lane.b32.xlu2 %v3793_v24, %s3720_s23 }
 0x1b8   : > { %1022 = vrot.lane.b32.xlu1 %v4804_v19, %s3719_s22 }
 0x1b9   : > { %v4810_v50 = vpop.permute.xlu2 %921 }
 0x1ba   : > { %8138 = vst [vmem:[#allocation176_spill] sm:$0xff] %v4810_v50  ;;  %v4812_v54 = vpop.permute.xlu1 %901 }
 0x1bb   : > { %8139 = vst [vmem:[#allocation177_spill] sm:$0xff] %v4812_v54 }
 0x1bc   : > { %1058 = vrot.lane.b32.xlu0 %v3787_v22, %s3720_s23 }
 0x1be   : > { %v4816_v60 = vpop.permute.xlu0 %905 }
 0x1bf   : > { %8140 = vst [vmem:[#allocation178_spill] sm:$0xff] %v4816_v60  ;;  %1062 = vrot.lane.b32.xlu2 %v3810_v33, %s3720_s23 }
 0x1c0   : > { %1060 = vrot.lane.b32.xlu1 %v3817_v36, %s3720_s23 }
 0x1c1   : > { %v4822_v28 = vpop.permute.xlu2 %964 }
 0x1c2   : > { %v4824_v42 = vpop.permute.xlu1 %907 }
 0x1c3   : > { %8141 = vst [vmem:[#allocation179_spill] sm:$0xff] %v4824_v42 }
 0x1c4   : > { %1064 = vrot.lane.b32.xlu0 %v3848_v51, %s3720_s23 }
 0x1c6   : > { %v4828_v50 = vpop.permute.xlu0 %911 }
 0x1c7   : > { %8142 = vst [vmem:[#allocation180_spill] sm:$0xff] %v4828_v50  ;;  %1068 = vrot.lane.b32.xlu2 %v3872_v63, %s3720_s23 }
 0x1c8   : > { %1066 = vrot.lane.b32.xlu1 %v3851_v52, %s3720_s23 }
 0x1c9   : > { %v4834_v60 = vpop.permute.xlu2 %970 }
 0x1ca   : > { %v4836_v54 = vpop.permute.xlu1 %913 }
 0x1cb   : > { %8143 = vst [vmem:[#allocation181_spill] sm:$0xff] %v4836_v54 }
 0x1cc   : > { %1070 = vrot.lane.b32.xlu0 %v3869_v62, %s3720_s23 }
 0x1ce   : > { %v4840_v39 = vpop.permute.xlu0 %917 }
 0x1cf   : > { %8144 = vst [vmem:[#allocation182_spill] sm:$0xff] %v4840_v39  ;;  %1074 = vrot.lane.b32.xlu2 %v3885_v9, %s3720_s23 }
 0x1d0   : > { %1072 = vrot.lane.b32.xlu1 %v3888_v10, %s3720_s23 }
 0x1d1   : > { %v4846_v50 = vpop.permute.xlu2 %976 }
 0x1d2   : > { %8145 = vst [vmem:[#allocation183_spill] sm:$0xff] %v4846_v50  ;;  %v4848_v42 = vpop.permute.xlu1 %919 }
 0x1d3   : > { %8146 = vst [vmem:[#allocation184_spill] sm:$0xff] %v4848_v42 }
 0x1d4   : > { %1076 = vrot.lane.b32.xlu0 %v3927_v43, %s3720_s23 }
 0x1d6   : > { %v4852_v63 = vpop.permute.xlu0 %960 }
 0x1d7   : > { %1080 = vrot.lane.b32.xlu2 %v3944_v57, %s3720_s23 }
 0x1d8   : > { %1078 = vrot.lane.b32.xlu1 %v3920_v35, %s3720_s23 }
 0x1d9   : > { %v4858_v39 = vpop.permute.xlu2 %982 }
 0x1da   : > { %8147 = vst [vmem:[#allocation185_spill] sm:$0xff] %v4858_v39  ;;  %v4860_v54 = vpop.permute.xlu1 %962 }
 0x1dc   : > { %1082 = vrot.lane.b32.xlu0 %v3941_v56, %s3720_s23 }
 0x1de   : > { %v4864_v9 = vpop.permute.xlu0 %966 }
 0x1df   : > { %1086 = vrot.lane.b32.xlu2 %v3957_v6, %s3720_s23 }
 0x1e0   : > { %1084 = vrot.lane.b32.xlu1 %v3960_v7, %s3720_s23 }
 0x1e1   : > { %v4870_v42 = vpop.permute.xlu2 %988 }
 0x1e2   : > { %8148 = vst [vmem:[#allocation186_spill] sm:$0xff] %v4870_v42  ;;  %v4872_v43 = vpop.permute.xlu1 %968 }
 0x1e4   : > { %1088 = vrot.lane.b32.xlu0 %v3998_v61, %s3720_s23 }
 0x1e6   : > { %v4876_v35 = vpop.permute.xlu0 %972 }
 0x1e7   : > { %1092 = vrot.lane.b32.xlu2 %v4015_v26, %s3720_s23 }
 0x1e8   : > { %1090 = vrot.lane.b32.xlu1 %v3992_v55, %s3720_s23 }
 0x1e9   : > { %v4882_v10 = vpop.permute.xlu2 %994 }
 0x1ea   : > { %v4884_v39 = vpop.permute.xlu1 %974 }
 0x1ec   : > { %1094 = vrot.lane.b32.xlu0 %v4012_v31, %s3720_s23 }
 0x1ee   : > { %v4888_v42 = vpop.permute.xlu0 %978 }
 0x1ef   : > { %8149 = vst [vmem:[#allocation187_spill] sm:$0xff] %v4888_v42  ;;  %1098 = vrot.lane.b32.xlu2 %v4035_v16, %s3720_s23 }
 0x1f0   : > { %1096 = vrot.lane.b32.xlu1 %v4038_v18, %s3720_s23 }
 0x1f1   : > { %v4894_v62 = vpop.permute.xlu2 %1000 }
 0x1f2   : > { %8150 = vst [vmem:[#allocation188_spill] sm:$0xff] %v4894_v62  ;;  %v4896_v26 = vpop.permute.xlu1 %980  ;;  %v8193_v62 = vld [vmem:[#allocation46_spill] sm:$0xff] }
 0x1f3   : > { %8151 = vst [vmem:[#allocation189_spill] sm:$0xff] %v4896_v26 }
 0x1f4   : > { %1100 = vrot.lane.b32.xlu0 %v4077_v20, %s3720_s23 }
 0x1f6   : > { %v4900_v55 = vpop.permute.xlu0 %984 }
 0x1f7   : > { %8152 = vst [vmem:[#allocation190_spill] sm:$0xff] %v4900_v55  ;;  %1104 = vrot.lane.b32.xlu2 %v4095_v45, %s3720_s23 }
 0x1f8   : > { %1102 = vrot.lane.b32.xlu1 %v4071_v46, %s3720_s23  ;;  %v8157_v46 = vld [vmem:[#allocation3_spill] sm:$0xff] }
 0x1f9   : > { %v4906_v31 = vpop.permute.xlu2 %1006 }
 0x1fa   : > { %8153 = vst [vmem:[#allocation191_spill] sm:$0xff] %v4906_v31  ;;  %v4908_v16 = vpop.permute.xlu1 %986 }
 0x1fb   : > { %8154 = vst [vmem:[#allocation192_spill] sm:$0xff] %v4908_v16  ;;  %v8158_v16 = vld [vmem:[#allocation2_spill] sm:$0xff] }
 0x1fc   : > { %1106 = vrot.lane.b32.xlu0 %v4092_v14, %s3720_s23  ;;  %v3659_v55 = vpack.i.bf16 %v8158_v16, %v8157_v46 }
 0x1fe   : > { %v4912_v18 = vpop.permute.xlu0 %990 }
 0x1ff   : > { %8155 = vst [vmem:[#allocation193_spill] sm:$0xff] %v4912_v18  ;;  %1110 = vrot.lane.b32.xlu2 %v4108_v8, %s3720_s23 }
 0x200   : > { %1108 = vrot.lane.b32.xlu1 %v4111_v25, %s3720_s23 }
 0x201   : > { %v4918_v20 = vpop.permute.xlu2 %1012 }
 0x202   : > { %8156 = vst [vmem:[#allocation194_spill] sm:$0xff] %v4918_v20  ;;  %v4920_v45 = vpop.permute.xlu1 %992  ;;  %v8167_v20 = vld [vmem:[#allocation14_spill] sm:$0xff] }
 0x204   : > { %1112 = vrot.lane.b32.xlu0 %v4509_v41, %s3720_s23 }
 0x206   : > { %v4926_v31 = vpop.permute.xlu0 %996 }
 0x207   : > { %3660 = vrot.lane.b32.xlu2 %v3659_v55, %s3720_s23 }
 0x208   : > { %1114 = vrot.lane.b32.xlu1 %v4521_v44, %s3720_s23 }
 0x209   : > { %v4931_v8 = vpop.permute.xlu2 %1018 }
 0x20a   : > { %8159 = vst [vmem:[#allocation3_spill] sm:$0xff] %v4931_v8  ;;  %v4933_v25 = vpop.permute.xlu1 %998 }
 0x20c   : > { %1152 = vrot.lane.b32.xlu0 %v3844_v49, %s3721_s24  ;;  %v8163_v49 = vld [vmem:[#allocation10_spill] sm:$0xff] }
 0x20e   : > { %v4937_v14 = vpop.permute.xlu0 %1002 }
 0x20f   : > { %8160 = vst [vmem:[#allocation2_spill] sm:$0xff] %v4937_v14  ;;  %1156 = vrot.lane.b32.xlu2 %v3841_v48, %s3721_s24 }
 0x210   : > { %1154 = vrot.lane.b32.xlu1 %v3813_v34, %s3721_s24  ;;  %v8165_v34 = vld [vmem:[#allocation13_spill] sm:$0xff] }
 0x211   : > { %v4943_v55 = vpop.permute.xlu2 %1056 }
 0x212   : > { %v4945_v41 = vpop.permute.xlu1 %1004 }
 0x213   : > { %8161 = vst [vmem:[#allocation195_spill] sm:$0xff] %v4945_v41 }
 0x214   : > { %1158 = vrot.lane.b32.xlu0 %v3863_v58, %s3721_s24  ;;  %v8168_v58 = vld [vmem:[#allocation15_spill] sm:$0xff] }
 0x216   : > { %v4949_v44 = vpop.permute.xlu0 %1008 }
 0x217   : > { %8162 = vst [vmem:[#allocation196_spill] sm:$0xff] %v4949_v44  ;;  %1162 = vrot.lane.b32.xlu2 %v3877_v5, %s3721_s24 }
 0x218   : > { %1160 = vrot.lane.b32.xlu1 %v8163_v49, %s3721_s24  ;;  %v8170_v49 = vld [vmem:[#allocation18_spill] sm:$0xff] }
 0x219   : > { %v4955_v8 = vpop.permute.xlu2 %1062 }
 0x21a   : > { %v4957_v48 = vpop.permute.xlu1 %1010 }
 0x21b   : > { %8164 = vst [vmem:[#allocation10_spill] sm:$0xff] %v4957_v48  ;;  %v8172_v48 = vld [vmem:[#allocation19_spill] sm:$0xff] }
 0x21c   : > { %1164 = vrot.lane.b32.xlu0 %v8165_v34, %s3721_s24  ;;  %v8173_v34 = vld [vmem:[#allocation20_spill] sm:$0xff] }
 0x21e   : > { %v4961_v18 = vpop.permute.xlu0 %1014 }
 0x21f   : > { %8166 = vst [vmem:[#allocation13_spill] sm:$0xff] %v4961_v18  ;;  %1168 = vrot.lane.b32.xlu2 %v8167_v20, %s3721_s24 }
 0x220   : > { %1166 = vrot.lane.b32.xlu1 %v8168_v58, %s3721_s24  ;;  %v8176_v58 = vld [vmem:[#allocation21_spill] sm:$0xff] }
 0x221   : > { %v4967_v44 = vpop.permute.xlu2 %1068 }
 0x222   : > { %v4969_v5 = vpop.permute.xlu1 %1016 }
 0x223   : > { %8169 = vst [vmem:[#allocation14_spill] sm:$0xff] %v4969_v5  ;;  %v8177_v5 = vld [vmem:[#allocation22_spill] sm:$0xff] }
 0x224   : > { %1170 = vrot.lane.b32.xlu0 %v8170_v49, %s3721_s24  ;;  %v8178_v49 = vld [vmem:[#allocation23_spill] sm:$0xff] }
 0x226   : > { %v4973_v41 = vpop.permute.xlu0 %1020 }
 0x227   : > { %8171 = vst [vmem:[#allocation15_spill] sm:$0xff] %v4973_v41  ;;  %1174 = vrot.lane.b32.xlu2 %v8172_v48, %s3721_s24 }
 0x228   : > { %1172 = vrot.lane.b32.xlu1 %v8173_v34, %s3721_s24  ;;  %v8180_v34 = vld [vmem:[#allocation25_spill] sm:$0xff] }
 0x229   : > { %v4979_v18 = vpop.permute.xlu2 %1074 }
 0x22a   : > { %8174 = vst [vmem:[#allocation18_spill] sm:$0xff] %v4979_v18  ;;  %v4981_v20 = vpop.permute.xlu1 %1022  ;;  %v8184_v18 = vld [vmem:[#allocation34_spill] sm:$0xff] }
 0x22b   : > { %8175 = vst [vmem:[#allocation19_spill] sm:$0xff] %v4981_v20  ;;  %v8181_v20 = vld [vmem:[#allocation28_spill] sm:$0xff] }
 0x22c   : > { %1176 = vrot.lane.b32.xlu0 %v8176_v58, %s3721_s24 }
 0x22e   : > { %v4985_v26 = vpop.permute.xlu0 %1058 }
 0x22f   : > { %1180 = vrot.lane.b32.xlu2 %v8177_v5, %s3721_s24 }
 0x230   : > { %1178 = vrot.lane.b32.xlu1 %v8178_v49, %s3721_s24  ;;  %v8183_v49 = vld [vmem:[#allocation32_spill] sm:$0xff] }
 0x231   : > { %v4991_v41 = vpop.permute.xlu2 %1080 }
 0x232   : > { %8179 = vst [vmem:[#allocation20_spill] sm:$0xff] %v4991_v41  ;;  %v4993_v48 = vpop.permute.xlu1 %1060 }
 0x234   : > { %1182 = vrot.lane.b32.xlu0 %v8180_v34, %s3721_s24  ;;  %v8185_v34 = vld [vmem:[#allocation35_spill] sm:$0xff] }
 0x236   : > { %v4997_v14 = vpop.permute.xlu0 %1064 }
 0x237   : > { %1186 = vrot.lane.b32.xlu2 %v8181_v20, %s3721_s24 }
 0x238   : > { %1184 = vrot.lane.b32.xlu1 %v8071_v32, %s3721_s24  ;;  %v8187_v32 = vld [vmem:[#allocation38_spill] sm:$0xff] }
 0x239   : > { %v5003_v58 = vpop.permute.xlu2 %1086 }
 0x23a   : > { %8182 = vst [vmem:[#allocation21_spill] sm:$0xff] %v5003_v58  ;;  %v5005_v5 = vpop.permute.xlu1 %1066 }
 0x23c   : > { %1188 = vrot.lane.b32.xlu0 %v8183_v49, %s3721_s24 }
 0x23e   : > { %v5009_v41 = vpop.permute.xlu0 %1070 }
 0x23f   : > { %1192 = vrot.lane.b32.xlu2 %v8184_v18, %s3721_s24 }
 0x240   : > { %1190 = vrot.lane.b32.xlu1 %v8185_v34, %s3721_s24  ;;  %v8191_v34 = vld [vmem:[#allocation45_spill] sm:$0xff] }
 0x241   : > { %v5015_v42 = vpop.permute.xlu2 %1092 }
 0x242   : > { %v5017_v20 = vpop.permute.xlu1 %1072 }
 0x243   : > { %8186 = vst [vmem:[#allocation22_spill] sm:$0xff] %v5017_v20  ;;  %v8245_v20 = vld [vmem:[#allocation164_spill] sm:$0xff] }
 0x244   : > { %1194 = vrot.lane.b32.xlu0 %v8187_v32, %s3721_s24  ;;  %v8194_v32 = vld [vmem:[#allocation47_spill] sm:$0xff] }
 0x246   : > { %v5021_v58 = vpop.permute.xlu0 %1076 }
 0x247   : > { %8188 = vst [vmem:[#allocation23_spill] sm:$0xff] %v5021_v58  ;;  %1198 = vrot.lane.b32.xlu2 %v8081_v12, %s3721_s24 }
 0x248   : > { %1196 = vrot.lane.b32.xlu1 %v8082_v0, %s3721_s24  ;;  %v8197_v0 = vld [vmem:[#allocation48_spill] sm:$0xff] }
 0x249   : > { %v5027_v49 = vpop.permute.xlu2 %1098 }
 0x24a   : > { %8189 = vst [vmem:[#allocation25_spill] sm:$0xff] %v5027_v49  ;;  %v5029_v18 = vpop.permute.xlu1 %1078 }
 0x24b   : > { %8190 = vst [vmem:[#allocation28_spill] sm:$0xff] %v5029_v18 }
 0x24c   : > { %1200 = vrot.lane.b32.xlu0 %v8191_v34, %s3721_s24 }
 0x24e   : > { %v5033_v52 = vpop.permute.xlu0 %1082 }
 0x24f   : > { %8192 = vst [vmem:[#allocation32_spill] sm:$0xff] %v5033_v52  ;;  %1204 = vrot.lane.b32.xlu2 %v8193_v62, %s3721_s24 }
 0x250   : > { %1202 = vrot.lane.b32.xlu1 %v8194_v32, %s3721_s24  ;;  %v8199_v32 = vld [vmem:[#allocation4_spill] sm:$0xff] }
 0x251   : > { %v5039_v58 = vpop.permute.xlu2 %1104 }
 0x252   : > { %8195 = vst [vmem:[#allocation34_spill] sm:$0xff] %v5039_v58  ;;  %v5041_v12 = vpop.permute.xlu1 %1084 }
 0x253   : > { %8196 = vst [vmem:[#allocation35_spill] sm:$0xff] %v5041_v12 }
 0x254   : > { %1206 = vrot.lane.b32.xlu0 %v8197_v0, %s3721_s24 }
 0x256   : > { %v5045_v49 = vpop.permute.xlu0 %1088 }
 0x257   : > { %1210 = vrot.lane.b32.xlu2 %v4658_v38, %s3721_s24 }
 0x258   : > { %1208 = vrot.lane.b32.xlu1 %v4663_v17, %s3721_s24  ;;  %v8202_v17 = vld [vmem:[#allocation52_spill] sm:$0xff] }
 0x259   : > { %v5051_v34 = vpop.permute.xlu2 %1110 }
 0x25a   : > { %8198 = vst [vmem:[#allocation38_spill] sm:$0xff] %v5051_v34  ;;  %v5053_v62 = vpop.permute.xlu1 %1090 }
 0x25c   : > { %3665 = vrot.lane.b32.xlu0 %v8199_v32, %s3721_s24  ;;  %v8204_v32 = vld [vmem:[#allocation55_spill] sm:$0xff] }
 0x25e   : > { %v5057_v52 = vpop.permute.xlu0 %1094 }
 0x25f   : > { %1250 = vrot.lane.b32.xlu2 %v8099_v37, %s3722_s25 }
 0x260   : > { %1248 = vrot.lane.b32.xlu1 %v4171_v1, %s3722_s25  ;;  %v8206_v1 = vld [vmem:[#allocation56_spill] sm:$0xff] }
 0x261   : > { %v5063_v38 = vpop.permute.xlu2 %3660 }
 0x262   : > { %8200 = vst [vmem:[#allocation45_spill] sm:$0xff] %v5063_v38  ;;  %v5065_v0 = vpop.permute.xlu1 %1096 }
 0x263   : > { %8201 = vst [vmem:[#allocation46_spill] sm:$0xff] %v5065_v0  ;;  %v8240_v0 = vld [vmem:[#allocation109_spill] sm:$0xff] }
 0x264   : > { %1252 = vrot.lane.b32.xlu0 %v8202_v17, %s3722_s25  ;;  %v8208_v17 = vld [vmem:[#allocation59_spill] sm:$0xff] }
 0x266   : > { %v5069_v34 = vpop.permute.xlu0 %1100 }
 0x267   : > { %8203 = vst [vmem:[#allocation47_spill] sm:$0xff] %v5069_v34  ;;  %1256 = vrot.lane.b32.xlu2 %v8103_v2, %s3722_s25 }
 0x268   : > { %1254 = vrot.lane.b32.xlu1 %v8204_v32, %s3722_s25  ;;  %v8210_v32 = vld [vmem:[#allocation60_spill] sm:$0xff] }
 0x269   : > { %v5075_v12 = vpop.permute.xlu2 %1156 }
 0x26a   : > { %v5077_v37 = vpop.permute.xlu1 %1102 }
 0x26b   : > { %8205 = vst [vmem:[#allocation48_spill] sm:$0xff] %v5077_v37 }
 0x26c   : > { %1258 = vrot.lane.b32.xlu0 %v8206_v1, %s3722_s25  ;;  %v8212_v1 = vld [vmem:[#allocation64_spill] sm:$0xff] }
 0x26e   : > { %v5081_v38 = vpop.permute.xlu0 %1106 }
 0x26f   : > { %8207 = vst [vmem:[#allocation4_spill] sm:$0xff] %v5081_v38  ;;  %1262 = vrot.lane.b32.xlu2 %v8108_v23, %s3722_s25 }
 0x270   : > { %1260 = vrot.lane.b32.xlu1 %v8208_v17, %s3722_s25 }
 0x271   : > { %v5087_v58 = vpop.permute.xlu2 %1162 }
 0x272   : > { %v5089_v2 = vpop.permute.xlu1 %1108 }
 0x273   : > { %8209 = vst [vmem:[#allocation52_spill] sm:$0xff] %v5089_v2 }
 0x274   : > { %1264 = vrot.lane.b32.xlu0 %v8210_v32, %s3722_s25  ;;  %v8215_v32 = vld [vmem:[#allocation70_spill] sm:$0xff] }
 0x276   : > { %v5093_v18 = vpop.permute.xlu0 %1112 }
 0x277   : > { %8211 = vst [vmem:[#allocation55_spill] sm:$0xff] %v5093_v18  ;;  %1268 = vrot.lane.b32.xlu2 %v8113_v27, %s3722_s25 }
 0x278   : > { %1266 = vrot.lane.b32.xlu1 %v8212_v1, %s3722_s25  ;;  %v8217_v1 = vld [vmem:[#allocation71_spill] sm:$0xff] }
 0x279   : > { %v5099_v38 = vpop.permute.xlu2 %1168 }
 0x27a   : > { %8213 = vst [vmem:[#allocation56_spill] sm:$0xff] %v5099_v38  ;;  %v5101_v23 = vpop.permute.xlu1 %1114  ;;  %v3657_v38 = vunpack.i.l.bf16 %v8240_v0 }
 0x27b   : > { %8214 = vst [vmem:[#allocation59_spill] sm:$0xff] %v5101_v23 }
 0x27c   : > { %1270 = vrot.lane.b32.xlu0 %v8115_v21, %s3722_s25  ;;  %v8218_v21 = vld [vmem:[#allocation76_spill] sm:$0xff] }
 0x27e   : > { %v5105_v17 = vpop.permute.xlu0 %1152 }
 0x27f   : > { %1274 = vrot.lane.b32.xlu2 %v8118_v40, %s3722_s25 }
 0x280   : > { %1272 = vrot.lane.b32.xlu1 %v8215_v32, %s3722_s25 }
 0x281   : > { %v5111_v18 = vpop.permute.xlu2 %1174 }
 0x282   : > { %8216 = vst [vmem:[#allocation60_spill] sm:$0xff] %v5111_v18  ;;  %v5113_v27 = vpop.permute.xlu1 %1154  ;;  %v8226_v18 = vld [vmem:[#allocation90_spill] sm:$0xff] }
 0x284   : > { %1276 = vrot.lane.b32.xlu0 %v8217_v1, %s3722_s25 }
 0x286   : > { %v5117_v2 = vpop.permute.xlu0 %1158 }
 0x287   : > { %1280 = vrot.lane.b32.xlu2 %v8122_v13, %s3722_s25 }
 0x288   : > { %1278 = vrot.lane.b32.xlu1 %v8218_v21, %s3722_s25 }
 0x289   : > { %v5123_v23 = vpop.permute.xlu2 %1180 }
 0x28a   : > { %8219 = vst [vmem:[#allocation64_spill] sm:$0xff] %v5123_v23  ;;  %v5125_v40 = vpop.permute.xlu1 %1160  ;;  %v8221_v23 = vld [vmem:[#allocation84_spill] sm:$0xff] }
 0x28c   : > { %1282 = vrot.lane.b32.xlu0 %v8124_v59, %s3722_s25  ;;  %v8222_v59 = vld [vmem:[#allocation86_spill] sm:$0xff] }
 0x28e   : > { %v5129_v32 = vpop.permute.xlu0 %1164 }
 0x28f   : > { %1286 = vrot.lane.b32.xlu2 %v8127_v11, %s3722_s25 }
 0x290   : > { %1284 = vrot.lane.b32.xlu1 %v4314_v47, %s3722_s25 }
 0x291   : > { %v5135_v1 = vpop.permute.xlu2 %1186 }
 0x292   : > { %v5137_v13 = vpop.permute.xlu1 %1166 }
 0x294   : > { %1288 = vrot.lane.b32.xlu0 %v4321_v3, %s3722_s25  ;;  %v8227_v3 = vld [vmem:[#allocation92_spill] sm:$0xff] }
 0x296   : > { %v5141_v21 = vpop.permute.xlu0 %1170 }
 0x297   : > { %8220 = vst [vmem:[#allocation70_spill] sm:$0xff] %v5141_v21  ;;  %1292 = vrot.lane.b32.xlu2 %v8221_v23, %s3722_s25  ;;  %v8239_v21 = vld [vmem:[#allocation63_spill] sm:$0xff] }
 0x298   : > { %1290 = vrot.lane.b32.xlu1 %v8222_v59, %s3722_s25  ;;  %v1616_v59 = vld [vmem:[%s7669_s1 + $0x40] sm:$0xff]  ;;  %v3653_v50 = vunpack.i.h.bf16 %v8239_v21 }
 0x299   : > { %v5147_v37 = vpop.permute.xlu2 %1192  ;;  %1721 = vmatpush.msra.mxu0 %v1616_v59  ;;  %3614 = vmatpush.msra.mxu2 %v1616_v59 }
 0x29a   : > { %8223 = vst [vmem:[#allocation71_spill] sm:$0xff] %v5147_v37  ;;  %v5149_v11 = vpop.permute.xlu1 %1172  ;;  %v3652_v37 = vunpack.i.l.bf16 %v8239_v21  ;;  %v1346_v21 = vsel %vm1344_vm3, %v8158_v16, %v3653_v50 }
 0x29b   : > { %8224 = vst [vmem:[#allocation76_spill] sm:$0xff] %v5149_v11 }
 0x29c   : > { %1294 = vrot.lane.b32.xlu0 %v8132_v30, %s3722_s25  ;;  %v1615_v30 = vld [vmem:[%s7669_s1 + $0x38] sm:$0xff] }
 0x29d   : > { %1722 = vmatpush.msra.mxu0 %v1615_v30  ;;  %3615 = vmatpush.msra.mxu2 %v1615_v30  ;;  %v1610_v30 = vld [vmem:[%s7669_s1 + $0x10] sm:$0xff] }
 0x29e   : > { %v5153_v47 = vpop.permute.xlu0 %1176 }
 0x29f   : > { %8225 = vst [vmem:[#allocation84_spill] sm:$0xff] %v5153_v47  ;;  %1298 = vrot.lane.b32.xlu2 %v8226_v18, %s3722_s25 }
 0x2a0   : > { %1296 = vrot.lane.b32.xlu1 %v8227_v3, %s3722_s25  ;;  %v1614_v3 = vld [vmem:[%s7669_s1 + $0x30] sm:$0xff] }
 0x2a1   : > { %v5159_v34 = vpop.permute.xlu2 %1198  ;;  %1723 = vmatpush.msra.mxu0 %v1614_v3  ;;  %3616 = vmatpush.msra.mxu2 %v1614_v3 }
 0x2a2   : > { %8228 = vst [vmem:[#allocation86_spill] sm:$0xff] %v5159_v34  ;;  %v5161_v23 = vpop.permute.xlu1 %1178 }
 0x2a3   : > { %8229 = vst [vmem:[#allocation90_spill] sm:$0xff] %v5161_v23  ;;  %v1613_v23 = vld [vmem:[%s7669_s1 + $0x28] sm:$0xff] }
 0x2a4   : > { %1300 = vrot.lane.b32.xlu0 %v4372_v53, %s3722_s25  ;;  %1724 = vmatpush.msra.mxu0 %v1613_v23 }
 0x2a5   : > { %3617 = vmatpush.msra.mxu2 %v1613_v23  ;;  %v1609_v23 = vld [vmem:[%s7669_s1 + $0x8] sm:$0xff] }
 0x2a6   : > { %v5171_v18 = vpop.permute.xlu0 %1182 }
 0x2a7   : > { %8230 = vst [vmem:[#allocation92_spill] sm:$0xff] %v5171_v18  ;;  %1304 = vrot.lane.b32.xlu2 %v4792_v15, %s3722_s25  ;;  %v1612_v18 = vld [vmem:[%s7669_s1 + $0x20] sm:$0xff]  ;;  %v1611_v15 = vld [vmem:[%s7669_s1 + $0x18] sm:$0xff] }
 0x2a8   : > { %1302 = vrot.lane.b32.xlu1 %v4384_v4, %s3722_s25  ;;  %1725 = vmatpush.msra.mxu0 %v1612_v18 }
 0x2a9   : > { %v5183_v53 = vpop.permute.xlu2 %1204  ;;  %3618 = vmatpush.msra.mxu2 %v1612_v18 }
 0x2aa   : > { %8231 = vst [vmem:[#allocation197_spill] sm:$0xff] %v5183_v53  ;;  %v5185_v59 = vpop.permute.xlu1 %1184  ;;  %1726 = vmatpush.msra.mxu0 %v1611_v15  ;;  %v1608_v53 = vld [vmem:[%s7669_s1] sm:$0xff] }
 0x2ab   : > { %3619 = vmatpush.msra.mxu2 %v1611_v15 }
 0x2ac   : > { %1306 = vrot.lane.b32.xlu0 %v4804_v19, %s3722_s25  ;;  %1727 = vmatpush.msra.mxu0 %v1610_v30  ;;  %v8232_v19 = vld [vmem:[#allocation33_spill] sm:$0xff] }
 0x2ad   : > { %3620 = vmatpush.msra.mxu2 %v1610_v30 }
 0x2ae   : > { %v5195_v4 = vpop.permute.xlu0 %1188  ;;  %1728 = vmatpush.msra.mxu0 %v1609_v23 }
 0x2af   : > { %3621 = vmatpush.msra.mxu2 %v1609_v23 }
 0x2b0   : > { %3670 = vrot.lane.b32.xlu1 %v8232_v19, %s3722_s25  ;;  %1729 = vmatpush.msra.mxu0 %v1608_v53 }
 0x2b1   : > { %v5205_v3 = vpop.permute.xlu2 %1210  ;;  %3622 = vmatpush.msra.mxu2 %v1608_v53 }
 0x2b2   : > { %8233 = vst [vmem:[#allocation33_spill] sm:$0xff] %v5205_v3  ;;  %v5207_v18 = vpop.permute.xlu1 %1190 }
 0x2b6   : > { %v5212_v47 = vpop.permute.xlu0 %1194 }
 0x2b7   : > { %8234 = vst [vmem:[#allocation198_spill] sm:$0xff] %v5212_v47 }
 0x2b9   : > { %v1251_v15 = vpop.permute.xlu2 %1250 }
 0x2ba   : > { %v5214_v34 = vpop.permute.xlu1 %1196 }
 0x2bb   : > { %8235 = vst [vmem:[#allocation199_spill] sm:$0xff] %v5214_v34 }
 0x2be   : > { %v5216_v11 = vpop.permute.xlu0 %1200 }
 0x2bf   : > { %8236 = vst [vmem:[#allocation200_spill] sm:$0xff] %v5216_v11  ;;  %v1345_v11 = vsel %vm1344_vm3, %v8157_v46, %v3652_v37 }
 0x2c0   : > { %v5233_v34 = vsel %vm1377_vm5, %v1345_v11, %v3657_v38  ;;  %v3658_v38 = vunpack.i.h.bf16 %v8240_v0  ;;  %v8247_v0 = vld [vmem:[#allocation140_spill] sm:$0xff] }
 0x2c1   : > { %v5218_v30 = vpop.permute.xlu2 %1256  ;;  %8242 = vst [vmem:[#allocation109_spill] sm:$0xff] %v5233_v34 }
 0x2c2   : > { %v5220_v19 = vpop.permute.xlu1 %1202 }
 0x2c3   : > { %8237 = vst [vmem:[#allocation201_spill] sm:$0xff] %v5220_v19 }
 0x2c6   : > { %v5222_v3 = vpop.permute.xlu0 %1206 }
 0x2c7   : > { %8238 = vst [vmem:[#allocation202_spill] sm:$0xff] %v5222_v3  ;;  %v8244_v3 = vld [vmem:[#allocation129_spill] sm:$0xff] }
 0x2c8   : > { %v1411_v47 = vsel %vm1410_vm4, %v5233_v34, %v8244_v3 }
 0x2c9   : > { %v5226_v23 = vpop.permute.xlu2 %1262 }
 0x2ca   : > { %v5228_v53 = vpop.permute.xlu1 %1208 }
 0x2cb   : > { %8241 = vst [vmem:[#allocation63_spill] sm:$0xff] %v5228_v53  ;;  %v1444_v53 = vsel %vm1443_vm6, %v1411_v47, %v8245_v20 }
 0x2cc   : > { %v1477_v46 = vsel %vm1476_vm8, %v1444_v53, %v4852_v63  ;;  %v5257_v63 = vsel %vm1377_vm5, %v1346_v21, %v3658_v38  ;;  %v8248_v53 = vld [vmem:[#allocation50_spill] sm:$0xff]  ;;  %v8250_v21 = vld [vmem:[#allocation69_spill] sm:$0xff] }
 0x2cd   : > { %v1510_v37 = vsel %vm1509_vm7, %v1477_v46, %v4943_v55  ;;  %8246 = vst [vmem:[#allocation129_spill] sm:$0xff] %v5257_v63  ;;  %v1412_v47 = vsel %vm1410_vm4, %v5257_v63, %v8247_v0  ;;  %v8251_v0 = vld [vmem:[#allocation6_spill] sm:$0xff] }
 0x2ce   : > { %v5235_v19 = vpop.permute.xlu0 %3665  ;;  %v1543_v3 = vsel %vm1542_vm9, %v1510_v37, %v5105_v17  ;;  %v1445_v17 = vsel %vm1443_vm6, %v1412_v47, %v8248_v53  ;;  %v8249_v37 = vld [vmem:[#allocation91_spill] sm:$0xff]  ;;  %v1347_v47 = vsel %vm1344_vm3, %v8251_v0, %v8250_v21  ;;  %v8255_v63 = vld [vmem:[#allocation142_spill] sm:$0xff] }
 0x2cf   : > { %8243 = vst [vmem:[#allocation203_spill] sm:$0xff] %v5235_v19  ;;  %v1478_v46 = vsel %vm1476_vm8, %v1445_v17, %v4860_v54  ;;  %v8252_v54 = vld [vmem:[#allocation124_spill] sm:$0xff] }
 0x2d1   : > { %v5248_v11 = vpop.permute.xlu2 %1268 }
 0x2d2   : > { %v1249_v34 = vpop.permute.xlu1 %1248 }
 0x2d3   : > { %v1576_v20 = vsel %vm1575_vm11, %v1543_v3, %v1249_v34  ;;  %v1511_v34 = vsel %vm1509_vm7, %v1478_v46, %v4985_v26  ;;  %v1361_v3 = vsel %vm1344_vm3, %v3944_v57, %v8249_v37  ;;  %v8253_v26 = vld [vmem:[#allocation99_spill] sm:$0xff]  ;;  %v8257_v37 = vld [vmem:[#allocation62_spill] sm:$0xff] }
 0x2d4   : > { %3546 = vmatmul.msk.f32.vlgmr.msra.gmra.mxu0 %vm1617_vm10, %v1576_v20  ;;  %v1544_v50 = vsel %vm1542_vm9, %v1511_v34, %v5113_v27  ;;  %v1394_v53 = vsel %vm1377_vm5, %v1361_v3, %v8252_v54  ;;  %v1380_v17 = vsel %vm1377_vm5, %v1347_v47, %v8253_v26  ;;  %v8254_v27 = vld [vmem:[#allocation152_spill] sm:$0xff] }
 0x2d5   : > { %v1577_v20 = vsel %vm1575_vm11, %v1544_v50, %v1251_v15  ;;  %v1427_v46 = vsel %vm1410_vm4, %v1394_v53, %v8254_v27  ;;  %v1413_v57 = vsel %vm1410_vm4, %v1380_v17, %v8255_v63  ;;  %v8256_v15 = vld [vmem:[#allocation166_spill] sm:$0xff]  ;;  %v8259_v27 = vld [vmem:[#allocation5_spill] sm:$0xff] }
 0x2d6   : > { %v1253_v55 = vpop.permute.xlu0 %1252  ;;  %v1460_v50 = vsel %vm1443_vm6, %v1427_v46, %v8256_v15  ;;  %v1446_v21 = vsel %vm1443_vm6, %v1413_v57, %v8257_v37  ;;  %v8261_v57 = vld [vmem:[#allocation132_spill] sm:$0xff]  ;;  %v8262_v15 = vld [vmem:[#allocation165_spill] sm:$0xff] }
 0x2d7   : > { %v1493_v3 = vsel %vm1476_vm8, %v1460_v50, %v4920_v45 }
 0x2d8   : > { %v1526_v0 = vsel %vm1509_vm7, %v1493_v3, %v5045_v49 }
 0x2d9   : > { %v5268_v16 = vpop.permute.xlu2 %1274  ;;  %v1559_v63 = vsel %vm1542_vm9, %v1526_v0, %v5185_v59  ;;  %v8263_v0 = vld [vmem:[#allocation73_spill] sm:$0xff] }
 0x2da   : > { %v1255_v38 = vpop.permute.xlu1 %1254 }
 0x2dc   : > { %3547 = vmatmul.msk.f32.gmra.mxu0 %vm1617_vm10, %v1577_v20  ;;  %v1479_v20 = vsel %vm1476_vm8, %v1446_v21, %v4822_v28  ;;  %v8258_v28 = vld [vmem:[#allocation67_spill] sm:$0xff] }
 0x2dd   : > { %v1512_v47 = vsel %vm1509_vm7, %v1479_v20, %v4993_v48  ;;  %v1348_v49 = vsel %vm1344_vm3, %v8259_v27, %v8258_v28  ;;  %v8260_v48 = vld [vmem:[#allocation110_spill] sm:$0xff] }
 0x2de   : > { %v1259_v34 = vpop.permute.xlu0 %1258  ;;  %v1545_v53 = vsel %vm1542_vm9, %v1512_v47, %v5075_v12  ;;  %v1381_v59 = vsel %vm1377_vm5, %v1348_v49, %v8260_v48  ;;  %v1349_v47 = vsel %vm1344_vm3, %v3793_v24, %v8263_v0  ;;  %v8267_v49 = vld [vmem:[#allocation53_spill] sm:$0xff] }
 0x2df   : > { %v1578_v45 = vsel %vm1575_vm11, %v1545_v53, %v1253_v55  ;;  %v1414_v12 = vsel %vm1410_vm4, %v1381_v59, %v8261_v57  ;;  %v8265_v53 = vld [vmem:[#allocation143_spill] sm:$0xff]  ;;  %v1350_v48 = vsel %vm1344_vm3, %v3787_v22, %v8267_v49  ;;  %v8268_v59 = vld [vmem:[#allocation102_spill] sm:$0xff] }
 0x2e0   : > { %v1447_v50 = vsel %vm1443_vm6, %v1414_v12, %v8262_v15  ;;  %v8279_v49 = vld [vmem:[#allocation167_spill] sm:$0xff] }
 0x2e1   : > { %v1281_v54 = vpop.permute.xlu2 %1280  ;;  %v1480_v55 = vsel %vm1476_vm8, %v1447_v50, %v4864_v9  ;;  %v8271_v50 = vld [vmem:[#allocation68_spill] sm:$0xff] }
 0x2e2   : > { %v1261_v26 = vpop.permute.xlu1 %1260  ;;  %v1592_v17 = vsel %vm1575_vm11, %v1559_v63, %v1281_v54  ;;  %v1513_v37 = vsel %vm1509_vm7, %v1480_v55, %v4955_v8  ;;  %v8264_v63 = vld [vmem:[#allocation112_spill] sm:$0xff]  ;;  %v8272_v55 = vld [vmem:[#allocation114_spill] sm:$0xff] }
 0x2e3   : > { %3562 = vmatmul.msk.f32.vlgmr.msra.gmra.mxu2 %vm1617_vm10, %v1592_v17  ;;  %v1546_v21 = vsel %vm1542_vm9, %v1513_v37, %v5117_v2  ;;  %v1382_v54 = vsel %vm1377_vm5, %v1349_v47, %v8264_v63  ;;  %v8266_v17 = vld [vmem:[#allocation159_spill] sm:$0xff]  ;;  %v8274_v47 = vld [vmem:[#allocation173_spill] sm:$0xff] }
 0x2e4   : > { %3548 = vmatmul.msk.f32.gmra.mxu0 %vm1617_vm10, %v1578_v45  ;;  %v1579_v20 = vsel %vm1575_vm11, %v1546_v21, %v1255_v38  ;;  %v1415_v8 = vsel %vm1410_vm4, %v1382_v54, %v8265_v53  ;;  %v8273_v21 = vld [vmem:[#allocation154_spill] sm:$0xff] }
 0x2e5   : > { %v1448_v2 = vsel %vm1443_vm6, %v1415_v8, %v8266_v17 }
 0x2e6   : > { %v5313_v46 = vpop.permute.xlu0 %1264  ;;  %v1481_v38 = vsel %vm1476_vm8, %v1448_v2, %v4872_v43  ;;  %v1383_v43 = vsel %vm1377_vm5, %v1350_v48, %v8268_v59  ;;  %v8276_v2 = vld [vmem:[#allocation113_spill] sm:$0xff] }
 0x2e7   : > { %v1514_v45 = vsel %vm1509_vm7, %v1481_v38, %v4997_v14  ;;  %v8269_v14 = vld [vmem:[#allocation145_spill] sm:$0xff] }
 0x2e8   : > { %v1547_v24 = vsel %vm1542_vm9, %v1514_v45, %v5125_v40  ;;  %v1416_v12 = vsel %vm1410_vm4, %v1383_v43, %v8269_v14  ;;  %v8270_v40 = vld [vmem:[#allocation94_spill] sm:$0xff]  ;;  %v8280_v48 = vld [vmem:[#allocation125_spill] sm:$0xff] }
 0x2e9   : > { %v1580_v27 = vsel %vm1575_vm11, %v1547_v24, %v5218_v30  ;;  %v1362_v15 = vsel %vm1344_vm3, %v3941_v56, %v8270_v40  ;;  %v1449_v30 = vsel %vm1443_vm6, %v1416_v12, %v8271_v50  ;;  %v8277_v24 = vld [vmem:[#allocation135_spill] sm:$0xff]  ;;  %v8281_v43 = vld [vmem:[#allocation29_spill] sm:$0xff] }
 0x2ea   : > { %v5325_v3 = vpop.permute.xlu1 %1266  ;;  %v1395_v22 = vsel %vm1377_vm5, %v1362_v15, %v8272_v55  ;;  %v1482_v37 = vsel %vm1476_vm8, %v1449_v30, %v4834_v60  ;;  %v8275_v60 = vld [vmem:[#allocation57_spill] sm:$0xff]  ;;  %v8282_v55 = vld [vmem:[#allocation75_spill] sm:$0xff] }
 0x2eb   : > { %v1515_v0 = vsel %vm1509_vm7, %v1482_v37, %v5005_v5  ;;  %v1351_v17 = vsel %vm1344_vm3, %v3817_v36, %v8275_v60  ;;  %v8284_v37 = vld [vmem:[#allocation146_spill] sm:$0xff] }
 0x2ec   : > { %3549 = vmatmul.msk.f32.gmra.mxu0 %vm1617_vm10, %v1579_v20  ;;  %v1428_v20 = vsel %vm1410_vm4, %v1395_v22, %v8273_v21  ;;  %v1548_v56 = vsel %vm1542_vm9, %v1515_v0, %v5087_v58  ;;  %v1384_v38 = vsel %vm1377_vm5, %v1351_v17, %v8276_v2  ;;  %v8285_v21 = vld [vmem:[#allocation95_spill] sm:$0xff] }
 0x2ed   : > { %v1461_v63 = vsel %vm1443_vm6, %v1428_v20, %v8274_v47  ;;  %v1581_v8 = vsel %vm1575_vm11, %v1548_v56, %v1259_v34  ;;  %v8286_v20 = vld [vmem:[#allocation161_spill] sm:$0xff]  ;;  %v8287_v0 = vld [vmem:[#allocation127_spill] sm:$0xff] }
 0x2ee   : > { %v5334_v9 = vpop.permute.xlu0 %1270  ;;  %v1494_v53 = vsel %vm1476_vm8, %v1461_v63, %v4882_v10  ;;  %v1417_v10 = vsel %vm1410_vm4, %v1384_v38, %v8277_v24  ;;  %v8288_v63 = vld [vmem:[#allocation155_spill] sm:$0xff] }
 0x2ef   : > { %v1527_v5 = vsel %vm1509_vm7, %v1494_v53, %v5053_v62  ;;  %v1450_v62 = vsel %vm1443_vm6, %v1417_v10, %v8279_v49  ;;  %v8293_v10 = vld [vmem:[#allocation97_spill] sm:$0xff]  ;;  %v8296_v49 = vld [vmem:[#allocation183_spill] sm:$0xff] }
 0x2f0   : > { %v1560_v58 = vsel %vm1542_vm9, %v1527_v5, %v5135_v1  ;;  %v1483_v1 = vsel %vm1476_vm8, %v1450_v62, %v4876_v35  ;;  %v1352_v35 = vsel %vm1344_vm3, %v3810_v33, %v8282_v55  ;;  %v1364_v33 = vsel %vm1344_vm3, %v3957_v6, %v8285_v21  ;;  %v1287_v5 = vpop.permute.xlu2 %1286  ;;  %v8297_v62 = vld [vmem:[#allocation157_spill] sm:$0xff]  ;;  %v8303_v55 = vld [vmem:[#allocation7_spill] sm:$0xff] }
 0x2f1   : > { %v1516_v12 = vsel %vm1509_vm7, %v1483_v1, %v4967_v44  ;;  %v8283_v44 = vld [vmem:[#allocation115_spill] sm:$0xff]  ;;  %v1397_v47 = vsel %vm1377_vm5, %v1364_v33, %v8287_v0  ;;  %v8308_v33 = vld [vmem:[#allocation82_spill] sm:$0xff]  ;;  %v8310_v0 = vld [vmem:[#allocation168_spill] sm:$0xff] }
 0x2f2   : > { %v5346_v28 = vpop.permute.xlu1 %1272  ;;  %v1549_v40 = vsel %vm1542_vm9, %v1516_v12, %v5129_v32  ;;  %v1430_v56 = vsel %vm1410_vm4, %v1397_v47, %v8288_v63 }
 0x2f3   : > { %v1582_v30 = vsel %vm1575_vm11, %v1549_v40, %v1261_v26 }
 0x2f4   : > { %3550 = vmatmul.msk.f32.gmra.mxu0 %vm1617_vm10, %v1580_v27  ;;  %v8278_v27 = vld [vmem:[#allocation78_spill] sm:$0xff] }
 0x2f5   : > { %v1363_v36 = vsel %vm1344_vm3, %v3960_v7, %v8278_v27  ;;  %v8295_v27 = vld [vmem:[#allocation117_spill] sm:$0xff] }
 0x2f6   : > { %v5356_v57 = vpop.permute.xlu0 %1276  ;;  %v1396_v59 = vsel %vm1377_vm5, %v1363_v36, %v8280_v48 }
 0x2f7   : > { %v1429_v14 = vsel %vm1410_vm4, %v1396_v59, %v8281_v43  ;;  %v8298_v59 = vld [vmem:[#allocation22_spill] sm:$0xff]  ;;  %v8299_v43 = vld [vmem:[#allocation175_spill] sm:$0xff] }
 0x2f8   : > { %v1462_v7 = vsel %vm1443_vm6, %v1429_v14, %v4797_v29  ;;  %v1385_v29 = vsel %vm1377_vm5, %v1352_v35, %v8283_v44  ;;  %v8300_v14 = vld [vmem:[#allocation56_spill] sm:$0xff] }
 0x2f9   : > { %v1495_v15 = vsel %vm1476_vm8, %v1462_v7, %v4926_v31  ;;  %v1418_v31 = vsel %vm1410_vm4, %v1385_v29, %v8284_v37  ;;  %v8301_v7 = vld [vmem:[#allocation188_spill] sm:$0xff]  ;;  %v8306_v37 = vld [vmem:[#allocation71_spill] sm:$0xff] }
 0x2fa   : > { %v5377_v54 = vpop.permute.xlu1 %1278  ;;  %v1528_v22 = vsel %vm1509_vm7, %v1495_v15, %v5015_v42  ;;  %v1451_v42 = vsel %vm1443_vm6, %v1418_v31, %v8286_v20  ;;  %v8305_v29 = vld [vmem:[#allocation116_spill] sm:$0xff] }
 0x2fb   : > { %v1561_v32 = vsel %vm1542_vm9, %v1528_v22, %v5195_v4  ;;  %v1484_v4 = vsel %vm1476_vm8, %v1451_v42, %v4884_v39  ;;  %v8290_v39 = vld [vmem:[#allocation79_spill] sm:$0xff]  ;;  %v8304_v22 = vld [vmem:[#allocation46_spill] sm:$0xff]  ;;  %v8309_v20 = vld [vmem:[#allocation24_spill] sm:$0xff] }
 0x2fc   : > { %3551 = vmatmul.msk.f32.gmra.mxu0 %vm1617_vm10, %v1581_v8  ;;  %v1517_v53 = vsel %vm1509_vm7, %v1484_v4, %v5009_v41  ;;  %v8289_v8 = vld [vmem:[#allocation77_spill] sm:$0xff]  ;;  %v1353_v38 = vsel %vm1344_vm3, %v3848_v51, %v8290_v39  ;;  %v1365_v51 = vsel %vm1344_vm3, %v3998_v61, %v8293_v10  ;;  %v1366_v42 = vsel %vm1344_vm3, %v8309_v20, %v8308_v33  ;;  %v8311_v4 = vld [vmem:[#allocation128_spill] sm:$0xff]  ;;  %v8316_v39 = vld [vmem:[#allocation70_spill] sm:$0xff] }
 0x2fd   : > { %v1463_v6 = vsel %vm1443_vm6, %v1430_v56, %v8289_v8  ;;  %v1550_v60 = vsel %vm1542_vm9, %v1517_v53, %v5137_v13  ;;  %v1398_v36 = vsel %vm1377_vm5, %v1365_v51, %v8295_v27  ;;  %v1399_v63 = vsel %vm1377_vm5, %v1366_v42, %v8311_v4  ;;  %v8312_v56 = vld [vmem:[#allocation187_spill] sm:$0xff]  ;;  %v8313_v8 = vld [vmem:[#allocation149_spill] sm:$0xff]  ;;  %v8322_v27 = vld [vmem:[#allocation198_spill] sm:$0xff] }
 0x2fe   : > { %v1283_v45 = vpop.permute.xlu0 %1282  ;;  %v1496_v17 = vsel %vm1476_vm8, %v1463_v6, %v4933_v25  ;;  %v1583_v2 = vsel %vm1575_vm11, %v1550_v60, %v5226_v23  ;;  %v8292_v25 = vld [vmem:[#allocation147_spill] sm:$0xff]  ;;  %v1431_v48 = vsel %vm1410_vm4, %v1398_v36, %v8297_v62  ;;  %v1432_v6 = vsel %vm1410_vm4, %v1399_v63, %v8313_v8  ;;  %v8314_v60 = vld [vmem:[#allocation18_spill] sm:$0xff]  ;;  %v8320_v10 = vld [vmem:[#allocation25_spill] sm:$0xff] }
 0x2ff   : > { %v1593_v34 = vsel %vm1575_vm11, %v1560_v58, %v1283_v45  ;;  %v1529_v41 = vsel %vm1509_vm7, %v1496_v17, %v5057_v52  ;;  %v8291_v58 = vld [vmem:[#allocation105_spill] sm:$0xff]  ;;  %v1464_v61 = vsel %vm1443_vm6, %v1431_v48, %v8299_v43  ;;  %v8324_v62 = vld [vmem:[#allocation98_spill] sm:$0xff]  ;;  %v8325_v48 = vld [vmem:[#allocation27_spill] sm:$0xff] }
 0x300   : > { %3563 = vmatmul.msk.f32.gmra.mxu2 %vm1617_vm10, %v1593_v34  ;;  %v1386_v45 = vsel %vm1377_vm5, %v1353_v38, %v8291_v58  ;;  %v1562_v13 = vsel %vm1542_vm9, %v1529_v41, %v5207_v18  ;;  %v8294_v34 = vld [vmem:[#allocation74_spill] sm:$0xff]  ;;  %v1497_v40 = vsel %vm1476_vm8, %v1464_v61, %v8301_v7  ;;  %v8336_v33 = vld [vmem:[#allocation47_spill] sm:$0xff]  ;;  %v8337_v42 = vld [vmem:[#allocation108_spill] sm:$0xff] }
 0x301   : > { %v1419_v24 = vsel %vm1410_vm4, %v1386_v45, %v8292_v25  ;;  %v1595_v23 = vsel %vm1575_vm11, %v1562_v13, %v1287_v5  ;;  %v1530_v44 = vsel %vm1509_vm7, %v1497_v40, %v8304_v22  ;;  %v8315_v5 = vld [vmem:[#allocation177_spill] sm:$0xff]  ;;  %v8317_v41 = vld [vmem:[#allocation2_spill] sm:$0xff]  ;;  %v8332_v22 = vld [vmem:[#allocation76_spill] sm:$0xff] }
 0x302   : > { %v1285_v50 = vpop.permute.xlu1 %1284  ;;  %v1452_v52 = vsel %vm1443_vm6, %v1419_v24, %v8294_v34  ;;  %v1563_v31 = vsel %vm1542_vm9, %v1530_v44, %v8306_v37  ;;  %v8318_v25 = vld [vmem:[#allocation81_spill] sm:$0xff]  ;;  %v8321_v34 = vld [vmem:[#allocation118_spill] sm:$0xff]  ;;  %v1293_v37 = vpop.permute.xlu2 %1292 }
 0x303   : > { %v1594_v26 = vsel %vm1575_vm11, %v1561_v32, %v1285_v50  ;;  %v1485_v18 = vsel %vm1476_vm8, %v1452_v52, %v8296_v49  ;;  %v8319_v24 = vld [vmem:[#allocation9_spill] sm:$0xff]  ;;  %v8323_v49 = vld [vmem:[#allocation148_spill] sm:$0xff]  ;;  %v8327_v61 = vld [vmem:[#allocation130_spill] sm:$0xff] }
 0x304   : > { %3552 = vmatmul.msk.f32.gmra.mxu0 %vm1617_vm10, %v1582_v30  ;;  %v1518_v1 = vsel %vm1509_vm7, %v1485_v18, %v8298_v59  ;;  %v8302_v30 = vld [vmem:[#allocation61_spill] sm:$0xff]  ;;  %v1367_v59 = vsel %vm1344_vm3, %v8325_v48, %v8324_v62  ;;  %v8339_v63 = vld [vmem:[#allocation150_spill] sm:$0xff]  ;;  %v8353_v48 = vld [vmem:[#allocation119_spill] sm:$0xff] }
 0x305   : > { %v1551_v12 = vsel %vm1542_vm9, %v1518_v1, %v8300_v14  ;;  %v1354_v35 = vsel %vm1344_vm3, %v8303_v55, %v8302_v30  ;;  %v8326_v1 = vld [vmem:[#allocation163_spill] sm:$0xff]  ;;  %v1400_v14 = vsel %vm1377_vm5, %v1367_v59, %v8327_v61  ;;  %v8329_v40 = vld [vmem:[#allocation49_spill] sm:$0xff]  ;;  %v8341_v8 = vld [vmem:[#allocation26_spill] sm:$0xff] }
 0x306   : > { %v1289_v15 = vpop.permute.xlu0 %1288  ;;  %v1584_v50 = vsel %vm1575_vm11, %v1551_v12, %v5313_v46  ;;  %v1387_v32 = vsel %vm1377_vm5, %v1354_v35, %v8305_v29  ;;  %v8328_v12 = vld [vmem:[#allocation189_spill] sm:$0xff]  ;;  %v8333_v29 = vld [vmem:[#allocation195_spill] sm:$0xff] }
 0x307   : > { %v1596_v46 = vsel %vm1575_vm11, %v1563_v31, %v1289_v15  ;;  %v1433_v15 = vsel %vm1410_vm4, %v1400_v14, %v8329_v40  ;;  %v8331_v55 = vld [vmem:[#allocation169_spill] sm:$0xff] }
 0x308   : > { %3564 = vmatmul.msk.f32.gmra.mxu2 %vm1617_vm10, %v1594_v26  ;;  %v8307_v26 = vld [vmem:[#allocation138_spill] sm:$0xff]  ;;  %v1466_v35 = vsel %vm1443_vm6, %v1433_v15, %v8331_v55  ;;  %v8355_v61 = vld [vmem:[#allocation141_spill] sm:$0xff] }
 0x309   : > { %v1420_v21 = vsel %vm1410_vm4, %v1387_v32, %v8307_v26  ;;  %v1499_v32 = vsel %vm1476_vm8, %v1466_v35, %v8333_v29  ;;  %v8334_v26 = vld [vmem:[#allocation83_spill] sm:$0xff]  ;;  %v8358_v15 = vld [vmem:[#allocation170_spill] sm:$0xff] }
 0x30a   : > { %v1453_v47 = vsel %vm1443_vm6, %v1420_v21, %v8310_v0  ;;  %v1291_v45 = vpop.permute.xlu1 %1290  ;;  %v8335_v21 = vld [vmem:[#allocation8_spill] sm:$0xff]  ;;  %v1532_v20 = vsel %vm1509_vm7, %v1499_v32, %v8336_v33  ;;  %v8360_v35 = vld [vmem:[#allocation190_spill] sm:$0xff] }
 0x30b   : > { %v1486_v53 = vsel %vm1476_vm8, %v1453_v47, %v8312_v56  ;;  %v8338_v47 = vld [vmem:[#allocation199_spill] sm:$0xff]  ;;  %v8362_v32 = vld [vmem:[#allocation20_spill] sm:$0xff] }
 0x30c   : > { %3553 = vmatmul.msk.f32.gmra.mxu0 %vm1617_vm10, %v1583_v2  ;;  %v1519_v17 = vsel %vm1509_vm7, %v1486_v53, %v8314_v60  ;;  %v1465_v2 = vsel %vm1443_vm6, %v1432_v6, %v8315_v5  ;;  %v1565_v4 = vsel %vm1542_vm9, %v1532_v20, %v8338_v47  ;;  %v8340_v53 = vld [vmem:[#allocation100_spill] sm:$0xff]  ;;  %v8366_v47 = vld [vmem:[#allocation85_spill] sm:$0xff] }
 0x30d   : > { %v1552_v38 = vsel %vm1542_vm9, %v1519_v17, %v8316_v39  ;;  %v1498_v58 = vsel %vm1476_vm8, %v1465_v2, %v8317_v41  ;;  %v1368_v6 = vsel %vm1344_vm3, %v8341_v8, %v8340_v53  ;;  %v8342_v60 = vld [vmem:[#allocation80_spill] sm:$0xff]  ;;  %v8344_v39 = vld [vmem:[#allocation185_spill] sm:$0xff]  ;;  %v8345_v41 = vld [vmem:[#allocation158_spill] sm:$0xff] }
 0x30e   : > { %v1585_v13 = vsel %vm1575_vm11, %v1552_v38, %v5325_v3  ;;  %v1531_v51 = vsel %vm1509_vm7, %v1498_v58, %v8320_v10  ;;  %v8343_v5 = vld [vmem:[#allocation120_spill] sm:$0xff]  ;;  %v8369_v53 = vld [vmem:[#allocation121_spill] sm:$0xff] }
 0x30f   : > { %v1564_v36 = vsel %vm1542_vm9, %v1531_v51, %v8322_v27  ;;  %v1401_v2 = vsel %vm1377_vm5, %v1368_v6, %v8343_v5  ;;  %v8349_v51 = vld [vmem:[#allocation191_spill] sm:$0xff]  ;;  %v8365_v33 = vld [vmem:[#allocation196_spill] sm:$0xff] }
 0x310   : > { %3565 = vmatmul.msk.f32.gmra.mxu2 %vm1617_vm10, %v1595_v23  ;;  %v1355_v23 = vsel %vm1344_vm3, %v8319_v24, %v8318_v25  ;;  %v1597_v3 = vsel %vm1575_vm11, %v1564_v36, %v1291_v45  ;;  %v1434_v58 = vsel %vm1410_vm4, %v1401_v2, %v8345_v41  ;;  %v8346_v45 = vld [vmem:[#allocation28_spill] sm:$0xff]  ;;  %v8347_v25 = vld [vmem:[#allocation178_spill] sm:$0xff]  ;;  %v8372_v2 = vld [vmem:[#allocation101_spill] sm:$0xff] }
 0x311   : > { %v1388_v52 = vsel %vm1377_vm5, %v1355_v23, %v8321_v34  ;;  %v1467_v24 = vsel %vm1443_vm6, %v1434_v58, %v8347_v25  ;;  %v8348_v23 = vld [vmem:[#allocation60_spill] sm:$0xff]  ;;  %v8350_v36 = vld [vmem:[#allocation66_spill] sm:$0xff]  ;;  %v8374_v41 = vld [vmem:[#allocation65_spill] sm:$0xff] }
 0x312   : > { %v1421_v18 = vsel %vm1410_vm4, %v1388_v52, %v8323_v49  ;;  %v1500_v34 = vsel %vm1476_vm8, %v1467_v24, %v8349_v51  ;;  %v1295_v52 = vpop.permute.xlu0 %1294  ;;  %v8351_v49 = vld [vmem:[#allocation12_spill] sm:$0xff] }
 0x313   : > { %v1454_v43 = vsel %vm1443_vm6, %v1421_v18, %v8326_v1  ;;  %v1357_v18 = vsel %vm1344_vm3, %v8351_v49, %v8350_v36  ;;  %v8354_v1 = vld [vmem:[#allocation86_spill] sm:$0xff]  ;;  %v8370_v6 = vld [vmem:[#allocation200_spill] sm:$0xff] }
 0x314   : > { %3554 = vmatmul.msk.f32.gmra.mxu0 %vm1617_vm10, %v1584_v50  ;;  %v1487_v7 = vsel %vm1476_vm8, %v1454_v43, %v8328_v12  ;;  %v8330_v50 = vld [vmem:[#allocation23_spill] sm:$0xff]  ;;  %v1390_v59 = vsel %vm1377_vm5, %v1357_v18, %v8353_v48  ;;  %v8356_v12 = vld [vmem:[#allocation88_spill] sm:$0xff]  ;;  %v8380_v36 = vld [vmem:[#allocation90_spill] sm:$0xff] }
 0x315   : > { %v1520_v30 = vsel %vm1509_vm7, %v1487_v7, %v8330_v50  ;;  %v1423_v14 = vsel %vm1410_vm4, %v1390_v59, %v8355_v61  ;;  %v8357_v7 = vld [vmem:[#allocation31_spill] sm:$0xff]  ;;  %v8376_v25 = vld [vmem:[#allocation192_spill] sm:$0xff]  ;;  %v8381_v18 = vld [vmem:[#allocation10_spill] sm:$0xff] }
 0x316   : > { %v1553_v44 = vsel %vm1542_vm9, %v1520_v30, %v8332_v22  ;;  %v1369_v40 = vsel %vm1344_vm3, %v8357_v7, %v8356_v12  ;;  %v1456_v50 = vsel %vm1443_vm6, %v1423_v14, %v8358_v15  ;;  %v8359_v30 = vld [vmem:[#allocation131_spill] sm:$0xff]  ;;  %v8378_v51 = vld [vmem:[#allocation32_spill] sm:$0xff]  ;;  %v8382_v59 = vld [vmem:[#allocation89_spill] sm:$0xff] }
 0x317   : > { %v1586_v31 = vsel %vm1575_vm11, %v1553_v44, %v5248_v11  ;;  %v1598_v11 = vsel %vm1575_vm11, %v1565_v4, %v1293_v37  ;;  %v1402_v55 = vsel %vm1377_vm5, %v1369_v40, %v8359_v30  ;;  %v1489_v22 = vsel %vm1476_vm8, %v1456_v50, %v8360_v35  ;;  %v8361_v44 = vld [vmem:[#allocation41_spill] sm:$0xff]  ;;  %v8367_v4 = vld [vmem:[#allocation11_spill] sm:$0xff]  ;;  %v8384_v61 = vld [vmem:[#allocation4_spill] sm:$0xff] }
 0x318   : > { %3566 = vmatmul.msk.f32.gmra.mxu2 %vm1617_vm10, %v1596_v46  ;;  %v1356_v46 = vsel %vm1344_vm3, %v8335_v21, %v8334_v26  ;;  %v1435_v29 = vsel %vm1410_vm4, %v1402_v55, %v8361_v44  ;;  %v1522_v37 = vsel %vm1509_vm7, %v1489_v22, %v8362_v32  ;;  %v8364_v21 = vld [vmem:[#allocation84_spill] sm:$0xff]  ;;  %v8386_v7 = vld [vmem:[#allocation201_spill] sm:$0xff]  ;;  %v8387_v15 = vld [vmem:[#allocation42_spill] sm:$0xff] }
 0x319   : > { %v1389_v0 = vsel %vm1377_vm5, %v1356_v46, %v8337_v42  ;;  %v1555_v46 = vsel %vm1542_vm9, %v1522_v37, %v8364_v21  ;;  %v1297_v42 = vpop.permute.xlu1 %1296  ;;  %v8388_v30 = vld [vmem:[#allocation103_spill] sm:$0xff]  ;;  %v8389_v55 = vld [vmem:[#allocation37_spill] sm:$0xff]  ;;  %v8392_v37 = vld [vmem:[#allocation186_spill] sm:$0xff] }
 0x31a   : > { %v1422_v56 = vsel %vm1410_vm4, %v1389_v0, %v8339_v63  ;;  %v1588_v0 = vsel %vm1575_vm11, %v1555_v46, %v5346_v28  ;;  %v1358_v63 = vsel %vm1344_vm3, %v8367_v4, %v8366_v47  ;;  %v1371_v35 = vsel %vm1344_vm3, %v8389_v55, %v8388_v30  ;;  %v8390_v22 = vld [vmem:[#allocation171_spill] sm:$0xff]  ;;  %v8397_v4 = vld [vmem:[#allocation194_spill] sm:$0xff]  ;;  %v8418_v30 = vld [vmem:[#allocation136_spill] sm:$0xff] }
 0x31b   : > { %v1455_v17 = vsel %vm1443_vm6, %v1422_v56, %v8342_v60  ;;  %v8368_v56 = vld [vmem:[#allocation34_spill] sm:$0xff]  ;;  %v1391_v8 = vsel %vm1377_vm5, %v1358_v63, %v8369_v53  ;;  %v8394_v46 = vld [vmem:[#allocation35_spill] sm:$0xff]  ;;  %v8398_v53 = vld [vmem:[#allocation72_spill] sm:$0xff] }
 0x31c   : > { %3555 = vmatmul.msk.f32.gmra.mxu0 %vm1617_vm10, %v1585_v13  ;;  %v1488_v38 = vsel %vm1476_vm8, %v1455_v17, %v8344_v39  ;;  %v8371_v17 = vld [vmem:[#allocation151_spill] sm:$0xff]  ;;  %v8373_v39 = vld [vmem:[#allocation30_spill] sm:$0xff] }
 0x31d   : > { %v1521_v13 = vsel %vm1509_vm7, %v1488_v38, %v8346_v45  ;;  %v1424_v5 = vsel %vm1410_vm4, %v1391_v8, %v8371_v17  ;;  %v1370_v38 = vsel %vm1344_vm3, %v8373_v39, %v8372_v2  ;;  %v8375_v45 = vld [vmem:[#allocation133_spill] sm:$0xff]  ;;  %v8399_v8 = vld [vmem:[#allocation16_spill] sm:$0xff] }
 0x31e   : > { %v1554_v10 = vsel %vm1542_vm9, %v1521_v13, %v8348_v23  ;;  %v1457_v58 = vsel %vm1443_vm6, %v1424_v5, %v8374_v41  ;;  %v1403_v13 = vsel %vm1377_vm5, %v1370_v38, %v8375_v45  ;;  %v8377_v23 = vld [vmem:[#allocation51_spill] sm:$0xff]  ;;  %v8401_v5 = vld [vmem:[#allocation122_spill] sm:$0xff]  ;;  %v8402_v2 = vld [vmem:[#allocation197_spill] sm:$0xff] }
 0x31f   : > { %v1587_v27 = vsel %vm1575_vm11, %v1554_v10, %v5334_v9  ;;  %v1490_v24 = vsel %vm1476_vm8, %v1457_v58, %v8376_v25  ;;  %v1436_v10 = vsel %vm1410_vm4, %v1403_v13, %v8377_v23  ;;  %v8403_v38 = vld [vmem:[#allocation144_spill] sm:$0xff]  ;;  %v8404_v58 = vld [vmem:[#allocation93_spill] sm:$0xff]  ;;  %v8407_v23 = vld [vmem:[#allocation134_spill] sm:$0xff] }
 0x320   : > { %3567 = vmatmul.msk.f32.gmra.mxu2 %vm1617_vm10, %v1597_v3  ;;  %v8352_v3 = vld [vmem:[#allocation48_spill] sm:$0xff] }
 0x321   : > { %v1533_v62 = vsel %vm1509_vm7, %v1500_v34, %v8352_v3  ;;  %v1523_v34 = vsel %vm1509_vm7, %v1490_v24, %v8378_v51  ;;  %v8405_v45 = vld [vmem:[#allocation36_spill] sm:$0xff]  ;;  %v8408_v51 = vld [vmem:[#allocation193_spill] sm:$0xff] }
 0x322   : > { %v1566_v43 = vsel %vm1542_vm9, %v1533_v62, %v8354_v1  ;;  %v1556_v49 = vsel %vm1542_vm9, %v1523_v34, %v8380_v36  ;;  %v1299_v62 = vpop.permute.xlu2 %1298  ;;  %v8383_v1 = vld [vmem:[#allocation17_spill] sm:$0xff]  ;;  %v1372_v13 = vsel %vm1344_vm3, %v8405_v45, %v8404_v58  ;;  %v8406_v25 = vld [vmem:[#allocation172_spill] sm:$0xff] }
 0x323   : > { %v1599_v9 = vsel %vm1575_vm11, %v1566_v43, %v1295_v52  ;;  %v8379_v52 = vld [vmem:[#allocation87_spill] sm:$0xff]  ;;  %v1589_v48 = vsel %vm1575_vm11, %v1556_v49, %v5268_v16  ;;  %v1359_v43 = vsel %vm1344_vm3, %v8383_v1, %v8382_v59  ;;  %v8410_v36 = vld [vmem:[#allocation21_spill] sm:$0xff] }
 0x324   : > { %3556 = vmatmul.msk.f32.gmra.mxu0 %vm1617_vm10, %v1586_v31  ;;  %v8363_v31 = vld [vmem:[#allocation179_spill] sm:$0xff]  ;;  %v8413_v59 = vld [vmem:[#allocation13_spill] sm:$0xff] }
 0x325   : > { %v1468_v26 = vsel %vm1443_vm6, %v1435_v29, %v8363_v31  ;;  %v8391_v29 = vld [vmem:[#allocation123_spill] sm:$0xff]  ;;  %v8432_v45 = vld [vmem:[#allocation33_spill] sm:$0xff] }
 0x326   : > { %v1501_v20 = vsel %vm1476_vm8, %v1468_v26, %v8365_v33  ;;  %v1404_v32 = vsel %vm1377_vm5, %v1371_v35, %v8391_v29  ;;  %v8393_v26 = vld [vmem:[#allocation160_spill] sm:$0xff] }
 0x327   : > { %v1437_v21 = vsel %vm1410_vm4, %v1404_v32, %v8393_v26  ;;  %v8421_v32 = vld [vmem:[#allocation14_spill] sm:$0xff]  ;;  %v8422_v26 = vld [vmem:[#allocation55_spill] sm:$0xff] }
 0x328   : > { %3568 = vmatmul.msk.f32.gmra.mxu2 %vm1617_vm10, %v1598_v11  ;;  %v1534_v11 = vsel %vm1509_vm7, %v1501_v20, %v8368_v56  ;;  %v8395_v20 = vld [vmem:[#allocation180_spill] sm:$0xff]  ;;  %v1301_v56 = vpop.permute.xlu0 %1300 }
 0x329   : > { %v1567_v60 = vsel %vm1542_vm9, %v1534_v11, %v8370_v6  ;;  %v1360_v6 = vsel %vm1344_vm3, %v8399_v8, %v8398_v53  ;;  %v8427_v53 = vld [vmem:[#allocation162_spill] sm:$0xff] }
 0x32a   : > { %v1600_v28 = vsel %vm1575_vm11, %v1567_v60, %v1297_v42  ;;  %v1470_v42 = vsel %vm1443_vm6, %v1437_v21, %v8395_v20  ;;  %v8400_v60 = vld [vmem:[#allocation52_spill] sm:$0xff] }
 0x32b   : > { %v1503_v63 = vsel %vm1476_vm8, %v1470_v42, %v8397_v4 }
 0x32c   : > { %3557 = vmatmul.msk.f32.gmra.mxu0 %vm1617_vm10, %v1587_v27  ;;  %v1469_v27 = vsel %vm1443_vm6, %v1436_v10, %v8379_v52  ;;  %v1536_v17 = vsel %vm1509_vm7, %v1503_v63, %v8400_v60  ;;  %v1405_v10 = vsel %vm1377_vm5, %v1372_v13, %v8407_v23  ;;  %v8409_v52 = vld [vmem:[#allocation153_spill] sm:$0xff]  ;;  %v8426_v63 = vld [vmem:[#allocation126_spill] sm:$0xff] }
 0x32d   : > { %v1502_v3 = vsel %vm1476_vm8, %v1469_v27, %v8381_v18  ;;  %v1569_v39 = vsel %vm1542_vm9, %v1536_v17, %v8402_v2  ;;  %v1438_v27 = vsel %vm1410_vm4, %v1405_v10, %v8409_v52  ;;  %v8411_v18 = vld [vmem:[#allocation181_spill] sm:$0xff]  ;;  %v8428_v60 = vld [vmem:[#allocation182_spill] sm:$0xff]  ;;  %v8434_v10 = vld [vmem:[#allocation96_spill] sm:$0xff] }
 0x32e   : > { %v1535_v14 = vsel %vm1509_vm7, %v1502_v3, %v8384_v61  ;;  %v1471_v3 = vsel %vm1443_vm6, %v1438_v27, %v8411_v18  ;;  %v8437_v18 = vld [vmem:[#allocation137_spill] sm:$0xff] }
 0x32f   : > { %v1568_v40 = vsel %vm1542_vm9, %v1535_v14, %v8386_v7  ;;  %v1504_v1 = vsel %vm1476_vm8, %v1471_v3, %v8413_v59  ;;  %v8414_v14 = vld [vmem:[#allocation38_spill] sm:$0xff]  ;;  %v8439_v59 = vld [vmem:[#allocation156_spill] sm:$0xff] }
 0x330   : > { %3569 = vmatmul.msk.f32.gmra.mxu2 %vm1617_vm10, %v1599_v9  ;;  %v8385_v9 = vld [vmem:[#allocation111_spill] sm:$0xff]  ;;  %v1601_v16 = vsel %vm1575_vm11, %v1568_v40, %v1299_v62  ;;  %v8412_v62 = vld [vmem:[#allocation92_spill] sm:$0xff] }
 0x331   : > { %v1392_v12 = vsel %vm1377_vm5, %v1359_v43, %v8385_v9  ;;  %v1303_v43 = vpop.permute.xlu1 %1302  ;;  %v1537_v9 = vsel %vm1509_vm7, %v1504_v1, %v8414_v14 }
 0x332   : > { %v1425_v50 = vsel %vm1410_vm4, %v1392_v12, %v8387_v15  ;;  %v8415_v12 = vld [vmem:[#allocation202_spill] sm:$0xff]  ;;  %v8416_v15 = vld [vmem:[#allocation104_spill] sm:$0xff] }
 0x333   : > { %v1458_v44 = vsel %vm1443_vm6, %v1425_v50, %v8390_v22  ;;  %v1570_v7 = vsel %vm1542_vm9, %v1537_v9, %v8415_v12  ;;  %v8417_v50 = vld [vmem:[#allocation40_spill] sm:$0xff] }
 0x334   : > { %3558 = vmatmul.msk.f32.gmra.mxu0 %vm1617_vm10, %v1588_v0  ;;  %v1491_v31 = vsel %vm1476_vm8, %v1458_v44, %v8392_v37  ;;  %v8396_v0 = vld [vmem:[#allocation64_spill] sm:$0xff]  ;;  %v1603_v40 = vsel %vm1575_vm11, %v1570_v7, %v1303_v43  ;;  %v8420_v44 = vld [vmem:[#allocation174_spill] sm:$0xff]  ;;  %v7788_v43 = vunpack.i.l.bf16 %v5235_v19 }
 0x335   : > { %v1524_v33 = vsel %vm1509_vm7, %v1491_v31, %v8394_v46  ;;  %v1305_v31 = vpop.permute.xlu2 %1304  ;;  %v8440_v12 = vld [vmem:[#allocation184_spill] sm:$0xff] }
 0x336   : > { %v1557_v47 = vsel %vm1542_vm9, %v1524_v33, %v8396_v0  ;;  %v8423_v33 = vld [vmem:[#allocation63_spill] sm:$0xff]  ;;  %v8424_v0 = vld [vmem:[#allocation106_spill] sm:$0xff] }
 0x337   : > { %v1590_v11 = vsel %vm1575_vm11, %v1557_v47, %v5356_v57  ;;  %v1602_v57 = vsel %vm1575_vm11, %v1569_v39, %v1301_v56  ;;  %v8425_v47 = vld [vmem:[#allocation39_spill] sm:$0xff]  ;;  %v1307_v39 = vpop.permute.xlu0 %1306 }
 0x338   : > { %3570 = vmatmul.msk.f32.gmra.mxu2 %vm1617_vm10, %v1600_v28  ;;  %v1393_v28 = vsel %vm1377_vm5, %v1360_v6, %v8401_v5  ;;  %v1374_v4 = vsel %vm1344_vm3, %v8425_v47, %v8424_v0 }
 0x339   : > { %v1426_v41 = vsel %vm1410_vm4, %v1393_v28, %v8403_v38  ;;  %v1407_v56 = vsel %vm1377_vm5, %v1374_v4, %v8426_v63  ;;  %v8429_v28 = vld [vmem:[#allocation3_spill] sm:$0xff]  ;;  %v5783_v52 = vpop.permute.xlu1 %3670 }
 0x33a   : > { %v1459_v24 = vsel %vm1443_vm6, %v1426_v41, %v8406_v25  ;;  %v1440_v8 = vsel %vm1410_vm4, %v1407_v56, %v8427_v53  ;;  %v8430_v38 = vld [vmem:[#allocation59_spill] sm:$0xff]  ;;  %8436 = vst [vmem:[#allocation50_spill] sm:$0xff] %v5783_v52  ;;  %v7784_v0 = vunpack.i.h.bf16 %v5783_v52 }
 0x33b   : > { %v1492_v34 = vsel %vm1476_vm8, %v1459_v24, %v8408_v51  ;;  %v1473_v17 = vsel %vm1443_vm6, %v1440_v8, %v8428_v60  ;;  %v8435_v51 = vld [vmem:[#allocation44_spill] sm:$0xff]  ;;  %v8447_v4 = vld [vmem:[#allocation19_spill] sm:$0xff] }
 0x33c   : > { %3559 = vmatmul.msk.f32.gmra.mxu0 %vm1617_vm10, %v1589_v48  ;;  %v1525_v49 = vsel %vm1509_vm7, %v1492_v34, %v8410_v36  ;;  %v1506_v2 = vsel %vm1476_vm8, %v1473_v17, %v8429_v28  ;;  %v1375_v34 = vsel %vm1344_vm3, %v8435_v51, %v8434_v10 }
 0x33d   : > { %v1558_v48 = vsel %vm1542_vm9, %v1525_v49, %v8412_v62  ;;  %v1539_v41 = vsel %vm1509_vm7, %v1506_v2, %v8430_v38  ;;  %v1408_v3 = vsel %vm1377_vm5, %v1375_v34, %v8437_v18  ;;  %v8438_v62 = vld [vmem:[#allocation45_spill] sm:$0xff] }
 0x33e   : > { %v1591_v61 = vsel %vm1575_vm11, %v1558_v48, %v5377_v54  ;;  %v8419_v54 = vld [vmem:[#allocation54_spill] sm:$0xff]  ;;  %v1572_v13 = vsel %vm1542_vm9, %v1539_v41, %v8432_v45  ;;  %v7789_v48 = vunpack.i.l.bf16 %v8438_v62  ;;  %v1441_v1 = vsel %vm1410_vm4, %v1408_v3, %v8439_v59 }
 0x33f   : > { %v1605_v23 = vsel %vm1575_vm11, %v1572_v13, %v1307_v39  ;;  %v1474_v7 = vsel %vm1443_vm6, %v1441_v1, %v8440_v12 }
 0x340   : > { %3571 = vmatmul.msk.f32.gmra.mxu2 %vm1617_vm10, %v1601_v16  ;;  %v1373_v16 = vsel %vm1344_vm3, %v8417_v50, %v8416_v15  ;;  %v8441_v15 = vld [vmem:[#allocation15_spill] sm:$0xff] }
 0x341   : > { %v1406_v55 = vsel %vm1377_vm5, %v1373_v16, %v8418_v30  ;;  %v1507_v50 = vsel %vm1476_vm8, %v1474_v7, %v8441_v15 }
 0x342   : > { %v1439_v35 = vsel %vm1410_vm4, %v1406_v55, %v8419_v54  ;;  %v1540_v30 = vsel %vm1509_vm7, %v1507_v50, %v7789_v48 }
 0x343   : > { %v1472_v29 = vsel %vm1443_vm6, %v1439_v35, %v8420_v44  ;;  %v1573_v55 = vsel %vm1542_vm9, %v1540_v30, %v7788_v43  ;;  %v8442_v35 = vld [vmem:[#allocation107_spill] sm:$0xff] }
 0x344   : > { %3560 = vmatmul.msk.f32.gmra.mxu0 %vm1617_vm10, %v1590_v11  ;;  %v1505_v37 = vsel %vm1476_vm8, %v1472_v29, %v8421_v32  ;;  %v8444_v29 = vld [vmem:[#allocation139_spill] sm:$0xff] }
 0x345   : > { %v1538_v21 = vsel %vm1509_vm7, %v1505_v37, %v8422_v26  ;;  %v7786_v37 = vunpack.i.h.bf16 %v8438_v62  ;;  %v8445_v26 = vld [vmem:[#allocation58_spill] sm:$0xff] }
 0x346   : > { %v1571_v20 = vsel %vm1542_vm9, %v1538_v21, %v8423_v33 }
 0x347   : > { %v1604_v42 = vsel %vm1575_vm11, %v1571_v20, %v1305_v31  ;;  %v8446_v20 = vld [vmem:[#allocation176_spill] sm:$0xff] }
 0x348   : > { %3572 = vmatmul.msk.f32.gmra.mxu2 %vm1617_vm10, %v1602_v57 }
 0x34c   : > { %3561 = vmatmul.msk.f32.gmra.mxu0 %vm1617_vm10, %v1591_v61 }
 0x350   : > { %3573 = vmatmul.msk.f32.gmra.mxu2 %vm1617_vm10, %v1603_v40  ;;  %v7787_v40 = vunpack.i.l.bf16 %v5783_v52 }
 0x351   : > { %v1731_v22 = vpop.f32.mrf.mxu0 }
 0x352   : > { %v1827_v46 = vmax.f32 %v1731_v22, 0.0  ;;  %v1606_v54 = vsel %vm1575_vm11, %v1573_v55, %v7787_v40  ;;  %v8443_v22 = vld [vmem:[#allocation43_spill] sm:$0xff] }
 0x353   : > { %v1376_v44 = vsel %vm1344_vm3, %v8443_v22, %v8442_v35 }
 0x354   : > { %v1891_v11 = vrot.slane %v1827_v46, 7  ;;  %v1409_v32 = vsel %vm1377_vm5, %v1376_v44, %v8444_v29  ;;  %v7785_v46 = vunpack.i.h.bf16 %v5235_v19 }
 0x355   : > { %v1442_v21 = vsel %vm1410_vm4, %v1409_v32, %v8445_v26 }
 0x356   : > { %v5769_v57 = vsel %vm236_vm0, 0.0, %v1891_v11 }
 0x357   : > { %8431 = vst [vmem:[#allocation164_spill] sm:$0xff] %v5769_v57  ;;  %v2048_v27 = vrot.slane %v5769_v57, 1 }
 0x358   : > { %3574 = vmatmul.msk.f32.gmra.mxu2 %vm1617_vm10, %v1604_v42  ;;  %v1475_v42 = vsel %vm1443_vm6, %v1442_v21, %v8446_v20 }
 0x359   : > { %v1734_v6 = vpop.f32.mrf.mxu0  ;;  %v1508_v63 = vsel %vm1476_vm8, %v1475_v42, %v8447_v4 }
 0x35a   : > { %v1828_v5 = vmax.f32 %v1734_v6, 0.0  ;;  %v1541_v53 = vsel %vm1509_vm7, %v1508_v63, %v7786_v37 }
 0x35b   : > { %v1574_v8 = vsel %vm1542_vm9, %v1541_v53, %v7785_v46 }
 0x35c   : > { %v1892_v58 = vrot.slane %v1828_v5, 7  ;;  %v1607_v17 = vsel %vm1575_vm11, %v1574_v8, %v7784_v0 }
 0x35e   : > { %v5774_v25 = vsel %vm236_vm0, %v1891_v11, %v1892_v58  ;;  %v5777_v24 = vsel %vm236_vm0, %v1892_v58, 0.0 }
 0x35f   : > { %8433 = vst [vmem:[#allocation140_spill] sm:$0xff] %v5774_v25  ;;  %v2051_v36 = vrot.slane %v5777_v24, 1  ;;  %v2049_v49 = vrot.slane %v5774_v25, 1 }
 0x360   : > { %3575 = vmatmul.msk.f32.gmra.mxu2 %vm1617_vm10, %v1605_v23 }
 0x361   : > { %v1737_v61 = vpop.f32.mrf.mxu0  ;;  %v5796_v14 = vsel %vm402_vm1, %v2049_v49, %v2051_v36  ;;  %v5799_v9 = vsel %vm402_vm1, %v2048_v27, %v2049_v49 }
 0x362   : > { %2125 = vrot.lane.b32.xlu0 %v5796_v14, %s3715_s18  ;;  %2123 = vrot.lane.b32.xlu2 %v5799_v9, %s3715_s18  ;;  %v1829_v16 = vmax.f32 %v1737_v61, 0.0 }
 0x364   : > { %v1894_v31 = vrot.slane %v1829_v16, 7 }
 0x366   : > { %v5835_v56 = vsel %vm236_vm0, 0.0, %v1894_v31  ;;  %v5866_v23 = vpop.f32.mrf.mxu2 }
 0x367   : > { %8448 = vst [vmem:[#allocation91_spill] sm:$0xff] %v5835_v56  ;;  %v2053_v2 = vrot.slane %v5835_v56, 1 }
 0x368   : > { %3576 = vmatmul.msk.f32.gmra.mxu2 %vm1617_vm10, %v1606_v54 }
 0x369   : > { %v1740_v33 = vpop.f32.mrf.mxu0 }
 0x36a   : > { %v1830_v47 = vmax.f32 %v1740_v33, 0.0 }
 0x36c   : > { %v1895_v11 = vrot.slane %v1830_v47, 7 }
 0x36e   : > { %v5844_v6 = vsel %vm236_vm0, %v1894_v31, %v1895_v11  ;;  %v5847_v60 = vsel %vm236_vm0, %v1895_v11, 0.0 }
 0x36f   : > { %v2056_v5 = vrot.slane %v5847_v60, 1  ;;  %v2054_v28 = vrot.slane %v5844_v6, 1 }
 0x370   : > { %3577 = vmatmul.msk.f32.gmra.mxu2 %vm1617_vm10, %v1607_v17 }
 0x371   : > { %v1743_v39 = vpop.f32.mrf.mxu0  ;;  %v5857_v38 = vsel %vm402_vm1, %v2054_v28, %v2056_v5  ;;  %v5860_v41 = vsel %vm402_vm1, %v2053_v2, %v2054_v28 }
 0x372   : > { %2129 = vrot.lane.b32.xlu2 %v5857_v38, %s3715_s18  ;;  %2127 = vrot.lane.b32.xlu1 %v5860_v41, %s3715_s18  ;;  %v1831_v58 = vmax.f32 %v1743_v39, 0.0 }
 0x374   : > { %v1897_v45 = vrot.slane %v1831_v58, 7 }
 0x376   : > { %v5869_v51 = vsel %vm236_vm0, 0.0, %v1897_v45 }
 0x377   : > { %v2058_v3 = vrot.slane %v5869_v51, 1 }
 0x379   : > { %v1746_v13 = vpop.f32.mrf.mxu0 }
 0x37a   : > { %v1832_v10 = vmax.f32 %v1746_v13, 0.0 }
 0x37c   : > { %v1898_v34 = vrot.slane %v1832_v10, 7 }
 0x37e   : > { %v5872_v27 = vsel %vm236_vm0, %v1897_v45, %v1898_v34  ;;  %v5875_v36 = vsel %vm236_vm0, %v1898_v34, 0.0 }
 0x37f   : > { %v2061_v49 = vrot.slane %v5875_v36, 1  ;;  %v2059_v18 = vrot.slane %v5872_v27, 1 }
 0x381   : > { %v1749_v59 = vpop.f32.mrf.mxu0  ;;  %v5881_v1 = vsel %vm402_vm1, %v2059_v18, %v2061_v49  ;;  %v5884_v61 = vsel %vm402_vm1, %v2058_v3, %v2059_v18 }
 0x382   : > { %2133 = vrot.lane.b32.xlu1 %v5881_v1, %s3715_s18  ;;  %2131 = vrot.lane.b32.xlu0 %v5884_v61, %s3715_s18  ;;  %v1833_v7 = vmax.f32 %v1749_v59, 0.0 }
 0x383   : > { %v5890_v12 = vpop.f32.mrf.mxu2 }
 0x384   : > { %v1900_v15 = vrot.slane %v1833_v7, 7 }
 0x386   : > { %v5895_v55 = vsel %vm236_vm0, 0.0, %v1900_v15 }
 0x387   : > { %v2063_v32 = vrot.slane %v5895_v55, 1 }
 0x389   : > { %v1752_v50 = vpop.f32.mrf.mxu0 }
 0x38a   : > { %v1834_v16 = vmax.f32 %v1752_v50, 0.0 }
 0x38b   : > { %v5892_v30 = vpop.f32.mrf.mxu2 }
 0x38c   : > { %v1901_v54 = vrot.slane %v1834_v16, 7 }
 0x38e   : > { %v5898_v35 = vsel %vm236_vm0, %v1900_v15, %v1901_v54  ;;  %v5901_v22 = vsel %vm236_vm0, %v1901_v54, 0.0 }
 0x38f   : > { %v2066_v44 = vrot.slane %v5901_v22, 1  ;;  %v2064_v29 = vrot.slane %v5898_v35, 1 }
 0x391   : > { %v1755_v31 = vpop.f32.mrf.mxu0  ;;  %v5907_v26 = vsel %vm402_vm1, %v2064_v29, %v2066_v44  ;;  %v5910_v21 = vsel %vm402_vm1, %v2063_v32, %v2064_v29 }
 0x392   : > { %8449 = vst [vmem:[#allocation69_spill] sm:$0xff] %v5907_v26  ;;  %2137 = vrot.lane.b32.xlu0 %v5907_v26, %s3715_s18  ;;  %2135 = vrot.lane.b32.xlu2 %v5910_v21, %s3715_s18  ;;  %v1835_v20 = vmax.f32 %v1755_v31, 0.0 }
 0x393   : > { %8450 = vst [vmem:[#allocation6_spill] sm:$0xff] %v5910_v21  ;;  %v5916_v33 = vpop.f32.mrf.mxu2 }
 0x394   : > { %v1903_v42 = vrot.slane %v1835_v20, 7 }
 0x396   : > { %v5921_v11 = vsel %vm236_vm0, 0.0, %v1903_v42 }
 0x397   : > { %v2068_v2 = vrot.slane %v5921_v11, 1 }
 0x399   : > { %v1758_v47 = vpop.f32.mrf.mxu0 }
 0x39a   : > { %v1836_v4 = vmax.f32 %v1758_v47, 0.0 }
 0x39b   : > { %v5918_v63 = vpop.f32.mrf.mxu2 }
 0x39c   : > { %v1904_v53 = vrot.slane %v1836_v4, 7 }
 0x39e   : > { %v5924_v8 = vsel %vm236_vm0, %v1903_v42, %v1904_v53  ;;  %v5927_v17 = vsel %vm236_vm0, %v1904_v53, 0.0  ;;  %v1844_v53 = vmax.f32 %v5890_v12, 0.0 }
 0x39f   : > { %v2071_v5 = vrot.slane %v5927_v17, 1  ;;  %v2069_v28 = vrot.slane %v5924_v8, 1 }
 0x3a1   : > { %v1761_v39 = vpop.f32.mrf.mxu0  ;;  %v5933_v58 = vsel %vm402_vm1, %v2069_v28, %v2071_v5  ;;  %v5936_v45 = vsel %vm402_vm1, %v2068_v2, %v2069_v28  ;;  %v1843_v2 = vmax.f32 %v5866_v23, 0.0 }
 0x3a2   : > { %8451 = vst [vmem:[#allocation124_spill] sm:$0xff] %v5933_v58  ;;  %2141 = vrot.lane.b32.xlu2 %v5933_v58, %s3715_s18  ;;  %2139 = vrot.lane.b32.xlu1 %v5936_v45, %s3715_s18  ;;  %v1837_v10 = vmax.f32 %v1761_v39, 0.0 }
 0x3a3   : > { %8452 = vst [vmem:[#allocation99_spill] sm:$0xff] %v5936_v45  ;;  %v5942_v13 = vpop.f32.mrf.mxu2 }
 0x3a4   : > { %v1906_v34 = vrot.slane %v1837_v10, 7 }
 0x3a6   : > { %v5947_v59 = vsel %vm236_vm0, 0.0, %v1906_v34 }
 0x3a7   : > { %v2073_v44 = vrot.slane %v5947_v59, 1 }
 0x3a9   : > { %v1764_v49 = vpop.f32.mrf.mxu0 }
 0x3aa   : > { %v1838_v18 = vmax.f32 %v1764_v49, 0.0 }
 0x3ab   : > { %v5944_v3 = vpop.f32.mrf.mxu2 }
 0x3ac   : > { %v1907_v7 = vrot.slane %v1838_v18, 7 }
 0x3ae   : > { %v5950_v15 = vsel %vm236_vm0, %v1906_v34, %v1907_v7  ;;  %v5953_v50 = vsel %vm236_vm0, %v1907_v7, 0.0  ;;  %v1916_v34 = vrot.slane %v1844_v53, 7 }
 0x3af   : > { %8453 = vst [vmem:[#allocation152_spill] sm:$0xff] %v5950_v15  ;;  %v2076_v16 = vrot.slane %v5953_v50, 1  ;;  %v2074_v54 = vrot.slane %v5950_v15, 1 }
 0x3b1   : > { %v1767_v29 = vpop.f32.mrf.mxu0  ;;  %v5959_v32 = vsel %vm402_vm1, %v2074_v54, %v2076_v16  ;;  %v5962_v31 = vsel %vm402_vm1, %v2073_v44, %v2074_v54  ;;  %v1915_v54 = vrot.slane %v1843_v2, 7  ;;  %v1845_v2 = vmax.f32 %v5892_v30, 0.0 }
 0x3b2   : > { %8454 = vst [vmem:[#allocation142_spill] sm:$0xff] %v5959_v32  ;;  %2145 = vrot.lane.b32.xlu1 %v5959_v32, %s3715_s18  ;;  %2143 = vrot.lane.b32.xlu0 %v5962_v31, %s3715_s18  ;;  %v1839_v42 = vmax.f32 %v1767_v29, 0.0 }
 0x3b3   : > { %8455 = vst [vmem:[#allocation166_spill] sm:$0xff] %v5962_v31  ;;  %v1800_v20 = vpop.f32.mrf.mxu2  ;;  %v5999_v53 = vsel %vm236_vm0, 0.0, %v1915_v54  ;;  %v1918_v0 = vrot.slane %v1845_v2, 7  ;;  %v1849_v2 = vmax.f32 %v5944_v3, 0.0 }
 0x3b4   : > { %v1909_v47 = vrot.slane %v1839_v42, 7  ;;  %v5991_v42 = vsel %vm236_vm0, %v1915_v54, %v1916_v34  ;;  %8459 = vst [vmem:[#allocation110_spill] sm:$0xff] %v5999_v53 }
 0x3b5   : > { %8458 = vst [vmem:[#allocation5_spill] sm:$0xff] %v5991_v42 }
 0x3b6   : > { %v5973_v39 = vsel %vm236_vm0, 0.0, %v1909_v47 }
 0x3b7   : > { %v2078_v16 = vrot.slane %v5973_v39, 1 }
 0x3b9   : > { %v1770_v4 = vpop.f32.mrf.mxu0 }
 0x3ba   : > { %v1840_v5 = vmax.f32 %v1770_v4, 0.0  ;;  %v1846_v4 = vmax.f32 %v5916_v33, 0.0 }
 0x3bb   : > { %v5969_v28 = vpop.f32.mrf.mxu2 }
 0x3bc   : > { %v1910_v10 = vrot.slane %v1840_v5, 7 }
 0x3be   : > { %v5976_v49 = vsel %vm236_vm0, %v1909_v47, %v1910_v10  ;;  %v5979_v18 = vsel %vm236_vm0, %v1910_v10, 0.0  ;;  %v2089_v10 = vrot.slane %v5991_v42, 1 }
 0x3bf   : > { %v2081_v7 = vrot.slane %v5979_v18, 1  ;;  %v2079_v12 = vrot.slane %v5976_v49, 1 }
 0x3c1   : > { %v1773_v44 = vpop.f32.mrf.mxu0  ;;  %v5985_v23 = vsel %vm402_vm1, %v2079_v12, %v2081_v7  ;;  %v5988_v29 = vsel %vm402_vm1, %v2078_v16, %v2079_v12  ;;  %v1919_v7 = vrot.slane %v1846_v4, 7  ;;  %v2088_v12 = vrot.slane %v5999_v53, 1 }
 0x3c2   : > { %8456 = vst [vmem:[#allocation62_spill] sm:$0xff] %v5985_v23  ;;  %2149 = vrot.lane.b32.xlu0 %v5985_v23, %s3715_s18  ;;  %2147 = vrot.lane.b32.xlu2 %v5988_v29, %s3715_s18  ;;  %v1841_v5 = vmax.f32 %v1773_v44, 0.0  ;;  %v1850_v44 = vmax.f32 %v1800_v20, 0.0 }
 0x3c3   : > { %8457 = vst [vmem:[#allocation67_spill] sm:$0xff] %v5988_v29  ;;  %v1806_v47 = vpop.f32.mrf.mxu2  ;;  %v6005_v37 = vsel %vm402_vm1, %v2088_v12, %v2089_v10  ;;  %v6012_v54 = vsel %vm236_vm0, %v1918_v0, %v1919_v7  ;;  %v6015_v30 = vsel %vm236_vm0, %v1919_v7, 0.0 }
 0x3c4   : > { %v1912_v16 = vrot.slane %v1841_v5, 7  ;;  %8460 = vst [vmem:[#allocation132_spill] sm:$0xff] %v6005_v37  ;;  %v2094_v48 = vrot.slane %v6012_v54, 1  ;;  %v1925_v52 = vrot.slane %v1850_v44, 7 }
 0x3c6   : > { %v6018_v4 = vsel %vm236_vm0, 0.0, %v1912_v16 }
 0x3c7   : > { %8461 = vst [vmem:[#allocation165_spill] sm:$0xff] %v6018_v4  ;;  %v2083_v19 = vrot.slane %v6018_v4, 1 }
 0x3c9   : > { %v1776_v46 = vpop.f32.mrf.mxu0 }
 0x3ca   : > { %v1842_v40 = vmax.f32 %v1776_v46, 0.0  ;;  %2155 = vrot.lane.b32.xlu0 %v6005_v37, %s3715_s18  ;;  %v2096_v46 = vrot.slane %v6015_v30, 1 }
 0x3cb   : > { %v6009_v33 = vpop.f32.mrf.mxu2 }
 0x3cc   : > { %v1913_v5 = vrot.slane %v1842_v40, 7  ;;  %v1924_v40 = vrot.slane %v1849_v2, 7  ;;  %v6047_v44 = vsel %vm402_vm1, %v2094_v48, %v2096_v46  ;;  %v1851_v46 = vmax.f32 %v5969_v28, 0.0 }
 0x3cd   : > { %8465 = vst [vmem:[#allocation159_spill] sm:$0xff] %v6047_v44 }
 0x3ce   : > { %v6023_v12 = vsel %vm236_vm0, %v1912_v16, %v1913_v5  ;;  %v6026_v43 = vsel %vm236_vm0, %v1913_v5, 0.0  ;;  %v6039_v16 = vsel %vm236_vm0, %v1916_v34, 0.0  ;;  %v1848_v5 = vmax.f32 %v5942_v13, 0.0 }
 0x3cf   : > { %8462 = vst [vmem:[#allocation73_spill] sm:$0xff] %v6023_v12  ;;  %v2086_v7 = vrot.slane %v6026_v43, 1  ;;  %v2084_v20 = vrot.slane %v6023_v12, 1  ;;  %v6055_v34 = vsel %vm236_vm0, 0.0, %v1918_v0  ;;  %v1847_v13 = vmax.f32 %v5918_v63, 0.0 }
 0x3d0   : > { %v6060_v37 = vsel %vm236_vm0, 0.0, %v1924_v40  ;;  %v1927_v0 = vrot.slane %v1851_v46, 7 }
 0x3d1   : > { %v6033_v3 = vsel %vm402_vm1, %v2084_v20, %v2086_v7  ;;  %v6036_v62 = vsel %vm402_vm1, %v2083_v19, %v2084_v20  ;;  %v6050_v7 = vsel %vm236_vm0, %v1924_v40, %v1925_v52  ;;  %v1852_v19 = vmax.f32 %v1806_v47, 0.0 }
 0x3d2   : > { %8463 = vst [vmem:[#allocation112_spill] sm:$0xff] %v6033_v3  ;;  %2153 = vrot.lane.b32.xlu2 %v6033_v3, %s3715_s18  ;;  %2151 = vrot.lane.b32.xlu1 %v6036_v62, %s3715_s18  ;;  %v2091_v20 = vrot.slane %v6039_v16, 1  ;;  %v1922_v3 = vrot.slane %v1848_v5, 7  ;;  %v2104_v23 = vrot.slane %v6050_v7, 1  ;;  %v2093_v47 = vrot.slane %v6055_v34, 1 }
 0x3d3   : > { %8464 = vst [vmem:[#allocation143_spill] sm:$0xff] %v6036_v62  ;;  %v1812_v2 = vpop.f32.mrf.mxu2  ;;  %2161 = vrot.lane.b32.xlu0 %v6047_v44, %s3715_s18  ;;  %v1928_v29 = vrot.slane %v1852_v19, 7  ;;  %v1921_v62 = vrot.slane %v1847_v13, 7  ;;  %v2103_v44 = vrot.slane %v6060_v37, 1 }
 0x3d4   : > { %8466 = vst [vmem:[#allocation53_spill] sm:$0xff] %v6050_v7  ;;  %v6067_v31 = vsel %vm402_vm1, %v2089_v10, %v2091_v20  ;;  %v6070_v63 = vsel %vm402_vm1, %v2093_v47, %v2094_v48  ;;  %v6076_v28 = vsel %vm236_vm0, %v1922_v3, 0.0  ;;  %v1854_v58 = vmax.f32 %v1812_v2, 0.0 }
 0x3d5   : > { %8467 = vst [vmem:[#allocation102_spill] sm:$0xff] %v6067_v31  ;;  %v6073_v40 = vsel %vm236_vm0, %v1921_v62, %v1922_v3  ;;  %v6083_v5 = vsel %vm402_vm1, %v2103_v44, %v2104_v23  ;;  %v6086_v19 = vsel %vm236_vm0, %v1927_v0, %v1928_v29  ;;  %v6089_v48 = vsel %vm236_vm0, %v1928_v29, 0.0 }
 0x3d6   : > { %8468 = vst [vmem:[#allocation145_spill] sm:$0xff] %v6070_v63  ;;  %v6094_v3 = vsel %vm236_vm0, 0.0, %v1921_v62  ;;  %v2101_v13 = vrot.slane %v6076_v28, 1  ;;  %v2099_v46 = vrot.slane %v6073_v40, 1  ;;  %v2111_v44 = vrot.slane %v6089_v48, 1 }
 0x3d7   : > { %8469 = vst [vmem:[#allocation94_spill] sm:$0xff] %v6083_v5  ;;  %v2109_v47 = vrot.slane %v6086_v19, 1  ;;  %v6108_v62 = vsel %vm236_vm0, %v1925_v52, 0.0  ;;  %v1853_v52 = vmax.f32 %v6009_v33, 0.0 }
 0x3d8   : > { %8470 = vst [vmem:[#allocation68_spill] sm:$0xff] %v6086_v19  ;;  %v6102_v29 = vsel %vm402_vm1, %v2099_v46, %v2101_v13  ;;  %v2106_v2 = vrot.slane %v6108_v62, 1 }
 0x3d9   : > { %8471 = vst [vmem:[#allocation114_spill] sm:$0xff] %v6102_v29  ;;  %v1930_v26 = vrot.slane %v1853_v52, 7 }
 0x3da   : > { %2157 = vrot.lane.b32.xlu1 %v6067_v31, %s3715_s18  ;;  %2159 = vrot.lane.b32.xlu2 %v6070_v63, %s3715_s18  ;;  %v2098_v63 = vrot.slane %v6094_v3, 1 }
 0x3db   : > { %v1815_v10 = vpop.f32.mrf.mxu2  ;;  %2167 = vrot.lane.b32.xlu0 %v6083_v5, %s3715_s18 }
 0x3dc   : > { %v1855_v20 = vmax.f32 %v1815_v10, 0.0  ;;  %v6105_v5 = vsel %vm402_vm1, %v2098_v63, %v2099_v46  ;;  %v6115_v10 = vsel %vm402_vm1, %v2109_v47, %v2111_v44  ;;  %v6120_v63 = vsel %vm236_vm0, 0.0, %v1927_v0 }
 0x3dd   : > { %8472 = vst [vmem:[#allocation154_spill] sm:$0xff] %v6105_v5  ;;  %v2108_v32 = vrot.slane %v6120_v63, 1 }
 0x3de   : > { %v1933_v31 = vrot.slane %v1855_v20, 7  ;;  %8473 = vst [vmem:[#allocation173_spill] sm:$0xff] %v6115_v10 }
 0x3df   : > { %8474 = vst [vmem:[#allocation57_spill] sm:$0xff] %v6120_v63  ;;  %v6137_v33 = vsel %vm402_vm1, %v2108_v32, %v2109_v47  ;;  %v6155_v32 = vsel %vm236_vm0, 0.0, %v1930_v26  ;;  %v2216_v47 = vrot.slane %v5777_v24, 2 }
 0x3e0   : > { %v6125_v46 = vsel %vm236_vm0, 0.0, %v1933_v31  ;;  %8477 = vst [vmem:[#allocation78_spill] sm:$0xff] %v6137_v33  ;;  %v2113_v52 = vrot.slane %v6155_v32, 1 }
 0x3e1   : > { %8475 = vst [vmem:[#allocation113_spill] sm:$0xff] %v6125_v46 }
 0x3e2   : > { %2165 = vrot.lane.b32.xlu2 %v6102_v29, %s3715_s18  ;;  %2163 = vrot.lane.b32.xlu1 %v6105_v5, %s3715_s18  ;;  %v1931_v5 = vrot.slane %v1854_v58, 7  ;;  %8480 = vst [vmem:[#allocation29_spill] sm:$0xff] %v6155_v32 }
 0x3e3   : > { %v1818_v20 = vpop.f32.mrf.mxu2  ;;  %2173 = vrot.lane.b32.xlu0 %v6115_v10, %s3715_s18  ;;  %v6134_v10 = vsel %vm402_vm1, %v2104_v23, %v2106_v2 }
 0x3e4   : > { %v1856_v13 = vmax.f32 %v1818_v20, 0.0  ;;  %v2118_v20 = vrot.slane %v6125_v46, 1  ;;  %v6140_v21 = vsel %vm236_vm0, %v1930_v26, %v1931_v5  ;;  %v6143_v58 = vsel %vm236_vm0, %v1931_v5, 0.0 }
 0x3e5   : > { %8478 = vst [vmem:[#allocation167_spill] sm:$0xff] %v6140_v21  ;;  %v2116_v23 = vrot.slane %v6143_v58, 1  ;;  %v2114_v5 = vrot.slane %v6140_v21, 1 }
 0x3e6   : > { %v1934_v29 = vrot.slane %v1856_v13, 7  ;;  %v2214_v13 = vrot.slane %v5774_v25, 2 }
 0x3e7   : > { %v6163_v2 = vsel %vm402_vm1, %v2114_v5, %v2116_v23  ;;  %v2224_v23 = vrot.slane %v5872_v27, 2 }
 0x3e8   : > { %v6128_v44 = vsel %vm236_vm0, %v1933_v31, %v1934_v29  ;;  %8481 = vst [vmem:[#allocation75_spill] sm:$0xff] %v6163_v2  ;;  %v6176_v24 = vsel %vm579_vm2, %v2214_v13, %v2216_v47 }
 0x3e9   : > { %8476 = vst [vmem:[#allocation135_spill] sm:$0xff] %v6128_v44  ;;  %v2119_v0 = vrot.slane %v6128_v44, 1 }
 0x3ea   : > { %2169 = vrot.lane.b32.xlu1 %v6134_v10, %s3715_s18  ;;  %2171 = vrot.lane.b32.xlu2 %v6137_v33, %s3715_s18  ;;  %8483 = vst [vmem:[#allocation146_spill] sm:$0xff] %v6176_v24 }
 0x3eb   : > { %v6150_v31 = vsel %vm402_vm1, %v2118_v20, %v2119_v0  ;;  %v6166_v20 = vsel %vm402_vm1, %v2113_v52, %v2114_v5  ;;  %v2213_v5 = vrot.slane %v5769_v57, 2 }
 0x3ec   : > { %8479 = vst [vmem:[#allocation125_spill] sm:$0xff] %v6150_v31  ;;  %2179 = vrot.lane.b32.xlu0 %v6150_v31, %s3715_s18  ;;  %v6169_v31 = vsel %vm236_vm0, %v1934_v29, 0.0  ;;  %v2223_v29 = vrot.slane %v5869_v51, 2 }
 0x3ed   : > { %8482 = vst [vmem:[#allocation115_spill] sm:$0xff] %v6166_v20  ;;  %v2121_v26 = vrot.slane %v6169_v31, 1  ;;  %v6185_v52 = vsel %vm579_vm2, %v2213_v5, %v2214_v13  ;;  %v2219_v13 = vrot.slane %v5844_v6, 2  ;;  %v2231_v5 = vrot.slane %v5901_v22, 2  ;;  %v6219_v22 = vpop.permute.xlu2 %2123 }
 0x3ee   : > { %8484 = vst [vmem:[#allocation95_spill] sm:$0xff] %v6185_v52  ;;  %v6195_v47 = vsel %vm579_vm2, %v2223_v29, %v2224_v23  ;;  %v2239_v29 = vrot.slane %v5950_v15, 2 }
 0x3ef   : > { %8486 = vst [vmem:[#allocation127_spill] sm:$0xff] %v6195_v47 }
 0x3f0   : > { %8489 = vst [vmem:[#allocation79_spill] sm:$0xff] %v6219_v22  ;;  %v2233_v22 = vrot.slane %v5921_v11, 2 }
 0x3f2   : > { %2177 = vrot.lane.b32.xlu2 %v6163_v2, %s3715_s18  ;;  %2175 = vrot.lane.b32.xlu1 %v6166_v20, %s3715_s18  ;;  %v6188_v2 = vsel %vm402_vm1, %v2119_v0, %v2121_v26  ;;  %v2229_v0 = vrot.slane %v5898_v35, 2  ;;  %v2218_v26 = vrot.slane %v5835_v56, 2 }
 0x3f3   : > { %8485 = vst [vmem:[#allocation161_spill] sm:$0xff] %v6188_v2 }
 0x3f4   : > { %2290 = vrot.lane.b32.xlu0 %v6176_v24, %s3716_s19  ;;  %v2221_v24 = vrot.slane %v5847_v60, 2  ;;  %v6215_v60 = vsel %vm579_vm2, %v2229_v0, %v2231_v5 }
 0x3f5   : > { %8488 = vst [vmem:[#allocation77_spill] sm:$0xff] %v6215_v60  ;;  %v6240_v5 = vpop.permute.xlu2 %2129 }
 0x3f6   : > { %8491 = vst [vmem:[#allocation147_spill] sm:$0xff] %v6240_v5 }
 0x3fa   : > { %2288 = vrot.lane.b32.xlu2 %v6185_v52, %s3716_s19  ;;  %2181 = vrot.lane.b32.xlu1 %v6188_v2, %s3715_s18  ;;  %v6205_v52 = vsel %vm579_vm2, %v2219_v13, %v2221_v24  ;;  %v6208_v2 = vsel %vm579_vm2, %v2218_v26, %v2219_v13  ;;  %v2226_v24 = vrot.slane %v5875_v36, 2  ;;  %v2228_v13 = vrot.slane %v5895_v55, 2 }
 0x3fb   : > { %8487 = vst [vmem:[#allocation155_spill] sm:$0xff] %v6208_v2  ;;  %v2238_v26 = vrot.slane %v5947_v59, 2 }
 0x3fc   : > { %2296 = vrot.lane.b32.xlu0 %v6195_v47, %s3716_s19  ;;  %v6226_v47 = vsel %vm579_vm2, %v2228_v13, %v2229_v0  ;;  %v2236_v0 = vrot.slane %v5927_v17, 2  ;;  %v2234_v13 = vrot.slane %v5924_v8, 2 }
 0x3fd   : > { %v6236_v36 = vsel %vm579_vm2, %v2238_v26, %v2239_v29  ;;  %v6264_v5 = vpop.permute.xlu2 %2135 }
 0x3fe   : > { %8490 = vst [vmem:[#allocation105_spill] sm:$0xff] %v6236_v36  ;;  %v6251_v26 = vsel %vm579_vm2, %v2233_v22, %v2234_v13  ;;  %v2254_v22 = vrot.slane %v5991_v42, 2 }
 0x3ff   : > { %8493 = vst [vmem:[#allocation74_spill] sm:$0xff] %v6251_v26 }
 0x400   : > { %8496 = vst [vmem:[#allocation157_spill] sm:$0xff] %v6264_v5 }
 0x402   : > { %2294 = vrot.lane.b32.xlu2 %v6205_v52, %s3716_s19  ;;  %2292 = vrot.lane.b32.xlu1 %v6208_v2, %s3716_s19  ;;  %v6229_v2 = vsel %vm579_vm2, %v2224_v23, %v2226_v24  ;;  %v2246_v23 = vrot.slane %v5979_v18, 2  ;;  %v2244_v24 = vrot.slane %v5976_v49, 2  ;;  %v6262_v18 = vpop.permute.xlu0 %2125 }
 0x403   : > { %8495 = vst [vmem:[#allocation183_spill] sm:$0xff] %v6262_v18 }
 0x404   : > { %2302 = vrot.lane.b32.xlu0 %v6215_v60, %s3716_s19  ;;  %v6248_v60 = vsel %vm579_vm2, %v2234_v13, %v2236_v0  ;;  %v6258_v17 = vsel %vm579_vm2, %v2244_v24, %v2246_v23  ;;  %v2241_v0 = vrot.slane %v5953_v50, 2  ;;  %v2243_v13 = vrot.slane %v5973_v39, 2 }
 0x405   : > { %8492 = vst [vmem:[#allocation97_spill] sm:$0xff] %v6248_v60  ;;  %v6287_v5 = vpop.permute.xlu2 %2141 }
 0x406   : > { %8494 = vst [vmem:[#allocation117_spill] sm:$0xff] %v6258_v17  ;;  %v6274_v23 = vsel %vm579_vm2, %v2239_v29, %v2241_v0  ;;  %v2249_v29 = vrot.slane %v6023_v12, 2  ;;  %v2261_v0 = vrot.slane %v6015_v30, 2  ;;  %v6307_v30 = vpop.permute.xlu1 %2127 }
 0x407   : > { %8498 = vst [vmem:[#allocation175_spill] sm:$0xff] %v6274_v23 }
 0x408   : > { %8501 = vst [vmem:[#allocation61_spill] sm:$0xff] %v6287_v5  ;;  %v2258_v5 = vrot.slane %v6055_v34, 2 }
 0x409   : > { %8505 = vst [vmem:[#allocation71_spill] sm:$0xff] %v6307_v30 }
 0x40a   : > { %2300 = vrot.lane.b32.xlu2 %v6226_v47, %s3716_s19  ;;  %2298 = vrot.lane.b32.xlu1 %v6229_v2, %s3716_s19  ;;  %v6285_v18 = vpop.permute.xlu0 %2131 }
 0x40b   : > { %8500 = vst [vmem:[#allocation188_spill] sm:$0xff] %v6285_v18 }
 0x40c   : > { %2308 = vrot.lane.b32.xlu0 %v6236_v36, %s3716_s19  ;;  %v2253_v36 = vrot.slane %v5999_v53, 2 }
 0x40e   : > { %v6281_v50 = vsel %vm579_vm2, %v2253_v36, %v2254_v22 }
 0x40f   : > { %8499 = vst [vmem:[#allocation56_spill] sm:$0xff] %v6281_v50 }
 0x412   : > { %2306 = vrot.lane.b32.xlu2 %v6248_v60, %s3716_s19  ;;  %2304 = vrot.lane.b32.xlu1 %v6251_v26, %s3716_s19  ;;  %v6271_v26 = vsel %vm579_vm2, %v2243_v13, %v2244_v24  ;;  %v2251_v24 = vrot.slane %v6026_v43, 2  ;;  %v2259_v13 = vrot.slane %v6012_v54, 2  ;;  %v6311_v18 = vpop.permute.xlu0 %2137 }
 0x413   : > { %8497 = vst [vmem:[#allocation22_spill] sm:$0xff] %v6271_v26 }
 0x414   : > { %2314 = vrot.lane.b32.xlu0 %v6258_v17, %s3716_s19  ;;  %v2248_v17 = vrot.slane %v6018_v4, 2  ;;  %v6295_v36 = vsel %vm579_vm2, %v2249_v29, %v2251_v24  ;;  %v6305_v43 = vsel %vm579_vm2, %v2259_v13, %v2261_v0  ;;  %8506 = vst [vmem:[#allocation138_spill] sm:$0xff] %v6311_v18  ;;  %v6320_v0 = vsel %vm579_vm2, %v2258_v5, %v2259_v13  ;;  %v6332_v18 = vpop.permute.xlu1 %2133 }
 0x415   : > { %8502 = vst [vmem:[#allocation7_spill] sm:$0xff] %v6295_v36  ;;  %v2264_v13 = vrot.slane %v6073_v40, 2 }
 0x416   : > { %8504 = vst [vmem:[#allocation116_spill] sm:$0xff] %v6305_v43 }
 0x417   : > { %8510 = vst [vmem:[#allocation128_spill] sm:$0xff] %v6332_v18 }
 0x41a   : > { %2312 = vrot.lane.b32.xlu2 %v6271_v26, %s3716_s19  ;;  %2310 = vrot.lane.b32.xlu1 %v6274_v23, %s3716_s19  ;;  %v6298_v23 = vsel %vm579_vm2, %v2248_v17, %v2249_v29  ;;  %v2256_v17 = vrot.slane %v6039_v16, 2  ;;  %v2269_v29 = vrot.slane %v6050_v7, 2 }
 0x41b   : > { %8503 = vst [vmem:[#allocation46_spill] sm:$0xff] %v6298_v23 }
 0x41c   : > { %2320 = vrot.lane.b32.xlu0 %v6281_v50, %s3716_s19  ;;  %v6313_v24 = vpop.permute.xlu2 %2147  ;;  %v2268_v50 = vrot.slane %v6060_v37, 2  ;;  %v6323_v30 = vsel %vm579_vm2, %v2254_v22, %v2256_v17  ;;  %v2266_v22 = vrot.slane %v6076_v28, 2  ;;  %v2276_v17 = vrot.slane %v6089_v48, 2  ;;  %v6358_v48 = vpop.permute.xlu1 %2139 }
 0x41d   : > { %8507 = vst [vmem:[#allocation82_spill] sm:$0xff] %v6313_v24 }
 0x41e   : > { %8508 = vst [vmem:[#allocation24_spill] sm:$0xff] %v6323_v30  ;;  %v6330_v16 = vsel %vm579_vm2, %v2268_v50, %v2269_v29  ;;  %v2263_v50 = vrot.slane %v6094_v3, 2 }
 0x41f   : > { %8509 = vst [vmem:[#allocation168_spill] sm:$0xff] %v6330_v16 }
 0x420   : > { %v6349_v18 = vsel %vm579_vm2, %v2263_v50, %v2264_v13  ;;  %8514 = vst [vmem:[#allocation177_spill] sm:$0xff] %v6358_v48  ;;  %v2284_v50 = vrot.slane %v6128_v44, 2 }
 0x422   : > { %2318 = vrot.lane.b32.xlu2 %v6295_v36, %s3716_s19  ;;  %2316 = vrot.lane.b32.xlu1 %v6298_v23, %s3716_s19 }
 0x424   : > { %2326 = vrot.lane.b32.xlu0 %v6305_v43, %s3716_s19  ;;  %v6336_v24 = vpop.permute.xlu0 %2143  ;;  %v2274_v43 = vrot.slane %v6086_v19, 2 }
 0x425   : > { %8511 = vst [vmem:[#allocation187_spill] sm:$0xff] %v6336_v24  ;;  %v2273_v24 = vrot.slane %v6120_v63, 2 }
 0x426   : > { %v6356_v28 = vsel %vm579_vm2, %v2274_v43, %v2276_v17 }
 0x427   : > { %8513 = vst [vmem:[#allocation18_spill] sm:$0xff] %v6356_v28  ;;  %v6371_v17 = vsel %vm579_vm2, %v2273_v24, %v2274_v43  ;;  %v2281_v24 = vrot.slane %v6143_v58, 2 }
 0x428   : > { %8516 = vst [vmem:[#allocation2_spill] sm:$0xff] %v6371_v17 }
 0x42a   : > { %2324 = vrot.lane.b32.xlu2 %v6320_v0, %s3716_s19  ;;  %2322 = vrot.lane.b32.xlu1 %v6323_v30, %s3716_s19  ;;  %v6346_v30 = vsel %vm579_vm2, %v2264_v13, %v2266_v22  ;;  %v2271_v13 = vrot.slane %v6108_v62, 2 }
 0x42c   : > { %2332 = vrot.lane.b32.xlu0 %v6330_v16, %s3716_s19  ;;  %v6338_v5 = vpop.permute.xlu2 %2153  ;;  %v2283_v16 = vrot.slane %v6125_v46, 2  ;;  %v6374_v48 = vsel %vm579_vm2, %v2269_v29, %v2271_v13  ;;  %v2279_v29 = vrot.slane %v6140_v21, 2  ;;  %v2278_v13 = vrot.slane %v6155_v32, 2 }
 0x42d   : > { %8512 = vst [vmem:[#allocation149_spill] sm:$0xff] %v6338_v5 }
 0x42e   : > { %8517 = vst [vmem:[#allocation81_spill] sm:$0xff] %v6374_v48  ;;  %v6381_v62 = vsel %vm579_vm2, %v2283_v16, %v2284_v50  ;;  %v6398_v16 = vsel %vm579_vm2, %v2278_v13, %v2279_v29 }
 0x42f   : > { %8518 = vst [vmem:[#allocation9_spill] sm:$0xff] %v6381_v62 }
 0x430   : > { %8523 = vst [vmem:[#allocation98_spill] sm:$0xff] %v6398_v16 }
 0x432   : > { %2330 = vrot.lane.b32.xlu2 %v6346_v30, %s3716_s19  ;;  %2328 = vrot.lane.b32.xlu1 %v6349_v18, %s3716_s19 }
 0x434   : > { %2338 = vrot.lane.b32.xlu0 %v6356_v28, %s3716_s19  ;;  %v6362_v5 = vpop.permute.xlu2 %2159  ;;  %v6364_v22 = vpop.permute.xlu0 %2149 }
 0x435   : > { %8515 = vst [vmem:[#allocation70_spill] sm:$0xff] %v6364_v22  ;;  %v6383_v28 = vpop.permute.xlu1 %2145 }
 0x436   : > { %8519 = vst [vmem:[#allocation25_spill] sm:$0xff] %v6383_v28 }
 0x43a   : > { %2336 = vrot.lane.b32.xlu2 %v6371_v17, %s3716_s19  ;;  %2334 = vrot.lane.b32.xlu1 %v6374_v48, %s3716_s19  ;;  %v6395_v17 = vsel %vm579_vm2, %v2279_v29, %v2281_v24 }
 0x43b   : > { %8522 = vst [vmem:[#allocation148_spill] sm:$0xff] %v6395_v17 }
 0x43c   : > { %2344 = vrot.lane.b32.xlu0 %v6381_v62, %s3716_s19  ;;  %v6387_v22 = vpop.permute.xlu2 %2165  ;;  %v6389_v43 = vpop.permute.xlu0 %2155  ;;  %v2286_v62 = vrot.slane %v6169_v31, 2 }
 0x43d   : > { %8520 = vst [vmem:[#allocation118_spill] sm:$0xff] %v6387_v22 }
 0x43e   : > { %8521 = vst [vmem:[#allocation198_spill] sm:$0xff] %v6389_v43  ;;  %v6414_v29 = vsel %vm579_vm2, %v2284_v50, %v2286_v62  ;;  %v1821_v43 = vpop.f32.mrf.mxu2 }
 0x43f   : > { %8527 = vst [vmem:[#allocation189_spill] sm:$0xff] %v6414_v29 }
 0x442   : > { %2342 = vrot.lane.b32.xlu2 %v6395_v17, %s3716_s19  ;;  %2340 = vrot.lane.b32.xlu1 %v6398_v16, %s3716_s19  ;;  %v1857_v16 = vmax.f32 %v1821_v43, 0.0 }
 0x444   : > { %2381 = vrot.lane.b32.xlu0 %v5774_v25, %s3717_s20  ;;  %v6406_v58 = vpop.permute.xlu1 %2151  ;;  %v6408_v22 = vpop.permute.xlu2 %2171 }
 0x445   : > { %8524 = vst [vmem:[#allocation27_spill] sm:$0xff] %v6406_v58  ;;  %v6411_v24 = vpop.permute.xlu0 %2161 }
 0x446   : > { %8525 = vst [vmem:[#allocation163_spill] sm:$0xff] %v6408_v22 }
 0x447   : > { %8526 = vst [vmem:[#allocation130_spill] sm:$0xff] %v6411_v24  ;;  %v1936_v24 = vrot.slane %v1857_v16, 7 }
 0x449   : > { %v6543_v16 = vsel %vm236_vm0, 0.0, %v1936_v24 }
 0x44a   : > { %2379 = vrot.lane.b32.xlu2 %v5769_v57, %s3717_s20  ;;  %2346 = vrot.lane.b32.xlu1 %v6414_v29, %s3716_s19  ;;  %8551 = vst [vmem:[#allocation48_spill] sm:$0xff] %v6543_v16  ;;  %s7397_s19 = scalar_lea.vmem %s7671_s3, %s3612_s14 }
 0x44c   : > { %2387 = vrot.lane.b32.xlu0 %v5869_v51, %s3717_s20  ;;  %v6422_v13 = vpop.permute.xlu1 %2157  ;;  %v6424_v17 = vpop.permute.xlu2 %2177 }
 0x44d   : > { %8528 = vst [vmem:[#allocation49_spill] sm:$0xff] %v6422_v13  ;;  %v6426_v22 = vpop.permute.xlu0 %2167 }
 0x44e   : > { %8529 = vst [vmem:[#allocation23_spill] sm:$0xff] %v6424_v17 }
 0x44f   : > { %8530 = vst [vmem:[#allocation169_spill] sm:$0xff] %v6426_v22 }
 0x452   : > { %2385 = vrot.lane.b32.xlu2 %v5844_v6, %s3717_s20  ;;  %2383 = vrot.lane.b32.xlu1 %v5835_v56, %s3717_s20 }
 0x454   : > { %2393 = vrot.lane.b32.xlu0 %v5898_v35, %s3717_s20  ;;  %v6434_v31 = vpop.permute.xlu1 %2163  ;;  %v6436_v50 = vpop.permute.xlu2 %2288 }
 0x455   : > { %8531 = vst [vmem:[#allocation76_spill] sm:$0xff] %v6434_v31  ;;  %v6438_v62 = vpop.permute.xlu0 %2173 }
 0x456   : > { %8532 = vst [vmem:[#allocation195_spill] sm:$0xff] %v6436_v50 }
 0x457   : > { %8533 = vst [vmem:[#allocation83_spill] sm:$0xff] %v6438_v62 }
 0x45a   : > { %2391 = vrot.lane.b32.xlu2 %v5895_v55, %s3717_s20  ;;  %2389 = vrot.lane.b32.xlu1 %v5872_v27, %s3717_s20 }
 0x45c   : > { %2399 = vrot.lane.b32.xlu0 %v5947_v59, %s3717_s20  ;;  %v6446_v17 = vpop.permute.xlu1 %2169  ;;  %v6448_v22 = vpop.permute.xlu2 %2294 }
 0x45d   : > { %8534 = vst [vmem:[#allocation8_spill] sm:$0xff] %v6446_v17 }
 0x45e   : > { %8535 = vst [vmem:[#allocation47_spill] sm:$0xff] %v6448_v22  ;;  %v6450_v29 = vpop.permute.xlu0 %2179 }
 0x45f   : > { %8536 = vst [vmem:[#allocation108_spill] sm:$0xff] %v6450_v29 }
 0x462   : > { %2397 = vrot.lane.b32.xlu2 %v5924_v8, %s3717_s20  ;;  %2395 = vrot.lane.b32.xlu1 %v5921_v11, %s3717_s20 }
 0x464   : > { %2405 = vrot.lane.b32.xlu0 %v5976_v49, %s3717_s20  ;;  %v6458_v62 = vpop.permute.xlu2 %2300  ;;  %v6460_v13 = vpop.permute.xlu1 %2175 }
 0x465   : > { %8537 = vst [vmem:[#allocation199_spill] sm:$0xff] %v6460_v13 }
 0x466   : > { %v6462_v25 = vpop.permute.xlu0 %2290 }
 0x467   : > { %8538 = vst [vmem:[#allocation150_spill] sm:$0xff] %v6462_v25 }
 0x46a   : > { %2403 = vrot.lane.b32.xlu2 %v5973_v39, %s3717_s20  ;;  %2401 = vrot.lane.b32.xlu1 %v5950_v15, %s3717_s20 }
 0x46c   : > { %2411 = vrot.lane.b32.xlu0 %v5999_v53, %s3717_s20  ;;  %v6470_v29 = vpop.permute.xlu2 %2306  ;;  %v6472_v17 = vpop.permute.xlu1 %2181 }
 0x46d   : > { %8539 = vst [vmem:[#allocation100_spill] sm:$0xff] %v6472_v17 }
 0x46e   : > { %v6474_v22 = vpop.permute.xlu0 %2296 }
 0x46f   : > { %8540 = vst [vmem:[#allocation26_spill] sm:$0xff] %v6474_v22 }
 0x472   : > { %2409 = vrot.lane.b32.xlu2 %v6023_v12, %s3717_s20  ;;  %2407 = vrot.lane.b32.xlu1 %v6018_v4, %s3717_s20 }
 0x474   : > { %2417 = vrot.lane.b32.xlu0 %v6012_v54, %s3717_s20  ;;  %v6482_v13 = vpop.permute.xlu2 %2312  ;;  %v6484_v25 = vpop.permute.xlu1 %2292 }
 0x475   : > { %8541 = vst [vmem:[#allocation80_spill] sm:$0xff] %v6484_v25 }
 0x476   : > { %v6486_v53 = vpop.permute.xlu0 %2302 }
 0x47a   : > { %2415 = vrot.lane.b32.xlu2 %v6055_v34, %s3717_s20  ;;  %2413 = vrot.lane.b32.xlu1 %v5991_v42, %s3717_s20 }
 0x47c   : > { %2423 = vrot.lane.b32.xlu0 %v6060_v37, %s3717_s20  ;;  %v6494_v17 = vpop.permute.xlu2 %2318  ;;  %v6496_v22 = vpop.permute.xlu1 %2298 }
 0x47d   : > { %8542 = vst [vmem:[#allocation120_spill] sm:$0xff] %v6494_v17  ;;  %v1824_v17 = vpop.f32.mrf.mxu2 }
 0x47e   : > { %v6498_v50 = vpop.permute.xlu0 %2308  ;;  %v1858_v12 = vmax.f32 %v1824_v17, 0.0 }
 0x480   : > { %v6524_v31 = vrot.slane %v1858_v12, 7 }
 0x482   : > { %2421 = vrot.lane.b32.xlu2 %v6073_v40, %s3717_s20  ;;  %2419 = vrot.lane.b32.xlu1 %v6094_v3, %s3717_s20  ;;  %v6532_v17 = vsel %vm236_vm0, %v1936_v24, %v6524_v31 }
 0x483   : > { %8547 = vst [vmem:[#allocation60_spill] sm:$0xff] %v6532_v17 }
 0x484   : > { %2429 = vrot.lane.b32.xlu0 %v6086_v19, %s3717_s20  ;;  %v6506_v25 = vpop.permute.xlu2 %2324  ;;  %v6508_v42 = vpop.permute.xlu1 %2304 }
 0x486   : > { %v6510_v57 = vpop.permute.xlu0 %2314 }
 0x487   : > { %8543 = vst [vmem:[#allocation185_spill] sm:$0xff] %v6510_v57 }
 0x48a   : > { %2427 = vrot.lane.b32.xlu2 %v6120_v63, %s3717_s20  ;;  %2425 = vrot.lane.b32.xlu1 %v6050_v7, %s3717_s20  ;;  %v8582_v63 = vld [vmem:[#allocation145_spill] sm:$0xff] }
 0x48c   : > { %2435 = vrot.lane.b32.xlu0 %v6125_v46, %s3717_s20  ;;  %v6518_v4 = vpop.permute.xlu2 %2330  ;;  %v6520_v58 = vpop.permute.xlu1 %2310 }
 0x48d   : > { %8544 = vst [vmem:[#allocation158_spill] sm:$0xff] %v6518_v4 }
 0x48e   : > { %8545 = vst [vmem:[#allocation28_spill] sm:$0xff] %v6520_v58  ;;  %v6522_v19 = vpop.permute.xlu0 %2320  ;;  %v8586_v58 = vld [vmem:[#allocation114_spill] sm:$0xff] }
 0x48f   : > { %8546 = vst [vmem:[#allocation178_spill] sm:$0xff] %v6522_v19 }
 0x492   : > { %2433 = vrot.lane.b32.xlu2 %v6140_v21, %s3717_s20  ;;  %2431 = vrot.lane.b32.xlu1 %v6155_v32, %s3717_s20 }
 0x494   : > { %2441 = vrot.lane.b32.xlu0 %v6532_v17, %s3717_s20  ;;  %v6536_v43 = vpop.permute.xlu2 %2336  ;;  %v6538_v4 = vpop.permute.xlu1 %2316 }
 0x495   : > { %8548 = vst [vmem:[#allocation191_spill] sm:$0xff] %v6536_v43 }
 0x496   : > { %8549 = vst [vmem:[#allocation66_spill] sm:$0xff] %v6538_v4  ;;  %v6540_v12 = vpop.permute.xlu0 %2326 }
 0x497   : > { %8550 = vst [vmem:[#allocation12_spill] sm:$0xff] %v6540_v12  ;;  %v8576_v12 = vld [vmem:[#allocation112_spill] sm:$0xff] }
 0x49a   : > { %2437 = vrot.lane.b32.xlu1 %v6128_v44, %s3717_s20  ;;  %2439 = vrot.lane.b32.xlu2 %v6543_v16, %s3717_s20 }
 0x49c   : > { %2485 = vrot.lane.b32.xlu0 %v5860_v41, %s3718_s21  ;;  %v6551_v46 = vpop.permute.xlu2 %2342  ;;  %v6553_v21 = vpop.permute.xlu1 %2322 }
 0x49d   : > { %8552 = vst [vmem:[#allocation119_spill] sm:$0xff] %v6551_v46 }
 0x49e   : > { %8553 = vst [vmem:[#allocation86_spill] sm:$0xff] %v6553_v21  ;;  %v6555_v43 = vpop.permute.xlu0 %2332  ;;  %v8563_v21 = vld [vmem:[#allocation142_spill] sm:$0xff] }
 0x49f   : > { %8554 = vst [vmem:[#allocation141_spill] sm:$0xff] %v6555_v43  ;;  %v8561_v43 = vld [vmem:[#allocation6_spill] sm:$0xff] }
 0x4a2   : > { %2481 = vrot.lane.b32.xlu1 %v5799_v9, %s3718_s21  ;;  %2483 = vrot.lane.b32.xlu2 %v5796_v14, %s3718_s21 }
 0x4a4   : > { %2491 = vrot.lane.b32.xlu0 %v5881_v1, %s3718_s21  ;;  %v6563_v24 = vpop.permute.xlu2 %2379  ;;  %v6565_v44 = vpop.permute.xlu1 %2328 }
 0x4a5   : > { %8555 = vst [vmem:[#allocation88_spill] sm:$0xff] %v6563_v24 }
 0x4a6   : > { %8556 = vst [vmem:[#allocation31_spill] sm:$0xff] %v6565_v44  ;;  %v6567_v19 = vpop.permute.xlu0 %2338 }
 0x4a7   : > { %8557 = vst [vmem:[#allocation170_spill] sm:$0xff] %v6567_v19  ;;  %v8562_v19 = vld [vmem:[#allocation69_spill] sm:$0xff] }
 0x4aa   : > { %2487 = vrot.lane.b32.xlu1 %v5857_v38, %s3718_s21  ;;  %2489 = vrot.lane.b32.xlu2 %v5884_v61, %s3718_s21 }
 0x4ac   : > { %2497 = vrot.lane.b32.xlu0 %v5936_v45, %s3718_s21  ;;  %v6575_v9 = vpop.permute.xlu2 %2385  ;;  %v6577_v14 = vpop.permute.xlu1 %2334 }
 0x4ad   : > { %8558 = vst [vmem:[#allocation131_spill] sm:$0xff] %v6575_v9  ;;  %v8567_v9 = vld [vmem:[#allocation124_spill] sm:$0xff] }
 0x4ae   : > { %8559 = vst [vmem:[#allocation190_spill] sm:$0xff] %v6577_v14  ;;  %v6579_v46 = vpop.permute.xlu0 %2344  ;;  %v8569_v14 = vld [vmem:[#allocation143_spill] sm:$0xff] }
 0x4af   : > { %8560 = vst [vmem:[#allocation41_spill] sm:$0xff] %v6579_v46  ;;  %v8568_v46 = vld [vmem:[#allocation166_spill] sm:$0xff] }
 0x4b2   : > { %2493 = vrot.lane.b32.xlu1 %v8561_v43, %s3718_s21  ;;  %2495 = vrot.lane.b32.xlu2 %v8562_v19, %s3718_s21 }
 0x4b4   : > { %2503 = vrot.lane.b32.xlu0 %v8563_v21, %s3718_s21  ;;  %v6587_v32 = vpop.permute.xlu2 %2391  ;;  %v6589_v4 = vpop.permute.xlu1 %2340 }
 0x4b5   : > { %8564 = vst [vmem:[#allocation20_spill] sm:$0xff] %v6587_v32  ;;  %v8572_v32 = vld [vmem:[#allocation67_spill] sm:$0xff] }
 0x4b6   : > { %8565 = vst [vmem:[#allocation179_spill] sm:$0xff] %v6589_v4  ;;  %v6591_v45 = vpop.permute.xlu0 %2381  ;;  %v8573_v4 = vld [vmem:[#allocation62_spill] sm:$0xff] }
 0x4b7   : > { %8566 = vst [vmem:[#allocation84_spill] sm:$0xff] %v6591_v45 }
 0x4ba   : > { %2499 = vrot.lane.b32.xlu1 %v8567_v9, %s3718_s21  ;;  %2501 = vrot.lane.b32.xlu2 %v8568_v46, %s3718_s21  ;;  %v8574_v9 = vld [vmem:[#allocation102_spill] sm:$0xff] }
 0x4bc   : > { %2509 = vrot.lane.b32.xlu0 %v8569_v14, %s3718_s21  ;;  %v6599_v44 = vpop.permute.xlu2 %2397  ;;  %v6601_v24 = vpop.permute.xlu1 %2346 }
 0x4bd   : > { %8570 = vst [vmem:[#allocation196_spill] sm:$0xff] %v6601_v24  ;;  %v8577_v24 = vld [vmem:[#allocation132_spill] sm:$0xff] }
 0x4be   : > { %v6603_v21 = vpop.permute.xlu0 %2387 }
 0x4bf   : > { %8571 = vst [vmem:[#allocation85_spill] sm:$0xff] %v6603_v21 }
 0x4c2   : > { %2505 = vrot.lane.b32.xlu1 %v8572_v32, %s3718_s21  ;;  %2507 = vrot.lane.b32.xlu2 %v8573_v4, %s3718_s21  ;;  %v8578_v32 = vld [vmem:[#allocation154_spill] sm:$0xff] }
 0x4c4   : > { %2515 = vrot.lane.b32.xlu0 %v8574_v9, %s3718_s21  ;;  %v6611_v45 = vpop.permute.xlu2 %2403  ;;  %v6613_v46 = vpop.permute.xlu1 %2383 }
 0x4c5   : > { %8575 = vst [vmem:[#allocation11_spill] sm:$0xff] %v6613_v46  ;;  %v8583_v46 = vld [vmem:[#allocation159_spill] sm:$0xff] }
 0x4c6   : > { %v6615_v14 = vpop.permute.xlu0 %2393 }
 0x4ca   : > { %2511 = vrot.lane.b32.xlu1 %v8576_v12, %s3718_s21  ;;  %2513 = vrot.lane.b32.xlu2 %v8577_v24, %s3718_s21 }
 0x4cc   : > { %2521 = vrot.lane.b32.xlu0 %v8578_v32, %s3718_s21  ;;  %v6623_v21 = vpop.permute.xlu2 %2409  ;;  %v6625_v4 = vpop.permute.xlu1 %2389 }
 0x4cd   : > { %8579 = vst [vmem:[#allocation34_spill] sm:$0xff] %v6623_v21 }
 0x4ce   : > { %8580 = vst [vmem:[#allocation121_spill] sm:$0xff] %v6625_v4  ;;  %v6627_v9 = vpop.permute.xlu0 %2399  ;;  %v8587_v4 = vld [vmem:[#allocation94_spill] sm:$0xff] }
 0x4cf   : > { %8581 = vst [vmem:[#allocation200_spill] sm:$0xff] %v6627_v9 }
 0x4d2   : > { %2517 = vrot.lane.b32.xlu1 %v8582_v63, %s3718_s21  ;;  %2519 = vrot.lane.b32.xlu2 %v8583_v46, %s3718_s21 }
 0x4d4   : > { %2527 = vrot.lane.b32.xlu0 %v6134_v10, %s3718_s21  ;;  %v6635_v12 = vpop.permute.xlu2 %2415  ;;  %v6637_v24 = vpop.permute.xlu1 %2395 }
 0x4d5   : > { %8584 = vst [vmem:[#allocation151_spill] sm:$0xff] %v6635_v12  ;;  %v8590_v12 = vld [vmem:[#allocation173_spill] sm:$0xff] }
 0x4d6   : > { %v6639_v48 = vpop.permute.xlu0 %2405 }
 0x4d7   : > { %8585 = vst [vmem:[#allocation101_spill] sm:$0xff] %v6639_v48  ;;  %v8591_v48 = vld [vmem:[#allocation161_spill] sm:$0xff] }
 0x4da   : > { %2523 = vrot.lane.b32.xlu1 %v8586_v58, %s3718_s21  ;;  %2525 = vrot.lane.b32.xlu2 %v8587_v4, %s3718_s21 }
 0x4dc   : > { %2533 = vrot.lane.b32.xlu0 %v6166_v20, %s3718_s21  ;;  %v6647_v15 = vpop.permute.xlu2 %2421  ;;  %v6649_v28 = vpop.permute.xlu1 %2401 }
 0x4dd   : > { %8588 = vst [vmem:[#allocation30_spill] sm:$0xff] %v6647_v15  ;;  %v6667_v15 = vsel %vm236_vm0, %v6524_v31, 0.0  ;;  %v2476_v31 = vrot.slane %v6543_v16, 1 }
 0x4de   : > { %v6651_v21 = vpop.permute.xlu0 %2411  ;;  %8594 = vst [vmem:[#allocation51_spill] sm:$0xff] %v6667_v15  ;;  %v2479_v57 = vrot.slane %v6667_v15, 1 }
 0x4df   : > { %8589 = vst [vmem:[#allocation65_spill] sm:$0xff] %v6651_v21  ;;  %v8595_v21 = vld [vmem:[#allocation75_spill] sm:$0xff] }
 0x4e2   : > { %2529 = vrot.lane.b32.xlu1 %v6137_v33, %s3718_s21  ;;  %2531 = vrot.lane.b32.xlu2 %v8590_v12, %s3718_s21  ;;  %v8596_v33 = vld [vmem:[#allocation125_spill] sm:$0xff]  ;;  %v8597_v12 = vld [vmem:[#allocation95_spill] sm:$0xff] }
 0x4e4   : > { %2539 = vrot.lane.b32.xlu0 %v8591_v48, %s3718_s21  ;;  %v6659_v19 = vpop.permute.xlu2 %2427  ;;  %v6661_v9 = vpop.permute.xlu1 %2407 }
 0x4e5   : > { %8592 = vst [vmem:[#allocation133_spill] sm:$0xff] %v6659_v19 }
 0x4e6   : > { %v6663_v20 = vpop.permute.xlu0 %2417 }
 0x4e7   : > { %8593 = vst [vmem:[#allocation192_spill] sm:$0xff] %v6663_v20  ;;  %v2477_v20 = vrot.slane %v6532_v17, 1 }
 0x4ea   : > { %2535 = vrot.lane.b32.xlu1 %v8595_v21, %s3718_s21  ;;  %2537 = vrot.lane.b32.xlu2 %v8596_v33, %s3718_s21  ;;  %v6685_v21 = vsel %vm402_vm1, %v2477_v20, %v2479_v57  ;;  %v6688_v33 = vsel %vm402_vm1, %v2476_v31, %v2477_v20  ;;  %v8605_v57 = vld [vmem:[#allocation155_spill] sm:$0xff]  ;;  %v8606_v20 = vld [vmem:[#allocation146_spill] sm:$0xff] }
 0x4eb   : > { %8601 = vst [vmem:[#allocation10_spill] sm:$0xff] %v6685_v21 }
 0x4ec   : > { %2582 = vrot.lane.b32.xlu0 %v8597_v12, %s3719_s22  ;;  %v6675_v48 = vpop.permute.xlu2 %2433  ;;  %v6677_v19 = vpop.permute.xlu1 %2413  ;;  %8602 = vst [vmem:[#allocation89_spill] sm:$0xff] %v6688_v33 }
 0x4ed   : > { %8598 = vst [vmem:[#allocation32_spill] sm:$0xff] %v6675_v48 }
 0x4ee   : > { %8599 = vst [vmem:[#allocation87_spill] sm:$0xff] %v6677_v19  ;;  %v6681_v7 = vpop.permute.xlu0 %2423 }
 0x4ef   : > { %8600 = vst [vmem:[#allocation90_spill] sm:$0xff] %v6681_v7 }
 0x4f2   : > { %2543 = vrot.lane.b32.xlu2 %v6685_v21, %s3718_s21  ;;  %2541 = vrot.lane.b32.xlu1 %v6688_v33, %s3718_s21 }
 0x4f4   : > { %2588 = vrot.lane.b32.xlu0 %v6205_v52, %s3719_s22  ;;  %v6696_v12 = vpop.permute.xlu1 %2419  ;;  %v6698_v48 = vpop.permute.xlu2 %2439 }
 0x4f5   : > { %8603 = vst [vmem:[#allocation17_spill] sm:$0xff] %v6698_v48  ;;  %v8610_v48 = vld [vmem:[#allocation127_spill] sm:$0xff] }
 0x4f6   : > { %v6700_v15 = vpop.permute.xlu0 %2429 }
 0x4f7   : > { %8604 = vst [vmem:[#allocation4_spill] sm:$0xff] %v6700_v15 }
 0x4fa   : > { %2586 = vrot.lane.b32.xlu2 %v8605_v57, %s3719_s22  ;;  %2584 = vrot.lane.b32.xlu1 %v8606_v20, %s3719_s22 }
 0x4fc   : > { %2594 = vrot.lane.b32.xlu0 %v6226_v47, %s3719_s22  ;;  %v6708_v31 = vpop.permute.xlu1 %2425  ;;  %v6710_v21 = vpop.permute.xlu2 %2483 }
 0x4fd   : > { %8607 = vst [vmem:[#allocation111_spill] sm:$0xff] %v6708_v31  ;;  %v8614_v31 = vld [vmem:[#allocation74_spill] sm:$0xff] }
 0x4fe   : > { %8608 = vst [vmem:[#allocation201_spill] sm:$0xff] %v6710_v21  ;;  %v6712_v17 = vpop.permute.xlu0 %2435 }
 0x4ff   : > { %8609 = vst [vmem:[#allocation42_spill] sm:$0xff] %v6712_v17  ;;  %v8615_v17 = vld [vmem:[#allocation77_spill] sm:$0xff] }
 0x502   : > { %2592 = vrot.lane.b32.xlu2 %v6229_v2, %s3719_s22  ;;  %2590 = vrot.lane.b32.xlu1 %v8610_v48, %s3719_s22 }
 0x504   : > { %2600 = vrot.lane.b32.xlu0 %v6248_v60, %s3719_s22  ;;  %v6720_v15 = vpop.permute.xlu1 %2431  ;;  %v6722_v20 = vpop.permute.xlu2 %2489 }
 0x505   : > { %8611 = vst [vmem:[#allocation103_spill] sm:$0xff] %v6720_v15  ;;  %v8618_v15 = vld [vmem:[#allocation175_spill] sm:$0xff] }
 0x506   : > { %8612 = vst [vmem:[#allocation37_spill] sm:$0xff] %v6722_v20  ;;  %v6724_v16 = vpop.permute.xlu0 %2441 }
 0x507   : > { %8613 = vst [vmem:[#allocation171_spill] sm:$0xff] %v6724_v16  ;;  %v8619_v16 = vld [vmem:[#allocation105_spill] sm:$0xff] }
 0x50a   : > { %2598 = vrot.lane.b32.xlu2 %v8614_v31, %s3719_s22  ;;  %2596 = vrot.lane.b32.xlu1 %v8615_v17, %s3719_s22 }
 0x50c   : > { %2606 = vrot.lane.b32.xlu0 %v6271_v26, %s3719_s22  ;;  %v6732_v33 = vpop.permute.xlu1 %2437  ;;  %v6734_v19 = vpop.permute.xlu2 %2495 }
 0x50d   : > { %8616 = vst [vmem:[#allocation123_spill] sm:$0xff] %v6732_v33  ;;  %v8622_v33 = vld [vmem:[#allocation117_spill] sm:$0xff] }
 0x50e   : > { %v6736_v60 = vpop.permute.xlu0 %2485 }
 0x50f   : > { %8617 = vst [vmem:[#allocation186_spill] sm:$0xff] %v6736_v60  ;;  %v8624_v60 = vld [vmem:[#allocation24_spill] sm:$0xff] }
 0x512   : > { %2604 = vrot.lane.b32.xlu2 %v8618_v15, %s3719_s22  ;;  %2602 = vrot.lane.b32.xlu1 %v8619_v16, %s3719_s22 }
 0x514   : > { %2612 = vrot.lane.b32.xlu0 %v6295_v36, %s3719_s22  ;;  %v6744_v20 = vpop.permute.xlu1 %2481  ;;  %v6746_v21 = vpop.permute.xlu2 %2501 }
 0x515   : > { %8620 = vst [vmem:[#allocation160_spill] sm:$0xff] %v6744_v20  ;;  %v8625_v20 = vld [vmem:[#allocation56_spill] sm:$0xff] }
 0x516   : > { %v6748_v26 = vpop.permute.xlu0 %2491 }
 0x517   : > { %8621 = vst [vmem:[#allocation35_spill] sm:$0xff] %v6748_v26 }
 0x51a   : > { %2610 = vrot.lane.b32.xlu2 %v6298_v23, %s3719_s22  ;;  %2608 = vrot.lane.b32.xlu1 %v8622_v33, %s3719_s22 }
 0x51c   : > { %2618 = vrot.lane.b32.xlu0 %v6320_v0, %s3719_s22  ;;  %v6756_v15 = vpop.permute.xlu1 %2487  ;;  %v6758_v16 = vpop.permute.xlu2 %2507 }
 0x51d   : > { %8623 = vst [vmem:[#allocation180_spill] sm:$0xff] %v6756_v15  ;;  %v8628_v15 = vld [vmem:[#allocation116_spill] sm:$0xff] }
 0x51e   : > { %v2498_v36 = vpop.permute.xlu0 %2497 }
 0x522   : > { %2616 = vrot.lane.b32.xlu2 %v8624_v60, %s3719_s22  ;;  %2614 = vrot.lane.b32.xlu1 %v8625_v20, %s3719_s22 }
 0x524   : > { %2624 = vrot.lane.b32.xlu0 %v6346_v30, %s3719_s22  ;;  %v6766_v23 = vpop.permute.xlu1 %2493  ;;  %v6768_v33 = vpop.permute.xlu2 %2513 }
 0x525   : > { %8626 = vst [vmem:[#allocation64_spill] sm:$0xff] %v6766_v23  ;;  %v8630_v23 = vld [vmem:[#allocation168_spill] sm:$0xff] }
 0x526   : > { %8627 = vst [vmem:[#allocation194_spill] sm:$0xff] %v6768_v33  ;;  %v2504_v26 = vpop.permute.xlu0 %2503 }
 0x52a   : > { %2622 = vrot.lane.b32.xlu2 %v6349_v18, %s3719_s22  ;;  %2620 = vrot.lane.b32.xlu1 %v8628_v15, %s3719_s22 }
 0x52c   : > { %2800 = vrot.lane.b32.xlu0 %v8582_v63, %s3721_s24  ;;  %v6776_v60 = vpop.permute.xlu1 %2499  ;;  %v6778_v20 = vpop.permute.xlu2 %2519 }
 0x52d   : > { %8629 = vst [vmem:[#allocation72_spill] sm:$0xff] %v6778_v20 }
 0x52e   : > { %v6780_v7 = vpop.permute.xlu0 %2509 }
 0x532   : > { %2710 = vrot.lane.b32.xlu2 %v6055_v34, %s3720_s23  ;;  %2626 = vrot.lane.b32.xlu1 %v8630_v23, %s3719_s22 }
 0x534   : > { %2768 = vrot.lane.b32.xlu0 %v5860_v41, %s3721_s24  ;;  %v6788_v33 = vpop.permute.xlu1 %2505  ;;  %v6790_v31 = vpop.permute.xlu2 %2525 }
 0x536   : > { %v6792_v63 = vpop.permute.xlu0 %2515 }
 0x53a   : > { %2678 = vrot.lane.b32.xlu2 %v5835_v56, %s3720_s23  ;;  %2890 = vrot.lane.b32.xlu1 %v6320_v0, %s3722_s25 }
 0x53c   : > { %2802 = vrot.lane.b32.xlu0 %v8583_v46, %s3721_s24  ;;  %v6800_v20 = vpop.permute.xlu1 %2511  ;;  %v6802_v17 = vpop.permute.xlu2 %2531 }
 0x53d   : > { %8631 = vst [vmem:[#allocation16_spill] sm:$0xff] %v6802_v17 }
 0x53e   : > { %v6804_v41 = vpop.permute.xlu0 %2521 }
 0x542   : > { %2858 = vrot.lane.b32.xlu2 %v8605_v57, %s3722_s25  ;;  %2712 = vrot.lane.b32.xlu1 %v6012_v54, %s3720_s23 }
 0x544   : > { %2770 = vrot.lane.b32.xlu0 %v5857_v38, %s3721_s24  ;;  %v6812_v56 = vpop.permute.xlu1 %2517  ;;  %v6814_v0 = vpop.permute.xlu2 %2537 }
 0x545   : > { %8632 = vst [vmem:[#allocation52_spill] sm:$0xff] %v6814_v0 }
 0x546   : > { %v6816_v46 = vpop.permute.xlu0 %2527 }
 0x547   : > { %8633 = vst [vmem:[#allocation122_spill] sm:$0xff] %v6816_v46 }
 0x54a   : > { %2680 = vrot.lane.b32.xlu2 %v5844_v6, %s3720_s23  ;;  %2892 = vrot.lane.b32.xlu1 %v8628_v15, %s3722_s25 }
 0x54c   : > { %2804 = vrot.lane.b32.xlu0 %v8578_v32, %s3721_s24  ;;  %v6824_v57 = vpop.permute.xlu1 %2523  ;;  %v6826_v17 = vpop.permute.xlu2 %2543 }
 0x54d   : > { %8634 = vst [vmem:[#allocation197_spill] sm:$0xff] %v6826_v17 }
 0x54e   : > { %v6828_v38 = vpop.permute.xlu0 %2533 }
 0x54f   : > { %8635 = vst [vmem:[#allocation144_spill] sm:$0xff] %v6828_v38  ;;  %v8639_v38 = vld [vmem:[#allocation157_spill] sm:$0xff] }
 0x552   : > { %2860 = vrot.lane.b32.xlu2 %v6205_v52, %s3722_s25  ;;  %2714 = vrot.lane.b32.xlu1 %v6094_v3, %s3720_s23 }
 0x554   : > { %2772 = vrot.lane.b32.xlu0 %v5884_v61, %s3721_s24  ;;  %v6836_v0 = vpop.permute.xlu1 %2529  ;;  %v6838_v15 = vpop.permute.xlu2 %2586 }
 0x555   : > { %8636 = vst [vmem:[#allocation93_spill] sm:$0xff] %v6836_v0  ;;  %v2954_v0 = vsel %vm1344_vm3, %v5895_v55, %v8639_v38 }
 0x556   : > { %v6840_v32 = vpop.permute.xlu0 %2539 }
 0x557   : > { %8637 = vst [vmem:[#allocation36_spill] sm:$0xff] %v6840_v32  ;;  %v2984_v32 = vsel %vm1377_vm5, %v2954_v0, %v6458_v62 }
 0x55a   : > { %2682 = vrot.lane.b32.xlu2 %v5869_v51, %s3720_s23  ;;  %2894 = vrot.lane.b32.xlu1 %v6349_v18, %s3722_s25  ;;  %v3016_v18 = vsel %vm1410_vm4, %v2984_v32, %v6637_v24 }
 0x55c   : > { %2806 = vrot.lane.b32.xlu0 %v8586_v58, %s3721_s24  ;;  %v6848_v52 = vpop.permute.xlu1 %2535  ;;  %v6850_v17 = vpop.permute.xlu2 %2592  ;;  %v3048_v58 = vsel %vm1443_vm6, %v3016_v18, %v2498_v36 }
 0x55d   : > { %8638 = vst [vmem:[#allocation172_spill] sm:$0xff] %v6848_v52 }
 0x55e   : > { %v6852_v61 = vpop.permute.xlu0 %2582 }
 0x562   : > { %2862 = vrot.lane.b32.xlu2 %v8610_v48, %s3722_s25  ;;  %2716 = vrot.lane.b32.xlu1 %v6073_v40, %s3720_s23  ;;  %v8640_v48 = vld [vmem:[#allocation61_spill] sm:$0xff] }
 0x563   : > { %v2957_v0 = vsel %vm1344_vm3, %v5924_v8, %v8640_v48  ;;  %v8642_v48 = vld [vmem:[#allocation138_spill] sm:$0xff] }
 0x564   : > { %2774 = vrot.lane.b32.xlu0 %v5881_v1, %s3721_s24  ;;  %v2599_v52 = vpop.permute.xlu2 %2598  ;;  %v6868_v46 = vpop.permute.xlu1 %2541  ;;  %v2987_v24 = vsel %vm1377_vm5, %v2957_v0, %v6470_v29 }
 0x565   : > { %v6871_v38 = vsel %vm1476_vm8, %v3048_v58, %v2599_v52  ;;  %v3019_v1 = vsel %vm1410_vm4, %v2987_v24, %v6649_v28  ;;  %v8641_v58 = vld [vmem:[#allocation82_spill] sm:$0xff]  ;;  %v2955_v28 = vsel %vm1344_vm3, %v5898_v35, %v8642_v48 }
 0x566   : > { %v6873_v62 = vpop.permute.xlu0 %2588  ;;  %v3051_v36 = vsel %vm1443_vm6, %v3019_v1, %v2504_v26  ;;  %v2985_v26 = vsel %vm1377_vm5, %v2955_v28, %v6486_v53  ;;  %v3206_v28 = vld [vmem:[%s7670_s2 + $0x30] sm:$0xff] }
 0x567   : > { %v3017_v24 = vsel %vm1410_vm4, %v2985_v26, %v6599_v44  ;;  %v3208_v44 = vld [vmem:[%s7670_s2 + $0x40] sm:$0xff] }
 0x568   : > { %3312 = vmatpush.msra.mxu1 %v3208_v44  ;;  %3623 = vmatpush.msra.mxu3 %v3208_v44 }
 0x56a   : > { %2684 = vrot.lane.b32.xlu2 %v5872_v27, %s3720_s23  ;;  %2896 = vrot.lane.b32.xlu1 %v6346_v30, %s3722_s25  ;;  %v2960_v30 = vsel %vm1344_vm3, %v5973_v39, %v8641_v58  ;;  %v8644_v58 = vld [vmem:[#allocation187_spill] sm:$0xff] }
 0x56c   : > { %2808 = vrot.lane.b32.xlu0 %v8587_v4, %s3721_s24  ;;  %v2605_v32 = vpop.permute.xlu2 %2604  ;;  %v6889_v52 = vpop.permute.xlu1 %2584  ;;  %v2990_v4 = vsel %vm1377_vm5, %v2960_v30, %v6482_v13  ;;  %v2958_v30 = vsel %vm1344_vm3, %v5947_v59, %v8644_v58  ;;  %v8649_v58 = vld [vmem:[#allocation200_spill] sm:$0xff] }
 0x56d   : > { %v6892_v18 = vsel %vm1476_vm8, %v3051_v36, %v2605_v32  ;;  %v3022_v0 = vsel %vm1410_vm4, %v2990_v4, %v6661_v9  ;;  %v3049_v36 = vsel %vm1443_vm6, %v3017_v24, %v6776_v60  ;;  %v8645_v24 = vld [vmem:[#allocation177_spill] sm:$0xff] }
 0x56e   : > { %v6894_v29 = vpop.permute.xlu0 %2594  ;;  %v3054_v13 = vsel %vm1443_vm6, %v3022_v0, %v6780_v7  ;;  %v3207_v7 = vld [vmem:[%s7670_s2 + $0x38] sm:$0xff] }
 0x56f   : > { %3313 = vmatpush.msra.mxu1 %v3207_v7  ;;  %3624 = vmatpush.msra.mxu3 %v3207_v7 }
 0x571   : > { %3314 = vmatpush.msra.mxu1 %v3206_v28  ;;  %3625 = vmatpush.msra.mxu3 %v3206_v28 }
 0x572   : > { %2864 = vrot.lane.b32.xlu2 %v6229_v2, %s3722_s25  ;;  %2718 = vrot.lane.b32.xlu1 %v6060_v37, %s3720_s23 }
 0x574   : > { %2776 = vrot.lane.b32.xlu0 %v8561_v43, %s3721_s24  ;;  %v2611_v1 = vpop.permute.xlu2 %2610  ;;  %v6918_v2 = vpop.permute.xlu1 %2590  ;;  %v8643_v43 = vld [vmem:[#allocation128_spill] sm:$0xff] }
 0x575   : > { %v6923_v53 = vsel %vm1476_vm8, %v3054_v13, %v2611_v1  ;;  %v2953_v60 = vsel %vm1344_vm3, %v5872_v27, %v8643_v43  ;;  %v2988_v27 = vsel %vm1377_vm5, %v2958_v30, %v6498_v50  ;;  %v2956_v13 = vsel %vm1344_vm3, %v5921_v11, %v8645_v24  ;;  %v8647_v43 = vld [vmem:[#allocation53_spill] sm:$0xff] }
 0x576   : > { %v2601_v32 = vpop.permute.xlu0 %2600  ;;  %v2983_v48 = vsel %vm1377_vm5, %v2953_v60, %v6496_v22  ;;  %v2966_v1 = vsel %vm1344_vm3, %v6055_v34, %v6362_v5  ;;  %v2986_v7 = vsel %vm1377_vm5, %v2956_v13, %v6508_v42  ;;  %v3202_v34 = vld [vmem:[%s7670_s2 + $0x10] sm:$0xff]  ;;  %v8648_v5 = vld [vmem:[#allocation185_spill] sm:$0xff] }
 0x577   : > { %v6926_v9 = vsel %vm1476_vm8, %v3049_v36, %v2601_v32  ;;  %v3015_v4 = vsel %vm1410_vm4, %v2983_v48, %v6615_v14  ;;  %v8646_v36 = vld [vmem:[#allocation70_spill] sm:$0xff]  ;;  %v2996_v44 = vsel %vm1377_vm5, %v2966_v1, %v6506_v25  ;;  %v3018_v30 = vsel %vm1410_vm4, %v2986_v7, %v8649_v58  ;;  %v8650_v42 = vld [vmem:[#allocation69_spill] sm:$0xff] }
 0x578   : > { %v2961_v32 = vsel %vm1344_vm3, %v5976_v49, %v8646_v36  ;;  %v3028_v25 = vsel %vm1410_vm4, %v2996_v44, %v6696_v12  ;;  %v3050_v28 = vsel %vm1443_vm6, %v3018_v30, %v6746_v21  ;;  %v3201_v21 = vld [vmem:[%s7670_s2 + $0x8] sm:$0xff]  ;;  %v8655_v13 = vld [vmem:[#allocation81_spill] sm:$0xff] }
 0x579   : > { %v2991_v60 = vsel %vm1377_vm5, %v2961_v32, %v8648_v5  ;;  %v8656_v1 = vld [vmem:[#allocation101_spill] sm:$0xff]  ;;  %v8657_v32 = vld [vmem:[#allocation78_spill] sm:$0xff] }
 0x57a   : > { %2686 = vrot.lane.b32.xlu2 %v5895_v55, %s3720_s23  ;;  %2898 = vrot.lane.b32.xlu1 %v8630_v23, %s3722_s25  ;;  %v3020_v55 = vsel %vm1410_vm4, %v2988_v27, %v6611_v45  ;;  %v3047_v23 = vsel %vm1443_vm6, %v3015_v4, %v6734_v19  ;;  %v3204_v19 = vld [vmem:[%s7670_s2 + $0x20] sm:$0xff]  ;;  %v3060_v27 = vsel %vm1443_vm6, %v3028_v25, %v6804_v41  ;;  %v8659_v30 = vld [vmem:[#allocation77_spill] sm:$0xff] }
 0x57b   : > { %v3052_v50 = vsel %vm1443_vm6, %v3020_v55, %v6788_v33  ;;  %v3203_v33 = vld [vmem:[%s7670_s2 + $0x18] sm:$0xff] }
 0x57c   : > { %2810 = vrot.lane.b32.xlu0 %v6134_v10, %s3721_s24  ;;  %v6959_v22 = vpop.permute.xlu2 %2616  ;;  %v2597_v26 = vpop.permute.xlu1 %2596  ;;  %v3205_v10 = vld [vmem:[%s7670_s2 + $0x28] sm:$0xff]  ;;  %v8660_v25 = vld [vmem:[#allocation57_spill] sm:$0xff] }
 0x57d   : > { %v6964_v0 = vsel %vm1476_vm8, %v3047_v23, %v2597_v26  ;;  %3315 = vmatpush.msra.mxu1 %v3205_v10  ;;  %3626 = vmatpush.msra.mxu3 %v3205_v10  ;;  %v8653_v10 = vld [vmem:[#allocation152_spill] sm:$0xff] }
 0x57e   : > { %v2607_v14 = vpop.permute.xlu0 %2606 }
 0x57f   : > { %v6970_v45 = vsel %vm1476_vm8, %v3052_v50, %v2607_v14  ;;  %3316 = vmatpush.msra.mxu1 %v3204_v19  ;;  %3627 = vmatpush.msra.mxu3 %v3204_v19  ;;  %v3200_v14 = vld [vmem:[%s7670_s2] sm:$0xff] }
 0x581   : > { %3317 = vmatpush.msra.mxu1 %v3203_v33  ;;  %3628 = vmatpush.msra.mxu3 %v3203_v33  ;;  %v8654_v33 = vld [vmem:[#allocation28_spill] sm:$0xff] }
 0x582   : > { %2866 = vrot.lane.b32.xlu2 %v6226_v47, %s3722_s25  ;;  %2720 = vrot.lane.b32.xlu1 %v8647_v43, %s3720_s23  ;;  %v8651_v47 = vld [vmem:[#allocation34_spill] sm:$0xff] }
 0x583   : > { %v3023_v48 = vsel %vm1410_vm4, %v2991_v60, %v8651_v47  ;;  %3318 = vmatpush.msra.mxu1 %v3202_v34  ;;  %3629 = vmatpush.msra.mxu3 %v3202_v34  ;;  %v8662_v47 = vld [vmem:[#allocation30_spill] sm:$0xff] }
 0x584   : > { %2778 = vrot.lane.b32.xlu0 %v8650_v42, %s3721_s24  ;;  %v2623_v4 = vpop.permute.xlu2 %2622  ;;  %v2603_v55 = vpop.permute.xlu1 %2602  ;;  %v3055_v23 = vsel %vm1443_vm6, %v3023_v48, %v6800_v20  ;;  %v8652_v20 = vld [vmem:[#allocation25_spill] sm:$0xff]  ;;  %v8661_v42 = vld [vmem:[#allocation12_spill] sm:$0xff] }
 0x585   : > { %v7015_v12 = vsel %vm1476_vm8, %v3060_v27, %v2623_v4  ;;  %v7018_v26 = vsel %vm1476_vm8, %v3050_v28, %v2603_v55  ;;  %3319 = vmatpush.msra.mxu1 %v3201_v21  ;;  %3630 = vmatpush.msra.mxu3 %v3201_v21  ;;  %v2959_v19 = vsel %vm1344_vm3, %v8653_v10, %v8652_v20 }
 0x586   : > { %v2613_v50 = vpop.permute.xlu0 %2612  ;;  %v2989_v24 = vsel %vm1377_vm5, %v2959_v19, %v8654_v33  ;;  %v8665_v19 = vld [vmem:[#allocation76_spill] sm:$0xff] }
 0x587   : > { %v7024_v41 = vsel %vm1476_vm8, %v3055_v23, %v2613_v50  ;;  %3320 = vmatpush.msra.mxu1 %v3200_v14  ;;  %v3021_v36 = vsel %vm1410_vm4, %v2989_v24, %v8656_v1  ;;  %3631 = vmatpush.msra.mxu3 %v3200_v14  ;;  %v8663_v23 = vld [vmem:[#allocation2_spill] sm:$0xff]  ;;  %v8666_v33 = vld [vmem:[#allocation88_spill] sm:$0xff]  ;;  %v8667_v24 = vld [vmem:[#allocation109_spill] sm:$0xff] }
 0x588   : > { %v3053_v44 = vsel %vm1443_vm6, %v3021_v36, %v6758_v16  ;;  %v8664_v50 = vld [vmem:[#allocation74_spill] sm:$0xff]  ;;  %v8668_v1 = vld [vmem:[#allocation31_spill] sm:$0xff]  ;;  %v8669_v36 = vld [vmem:[#allocation68_spill] sm:$0xff] }
 0x58a   : > { %2688 = vrot.lane.b32.xlu2 %v5898_v35, %s3720_s23  ;;  %2900 = vrot.lane.b32.xlu1 %v8655_v13, %s3722_s25  ;;  %v8658_v35 = vld [vmem:[#allocation130_spill] sm:$0xff] }
 0x58b   : > { %v2967_v58 = vsel %vm1344_vm3, %v6012_v54, %v8658_v35  ;;  %v8672_v35 = vld [vmem:[#allocation160_spill] sm:$0xff] }
 0x58c   : > { %2812 = vrot.lane.b32.xlu0 %v8657_v32, %s3721_s24  ;;  %v2711_v7 = vpop.permute.xlu2 %2710  ;;  %v2609_v34 = vpop.permute.xlu1 %2608  ;;  %v2997_v16 = vsel %vm1377_vm5, %v2967_v58, %v8661_v42  ;;  %v8670_v32 = vld [vmem:[#allocation99_spill] sm:$0xff] }
 0x58d   : > { %v7045_v5 = vsel %vm1476_vm8, %v3053_v44, %v2609_v34  ;;  %v3029_v48 = vsel %vm1410_vm4, %v2997_v16, %v8662_v47  ;;  %v8671_v44 = vld [vmem:[#allocation90_spill] sm:$0xff] }
 0x58e   : > { %v7047_v60 = vpop.permute.xlu0 %2618  ;;  %v3061_v54 = vsel %vm1443_vm6, %v3029_v48, %v6824_v57  ;;  %v2968_v57 = vsel %vm1344_vm3, %v6094_v3, %v8665_v19  ;;  %v8673_v3 = vld [vmem:[#allocation27_spill] sm:$0xff] }
 0x592   : > { %2868 = vrot.lane.b32.xlu2 %v8659_v30, %s3722_s25  ;;  %2722 = vrot.lane.b32.xlu1 %v8660_v25, %s3720_s23  ;;  %v8674_v30 = vld [vmem:[#allocation165_spill] sm:$0xff] }
 0x593   : > { %v2962_v42 = vsel %vm1344_vm3, %v8674_v30, %v8673_v3 }
 0x594   : > { %2628 = vrot.lane.b32.xlu0 %v8655_v13, %s3719_s22  ;;  %v2679_v28 = vpop.permute.xlu2 %2678  ;;  %v2615_v27 = vpop.permute.xlu1 %2614  ;;  %v3008_v13 = vsel %vm1410_vm4, %v8667_v24, %v8666_v33  ;;  %v8676_v33 = vld [vmem:[#allocation65_spill] sm:$0xff] }
 0x595   : > { %v3040_v58 = vsel %vm1443_vm6, %v3008_v13, %v8672_v35 }
 0x596   : > { %v2625_v4 = vpop.permute.xlu0 %2624  ;;  %v3072_v47 = vsel %vm1476_vm8, %v3040_v58, %v6852_v61 }
 0x597   : > { %v7065_v55 = vsel %vm1476_vm8, %v3061_v54, %v2625_v4  ;;  %v8675_v4 = vld [vmem:[#allocation66_spill] sm:$0xff]  ;;  %v3104_v19 = vsel %vm1509_vm7, %v3072_v47, %v2679_v28 }
 0x598   : > { %v8678_v28 = vld [vmem:[#allocation18_spill] sm:$0xff] }
 0x59a   : > { %2690 = vrot.lane.b32.xlu2 %v5921_v11, %s3720_s23  ;;  %2902 = vrot.lane.b32.xlu1 %v8663_v23, %s3722_s25  ;;  %v2998_v11 = vsel %vm1377_vm5, %v2968_v57, %v8668_v1 }
 0x59b   : > { %v3030_v34 = vsel %vm1410_vm4, %v2998_v11, %v8671_v44 }
 0x59c   : > { %2870 = vrot.lane.b32.xlu0 %v8664_v50, %s3722_s25  ;;  %v2859_v21 = vpop.permute.xlu2 %2858  ;;  %v7073_v14 = vpop.permute.xlu1 %2620  ;;  %v3062_v16 = vsel %vm1443_vm6, %v3030_v34, %v6790_v31  ;;  %v2992_v50 = vsel %vm1377_vm5, %v2962_v42, %v8675_v4  ;;  %v8677_v31 = vld [vmem:[#allocation194_spill] sm:$0xff]  ;;  %v8680_v34 = vld [vmem:[#allocation29_spill] sm:$0xff]  ;;  %v8681_v42 = vld [vmem:[#allocation84_spill] sm:$0xff] }
 0x59d   : > { %v3024_v24 = vsel %vm1410_vm4, %v2992_v50, %v8676_v33  ;;  %v8685_v4 = vld [vmem:[#allocation98_spill] sm:$0xff]  ;;  %v8686_v50 = vld [vmem:[#allocation149_spill] sm:$0xff] }
 0x59e   : > { %v2801_v20 = vpop.permute.xlu0 %2800  ;;  %v3056_v1 = vsel %vm1443_vm6, %v3024_v24, %v8677_v31  ;;  %v8688_v31 = vld [vmem:[#allocation120_spill] sm:$0xff] }
 0x59f   : > { %v3088_v11 = vsel %vm1476_vm8, %v3056_v1, %v2615_v27 }
 0x5a0   : > { %v3120_v44 = vsel %vm1509_vm7, %v3088_v11, %v2711_v7  ;;  %v8684_v7 = vld [vmem:[#allocation201_spill] sm:$0xff]  ;;  %v8689_v11 = vld [vmem:[#allocation87_spill] sm:$0xff] }
 0x5a1   : > { %v3152_v35 = vsel %vm1542_vm9, %v3120_v44, %v2801_v20 }
 0x5a2   : > { %2724 = vrot.lane.b32.xlu2 %v8669_v36, %s3720_s23  ;;  %2780 = vrot.lane.b32.xlu1 %v8670_v32, %s3721_s24  ;;  %v8679_v32 = vld [vmem:[#allocation173_spill] sm:$0xff] }
 0x5a4   : > { %2692 = vrot.lane.b32.xlu0 %v5924_v8, %s3720_s23  ;;  %v2681_v48 = vpop.permute.xlu2 %2680  ;;  %v2627_v54 = vpop.permute.xlu1 %2626 }
 0x5a5   : > { %v7104_v57 = vsel %vm1476_vm8, %v3062_v16, %v2627_v54  ;;  %v8682_v16 = vld [vmem:[#allocation129_spill] sm:$0xff]  ;;  %v8683_v54 = vld [vmem:[#allocation124_spill] sm:$0xff] }
 0x5a6   : > { %v2769_v8 = vpop.permute.xlu0 %2768  ;;  %v3009_v47 = vsel %vm1410_vm4, %v8682_v16, %v8681_v42  ;;  %v8691_v42 = vld [vmem:[#allocation97_spill] sm:$0xff]  ;;  %v8692_v16 = vld [vmem:[#allocation166_spill] sm:$0xff] }
 0x5a7   : > { %v3136_v13 = vsel %vm1542_vm9, %v3104_v19, %v2769_v8  ;;  %v3041_v20 = vsel %vm1443_vm6, %v3009_v47, %v8684_v7  ;;  %v8687_v19 = vld [vmem:[#allocation73_spill] sm:$0xff]  ;;  %v8693_v7 = vld [vmem:[#allocation79_spill] sm:$0xff] }
 0x5a8   : > { %v3168_v61 = vsel %vm1575_vm11, %v3136_v13, %v2859_v21  ;;  %v2963_v8 = vsel %vm1344_vm3, %v8687_v19, %v8686_v50  ;;  %v3073_v33 = vsel %vm1476_vm8, %v3041_v20, %v6889_v52  ;;  %v8694_v20 = vld [vmem:[#allocation164_spill] sm:$0xff] }
 0x5a9   : > { %3578 = vmatmul.msk.f32.vlgmr.msra.gmra.mxu1 %vm1617_vm10, %v3168_v61  ;;  %v2993_v1 = vsel %vm1377_vm5, %v2963_v8, %v8688_v31  ;;  %v2948_v50 = vsel %vm1344_vm3, %v8694_v20, %v8693_v7  ;;  %v8695_v8 = vld [vmem:[#allocation195_spill] sm:$0xff] }
 0x5aa   : > { %2904 = vrot.lane.b32.xlu2 %v8678_v28, %s3722_s25  ;;  %2814 = vrot.lane.b32.xlu1 %v8679_v32, %s3721_s24  ;;  %v3025_v32 = vsel %vm1410_vm4, %v2993_v1, %v8689_v11  ;;  %v8700_v11 = vld [vmem:[#allocation110_spill] sm:$0xff]  ;;  %v8704_v7 = vld [vmem:[#allocation167_spill] sm:$0xff] }
 0x5ac   : > { %2726 = vrot.lane.b32.xlu0 %v8680_v34, %s3720_s23  ;;  %v2861_v58 = vpop.permute.xlu2 %2860  ;;  %v2891_v3 = vpop.permute.xlu1 %2890 }
 0x5ad   : > { %v3184_v27 = vsel %vm1575_vm11, %v3152_v35, %v2891_v3  ;;  %v3057_v35 = vsel %vm1443_vm6, %v3025_v32, %v6792_v63 }
 0x5ae   : > { %v2803_v21 = vpop.permute.xlu0 %2802  ;;  %3594 = vmatmul.msk.f32.vlgmr.msra.gmra.mxu3 %vm1617_vm10, %v3184_v27  ;;  %v3089_v52 = vsel %vm1476_vm8, %v3057_v35, %v6959_v22 }
 0x5b2   : > { %2782 = vrot.lane.b32.xlu2 %v8683_v54, %s3721_s24  ;;  %2630 = vrot.lane.b32.xlu1 %v8663_v23, %s3719_s22  ;;  %v3105_v23 = vsel %vm1509_vm7, %v3073_v33, %v2681_v48  ;;  %v8690_v48 = vld [vmem:[#allocation115_spill] sm:$0xff]  ;;  %v2978_v33 = vsel %vm1377_vm5, %v2948_v50, %v8695_v8 }
 0x5b3   : > { %v8705_v8 = vld [vmem:[#allocation183_spill] sm:$0xff] }
 0x5b4   : > { %2906 = vrot.lane.b32.xlu0 %v8685_v4, %s3722_s25  ;;  %v2683_v24 = vpop.permute.xlu2 %2682  ;;  %v2713_v13 = vpop.permute.xlu1 %2712 }
 0x5b5   : > { %v3121_v27 = vsel %vm1509_vm7, %v3089_v52, %v2713_v13  ;;  %v8696_v13 = vld [vmem:[#allocation11_spill] sm:$0xff]  ;;  %v8701_v52 = vld [vmem:[#allocation178_spill] sm:$0xff] }
 0x5b6   : > { %v2771_v61 = vpop.permute.xlu0 %2770  ;;  %v3010_v31 = vsel %vm1410_vm4, %v2978_v33, %v8696_v13  ;;  %v8706_v33 = vld [vmem:[#allocation140_spill] sm:$0xff] }
 0x5b7   : > { %v3137_v44 = vsel %vm1542_vm9, %v3105_v23, %v2771_v61  ;;  %v8698_v23 = vld [vmem:[#allocation75_spill] sm:$0xff]  ;;  %v8699_v61 = vld [vmem:[#allocation198_spill] sm:$0xff]  ;;  %v2949_v13 = vsel %vm1344_vm3, %v8706_v33, %v8705_v8 }
 0x5b8   : > { %v3169_v3 = vsel %vm1575_vm11, %v3137_v44, %v2861_v58  ;;  %v3153_v58 = vsel %vm1542_vm9, %v3121_v27, %v2803_v21  ;;  %v8697_v21 = vld [vmem:[#allocation186_spill] sm:$0xff]  ;;  %v2964_v32 = vsel %vm1344_vm3, %v8700_v11, %v8699_v61 }
 0x5b9   : > { %3579 = vmatmul.msk.f32.gmra.mxu1 %vm1617_vm10, %v3169_v3  ;;  %v3042_v1 = vsel %vm1443_vm6, %v3010_v31, %v8697_v21  ;;  %v8707_v31 = vld [vmem:[#allocation150_spill] sm:$0xff] }
 0x5ba   : > { %2816 = vrot.lane.b32.xlu2 %v8690_v48, %s3721_s24  ;;  %2872 = vrot.lane.b32.xlu1 %v8691_v42, %s3722_s25  ;;  %v3074_v44 = vsel %vm1476_vm8, %v3042_v1, %v6838_v15  ;;  %v8702_v48 = vld [vmem:[#allocation151_spill] sm:$0xff]  ;;  %v2979_v21 = vsel %vm1377_vm5, %v2949_v13, %v8707_v31 }
 0x5bb   : > { %v8708_v1 = vld [vmem:[#allocation131_spill] sm:$0xff] }
 0x5bc   : > { %2784 = vrot.lane.b32.xlu0 %v8692_v16, %s3721_s24  ;;  %v2863_v47 = vpop.permute.xlu2 %2862  ;;  %v2893_v63 = vpop.permute.xlu1 %2892  ;;  %v8719_v31 = vld [vmem:[#allocation71_spill] sm:$0xff] }
 0x5bd   : > { %v3185_v22 = vsel %vm1575_vm11, %v3153_v58, %v2893_v63 }
 0x5be   : > { %v2805_v54 = vpop.permute.xlu0 %2804  ;;  %3595 = vmatmul.msk.f32.gmra.mxu3 %vm1617_vm10, %v3185_v22 }
 0x5c2   : > { %2632 = vrot.lane.b32.xlu2 %v8678_v28, %s3719_s22  ;;  %2694 = vrot.lane.b32.xlu1 %v5947_v59, %s3720_s23  ;;  %v2994_v28 = vsel %vm1377_vm5, %v2964_v32, %v8701_v52  ;;  %v3106_v59 = vsel %vm1509_vm7, %v3074_v44, %v2683_v24  ;;  %v8703_v24 = vld [vmem:[#allocation105_spill] sm:$0xff]  ;;  %v8711_v32 = vld [vmem:[#allocation175_spill] sm:$0xff] }
 0x5c3   : > { %v3026_v42 = vsel %vm1410_vm4, %v2994_v28, %v8702_v48  ;;  %v8712_v44 = vld [vmem:[#allocation49_spill] sm:$0xff]  ;;  %v8714_v48 = vld [vmem:[#allocation86_spill] sm:$0xff] }
 0x5c4   : > { %2818 = vrot.lane.b32.xlu0 %v8698_v23, %s3721_s24  ;;  %v2685_v35 = vpop.permute.xlu2 %2684  ;;  %v2715_v3 = vpop.permute.xlu1 %2714  ;;  %v3058_v63 = vsel %vm1443_vm6, %v3026_v42, %v6812_v56  ;;  %v3011_v23 = vsel %vm1410_vm4, %v2979_v21, %v8708_v1  ;;  %v8720_v21 = vld [vmem:[#allocation91_spill] sm:$0xff] }
 0x5c5   : > { %v3090_v15 = vsel %vm1476_vm8, %v3058_v63, %v7047_v60  ;;  %v8715_v63 = vld [vmem:[#allocation192_spill] sm:$0xff]  ;;  %v2950_v1 = vsel %vm1344_vm3, %v8720_v21, %v8719_v31  ;;  %v8734_v31 = vld [vmem:[#allocation35_spill] sm:$0xff] }
 0x5c6   : > { %v2773_v27 = vpop.permute.xlu0 %2772  ;;  %v3122_v22 = vsel %vm1509_vm7, %v3090_v15, %v2715_v3  ;;  %v8713_v3 = vld [vmem:[#allocation5_spill] sm:$0xff] }
 0x5c7   : > { %v3138_v16 = vsel %vm1542_vm9, %v3106_v59, %v2773_v27  ;;  %v2965_v52 = vsel %vm1344_vm3, %v8713_v3, %v8712_v44  ;;  %v8725_v44 = vld [vmem:[#allocation37_spill] sm:$0xff] }
 0x5c8   : > { %v3170_v58 = vsel %vm1575_vm11, %v3138_v16, %v2863_v47  ;;  %v3154_v47 = vsel %vm1542_vm9, %v3122_v22, %v2805_v54  ;;  %v8710_v54 = vld [vmem:[#allocation180_spill] sm:$0xff] }
 0x5c9   : > { %3580 = vmatmul.msk.f32.gmra.mxu1 %vm1617_vm10, %v3170_v58  ;;  %v3043_v61 = vsel %vm1443_vm6, %v3011_v23, %v8710_v54  ;;  %v8716_v22 = vld [vmem:[#allocation72_spill] sm:$0xff] }
 0x5ca   : > { %2874 = vrot.lane.b32.xlu2 %v8703_v24, %s3722_s25  ;;  %2728 = vrot.lane.b32.xlu1 %v8704_v7, %s3720_s23  ;;  %v3075_v28 = vsel %vm1476_vm8, %v3043_v61, %v6873_v62  ;;  %v8721_v23 = vld [vmem:[#allocation80_spill] sm:$0xff]  ;;  %v8722_v61 = vld [vmem:[#allocation85_spill] sm:$0xff] }
 0x5cb   : > { %v3107_v42 = vsel %vm1509_vm7, %v3075_v28, %v2685_v35  ;;  %v8717_v35 = vld [vmem:[#allocation113_spill] sm:$0xff]  ;;  %v2980_v54 = vsel %vm1377_vm5, %v2950_v1, %v8721_v23  ;;  %v8726_v28 = vld [vmem:[#allocation135_spill] sm:$0xff]  ;;  %v8735_v1 = vld [vmem:[#allocation62_spill] sm:$0xff] }
 0x5cc   : > { %2634 = vrot.lane.b32.xlu0 %v8685_v4, %s3719_s22  ;;  %v2865_v20 = vpop.permute.xlu2 %2864  ;;  %v2895_v56 = vpop.permute.xlu1 %2894  ;;  %v8709_v4 = vld [vmem:[#allocation148_spill] sm:$0xff] }
 0x5cd   : > { %v3186_v60 = vsel %vm1575_vm11, %v3154_v47, %v2895_v56 }
 0x5ce   : > { %v2807_v50 = vpop.permute.xlu0 %2806  ;;  %3596 = vmatmul.msk.f32.gmra.mxu3 %vm1617_vm10, %v3186_v60  ;;  %v8718_v60 = vld [vmem:[#allocation142_spill] sm:$0xff] }
 0x5d2   : > { %2696 = vrot.lane.b32.xlu2 %v8653_v10, %s3720_s23  ;;  %2908 = vrot.lane.b32.xlu1 %v8709_v4, %s3722_s25  ;;  %v2995_v10 = vsel %vm1377_vm5, %v2965_v52, %v8714_v48 }
 0x5d3   : > { %v3027_v58 = vsel %vm1410_vm4, %v2995_v10, %v8715_v63 }
 0x5d4   : > { %2876 = vrot.lane.b32.xlu0 %v8711_v32, %s3722_s25  ;;  %v2687_v59 = vpop.permute.xlu2 %2686  ;;  %v2717_v27 = vpop.permute.xlu1 %2716  ;;  %v3059_v24 = vsel %vm1443_vm6, %v3027_v58, %v8716_v22  ;;  %v3012_v32 = vsel %vm1410_vm4, %v2980_v54, %v8722_v61  ;;  %v8727_v22 = vld [vmem:[#allocation67_spill] sm:$0xff] }
 0x5d5   : > { %v3091_v62 = vsel %vm1476_vm8, %v3059_v24, %v7073_v14  ;;  %v3044_v52 = vsel %vm1443_vm6, %v3012_v32, %v8725_v44 }
 0x5d6   : > { %v2775_v16 = vpop.permute.xlu0 %2774  ;;  %v3123_v47 = vsel %vm1509_vm7, %v3091_v62, %v2717_v27  ;;  %v3076_v27 = vsel %vm1476_vm8, %v3044_v52, %v6918_v2  ;;  %v8728_v2 = vld [vmem:[#allocation189_spill] sm:$0xff] }
 0x5d7   : > { %v3139_v15 = vsel %vm1542_vm9, %v3107_v42, %v2775_v16  ;;  %v3108_v42 = vsel %vm1509_vm7, %v3076_v27, %v2687_v59 }
 0x5d8   : > { %v3171_v56 = vsel %vm1575_vm11, %v3139_v15, %v2865_v20  ;;  %v3155_v20 = vsel %vm1542_vm9, %v3123_v47, %v2807_v50  ;;  %v8724_v50 = vld [vmem:[#allocation125_spill] sm:$0xff] }
 0x5d9   : > { %3581 = vmatmul.msk.f32.gmra.mxu1 %vm1617_vm10, %v3171_v56 }
 0x5da   : > { %2730 = vrot.lane.b32.xlu2 %v8717_v35, %s3720_s23  ;;  %2786 = vrot.lane.b32.xlu1 %v8718_v60, %s3721_s24  ;;  %v8729_v60 = vld [vmem:[#allocation147_spill] sm:$0xff] }
 0x5dc   : > { %2698 = vrot.lane.b32.xlu0 %v5973_v39, %s3720_s23  ;;  %v2867_v8 = vpop.permute.xlu2 %2866  ;;  %v2897_v33 = vpop.permute.xlu1 %2896  ;;  %v8723_v39 = vld [vmem:[#allocation9_spill] sm:$0xff] }
 0x5dd   : > { %v3187_v14 = vsel %vm1575_vm11, %v3155_v20, %v2897_v33 }
 0x5de   : > { %v2809_v13 = vpop.permute.xlu0 %2808  ;;  %3597 = vmatmul.msk.f32.gmra.mxu3 %vm1617_vm10, %v3187_v14  ;;  %v8732_v14 = vld [vmem:[#allocation161_spill] sm:$0xff] }
 0x5e2   : > { %2910 = vrot.lane.b32.xlu2 %v8723_v39, %s3722_s25  ;;  %2820 = vrot.lane.b32.xlu1 %v8724_v50, %s3721_s24 }
 0x5e4   : > { %2732 = vrot.lane.b32.xlu0 %v8726_v28, %s3720_s23  ;;  %v2689_v48 = vpop.permute.xlu2 %2688  ;;  %v2719_v10 = vpop.permute.xlu1 %2718 }
 0x5e5   : > { %v3124_v15 = vsel %vm1509_vm7, %v7015_v12, %v2719_v10  ;;  %v2951_v12 = vsel %vm1344_vm3, %v5844_v6, %v8729_v60 }
 0x5e6   : > { %v2777_v16 = vpop.permute.xlu0 %2776  ;;  %v3156_v56 = vsel %vm1542_vm9, %v3124_v15, %v2809_v13  ;;  %v8733_v13 = vld [vmem:[#allocation22_spill] sm:$0xff] }
 0x5e7   : > { %v3140_v63 = vsel %vm1542_vm9, %v3108_v42, %v2777_v16 }
 0x5e8   : > { %v3172_v58 = vsel %vm1575_vm11, %v3140_v63, %v2867_v8  ;;  %v8730_v8 = vld [vmem:[#allocation47_spill] sm:$0xff] }
 0x5e9   : > { %3582 = vmatmul.msk.f32.gmra.mxu1 %vm1617_vm10, %v3172_v58  ;;  %v2981_v33 = vsel %vm1377_vm5, %v2951_v12, %v8730_v8  ;;  %v8739_v58 = vld [vmem:[#allocation60_spill] sm:$0xff] }
 0x5ea   : > { %2788 = vrot.lane.b32.xlu2 %v8727_v22, %s3721_s24  ;;  %2636 = vrot.lane.b32.xlu1 %v8709_v4, %s3719_s22  ;;  %v8731_v4 = vld [vmem:[#allocation121_spill] sm:$0xff]  ;;  %v2578_v15 = vrot.slane %v8739_v58, 2 }
 0x5eb   : > { %v3013_v20 = vsel %vm1410_vm4, %v2981_v33, %v8731_v4 }
 0x5ec   : > { %2912 = vrot.lane.b32.xlu0 %v8728_v2, %s3722_s25  ;;  %v2869_v59 = vpop.permute.xlu2 %2868  ;;  %v2899_v24 = vpop.permute.xlu1 %2898  ;;  %v3045_v21 = vsel %vm1443_vm6, %v3013_v20, %v8734_v31  ;;  %v8743_v20 = vld [vmem:[#allocation20_spill] sm:$0xff] }
 0x5ed   : > { %v3188_v47 = vsel %vm1575_vm11, %v3156_v56, %v2899_v24  ;;  %v3077_v6 = vsel %vm1476_vm8, %v3045_v21, %v6850_v17  ;;  %v8736_v17 = vld [vmem:[#allocation89_spill] sm:$0xff]  ;;  %v8745_v21 = vld [vmem:[#allocation143_spill] sm:$0xff] }
 0x5ee   : > { %v2811_v62 = vpop.permute.xlu0 %2810  ;;  %3598 = vmatmul.msk.f32.gmra.mxu3 %vm1617_vm10, %v3188_v47  ;;  %v3109_v61 = vsel %vm1509_vm7, %v3077_v6, %v2689_v48 }
 0x5f2   : > { %2822 = vrot.lane.b32.xlu2 %v8732_v14, %s3721_s24  ;;  %2878 = vrot.lane.b32.xlu1 %v8733_v13, %s3722_s25  ;;  %v8744_v13 = vld [vmem:[#allocation64_spill] sm:$0xff] }
 0x5f4   : > { %2790 = vrot.lane.b32.xlu0 %v8735_v1, %s3721_s24  ;;  %v2691_v23 = vpop.permute.xlu2 %2690  ;;  %v2721_v54 = vpop.permute.xlu1 %2720 }
 0x5f5   : > { %v3125_v52 = vsel %vm1509_vm7, %v7065_v55, %v2721_v54  ;;  %v8737_v55 = vld [vmem:[#allocation117_spill] sm:$0xff] }
 0x5f6   : > { %v2779_v32 = vpop.permute.xlu0 %2778  ;;  %v3157_v10 = vsel %vm1542_vm9, %v3125_v52, %v2811_v62  ;;  %v8740_v62 = vld [vmem:[#allocation46_spill] sm:$0xff] }
 0x5f7   : > { %v3141_v50 = vsel %vm1542_vm9, %v3109_v61, %v2779_v32  ;;  %v8746_v61 = vld [vmem:[#allocation51_spill] sm:$0xff] }
 0x5f8   : > { %v3173_v44 = vsel %vm1575_vm11, %v3141_v50, %v2869_v59  ;;  %v2580_v32 = vrot.slane %v8746_v61, 2  ;;  %v8747_v50 = vld [vmem:[#allocation118_spill] sm:$0xff] }
 0x5f9   : > { %3583 = vmatmul.msk.f32.gmra.mxu1 %vm1617_vm10, %v3173_v44  ;;  %v2969_v44 = vsel %vm1344_vm3, %v6073_v40, %v8747_v50  ;;  %v8759_v50 = vld [vmem:[#allocation102_spill] sm:$0xff] }
 0x5fa   : > { %2638 = vrot.lane.b32.xlu2 %v8723_v39, %s3719_s22  ;;  %2700 = vrot.lane.b32.xlu1 %v5976_v49, %s3720_s23  ;;  %v8738_v39 = vld [vmem:[#allocation48_spill] sm:$0xff]  ;;  %v2581_v40 = vsel %vm579_vm2, %v2578_v15, %v2580_v32 }
 0x5fb   : > { %v2577_v59 = vrot.slane %v8738_v39, 2 }
 0x5fc   : > { %2824 = vrot.lane.b32.xlu0 %v8736_v17, %s3721_s24  ;;  %v2725_v27 = vpop.permute.xlu2 %2724  ;;  %v2901_v48 = vpop.permute.xlu1 %2900 }
 0x5fd   : > { %v3189_v16 = vsel %vm1575_vm11, %v3157_v10, %v2901_v48  ;;  %v2579_v56 = vsel %vm579_vm2, %v2577_v59, %v2578_v15  ;;  %v8748_v48 = vld [vmem:[#allocation158_spill] sm:$0xff]  ;;  %v8753_v15 = vld [vmem:[#allocation169_spill] sm:$0xff] }
 0x5fe   : > { %v2813_v42 = vpop.permute.xlu0 %2812  ;;  %3599 = vmatmul.msk.f32.gmra.mxu3 %vm1617_vm10, %v3189_v16  ;;  %v2999_v10 = vsel %vm1377_vm5, %v2969_v44, %v8748_v48 }
 0x602   : > { %2880 = vrot.lane.b32.xlu2 %v8737_v55, %s3722_s25  ;;  %2734 = vrot.lane.b32.xlu1 %v8738_v39, %s3720_s23  ;;  %v8751_v39 = vld [vmem:[#allocation10_spill] sm:$0xff] }
 0x604   : > { %2640 = vrot.lane.b32.xlu0 %v8728_v2, %s3719_s22  ;;  %v2905_v49 = vpop.permute.xlu2 %2904  ;;  %v2723_v63 = vpop.permute.xlu1 %2722 }
 0x605   : > { %v3126_v24 = vsel %vm1509_vm7, %v7104_v57, %v2723_v63  ;;  %v8741_v57 = vld [vmem:[#allocation188_spill] sm:$0xff]  ;;  %v8752_v63 = vld [vmem:[#allocation7_spill] sm:$0xff] }
 0x606   : > { %v2629_v22 = vpop.permute.xlu0 %2628  ;;  %v3158_v60 = vsel %vm1542_vm9, %v3126_v24, %v2813_v42  ;;  %v2952_v33 = vsel %vm1344_vm3, %v5869_v51, %v8741_v57  ;;  %v8749_v42 = vld [vmem:[#allocation111_spill] sm:$0xff]  ;;  %v8755_v57 = vld [vmem:[#allocation112_spill] sm:$0xff] }
 0x60a   : > { %2702 = vrot.lane.b32.xlu2 %v8674_v30, %s3720_s23  ;;  %2914 = vrot.lane.b32.xlu1 %v2579_v56, %s3722_s25  ;;  %v8742_v30 = vld [vmem:[#allocation26_spill] sm:$0xff] }
 0x60b   : > { %v2982_v4 = vsel %vm1377_vm5, %v2952_v33, %v8742_v30  ;;  %v8758_v30 = vld [vmem:[#allocation93_spill] sm:$0xff] }
 0x60c   : > { %2882 = vrot.lane.b32.xlu0 %v8740_v62, %s3722_s25  ;;  %v7326_v2 = vpop.permute.xlu2 %2782  ;;  %v2903_v47 = vpop.permute.xlu1 %2902  ;;  %v3014_v14 = vsel %vm1410_vm4, %v2982_v4, %v8743_v20 }
 0x60d   : > { %v3190_v8 = vsel %vm1575_vm11, %v3158_v60, %v2903_v47  ;;  %v3046_v31 = vsel %vm1443_vm6, %v3014_v14, %v8744_v13  ;;  %v2970_v60 = vsel %vm1344_vm3, %v6060_v37, %v8753_v15  ;;  %v8763_v15 = vld [vmem:[#allocation190_spill] sm:$0xff] }
 0x60e   : > { %v2871_v12 = vpop.permute.xlu0 %2870  ;;  %3600 = vmatmul.msk.f32.gmra.mxu3 %vm1617_vm10, %v3190_v8  ;;  %v3078_v1 = vsel %vm1476_vm8, %v3046_v31, %v6894_v29 }
 0x60f   : > { %v3110_v51 = vsel %vm1509_vm7, %v3078_v1, %v2691_v23  ;;  %v8750_v23 = vld [vmem:[#allocation122_spill] sm:$0xff] }
 0x610   : > { %v3674_v1 = vld [vmem:[%s3772_s17] sm:$0xff] }
 0x612   : > { %2736 = vrot.lane.b32.xlu2 %v8739_v58, %s3720_s23  ;;  %2792 = vrot.lane.b32.xlu1 %v8745_v21, %s3721_s24 }
 0x614   : > { %2704 = vrot.lane.b32.xlu0 %v8687_v19, %s3720_s23  ;;  %v2817_v6 = vpop.permute.xlu2 %2816  ;;  %v2781_v54 = vpop.permute.xlu1 %2780  ;;  %v3031_v19 = vsel %vm1410_vm4, %v2999_v10, %v8749_v42  ;;  %v3675_v10 = vld [vmem:[%s3772_s17 + $0x80] sm:$0xff] }
 0x615   : > { %v3142_v52 = vsel %vm1542_vm9, %v3110_v51, %v2781_v54  ;;  %v3063_v16 = vsel %vm1443_vm6, %v3031_v19, %v8750_v23 }
 0x616   : > { %v2693_v17 = vpop.permute.xlu0 %2692  ;;  %v3174_v29 = vsel %vm1575_vm11, %v3142_v52, %v2871_v12  ;;  %v3095_v55 = vsel %vm1476_vm8, %v3063_v16, %v2629_v22  ;;  %v8754_v12 = vld [vmem:[#allocation141_spill] sm:$0xff] }
 0x617   : > { %3584 = vmatmul.msk.f32.gmra.mxu1 %vm1617_vm10, %v3174_v29  ;;  %v3127_v59 = vsel %vm1509_vm7, %v3095_v55, %v2725_v27  ;;  %v3000_v8 = vsel %vm1377_vm5, %v2970_v60, %v8754_v12  ;;  %v8756_v27 = vld [vmem:[#allocation133_spill] sm:$0xff]  ;;  %v3111_v32 = vsel %vm1509_vm7, %v6964_v0, %v2693_v17 }
 0x618   : > { %v3032_v33 = vsel %vm1410_vm4, %v3000_v8, %v8756_v27  ;;  %v3143_v52 = vsel %vm1542_vm9, %v3111_v32, %v7326_v2  ;;  %v8764_v8 = vld [vmem:[#allocation4_spill] sm:$0xff] }
 0x619   : > { %v3064_v4 = vsel %vm1443_vm6, %v3032_v33, %v8758_v30  ;;  %v8765_v27 = vld [vmem:[#allocation16_spill] sm:$0xff] }
 0x61a   : > { %2916 = vrot.lane.b32.xlu2 %v2581_v40, %s3722_s25  ;;  %2826 = vrot.lane.b32.xlu1 %v8751_v39, %s3721_s24 }
 0x61c   : > { %2884 = vrot.lane.b32.xlu0 %v8752_v63, %s3722_s25  ;;  %v7369_v58 = vpop.permute.xlu2 %2632  ;;  %v2815_v24 = vpop.permute.xlu1 %2814 }
 0x61d   : > { %v3159_v62 = vsel %vm1542_vm9, %v3127_v59, %v2815_v24  ;;  %v8761_v24 = vld [vmem:[#allocation24_spill] sm:$0xff] }
 0x61e   : > { %v2727_v47 = vpop.permute.xlu0 %2726  ;;  %v3191_v22 = vsel %vm1575_vm11, %v3159_v62, %v2905_v49  ;;  %v8757_v49 = vld [vmem:[#allocation132_spill] sm:$0xff] }
 0x61f   : > { %3601 = vmatmul.msk.f32.gmra.mxu3 %vm1617_vm10, %v3191_v22 }
 0x622   : > { %2794 = vrot.lane.b32.xlu2 %v8755_v57, %s3721_s24  ;;  %2642 = vrot.lane.b32.xlu1 %v2579_v56, %s3719_s22 }
 0x624   : > { %2796 = vrot.lane.b32.xlu0 %v8757_v49, %s3721_s24  ;;  %v2875_v20 = vpop.permute.xlu2 %2874  ;;  %v2631_v14 = vpop.permute.xlu1 %2630 }
 0x625   : > { %v3096_v37 = vsel %vm1476_vm8, %v3064_v4, %v2631_v14  ;;  %v3677_v4 = vld [vmem:[%s3772_s17 + $0x88] sm:$0xff] }
 0x626   : > { %v2907_v13 = vpop.permute.xlu0 %2906  ;;  %v3322_v31 = vpop.f32.mrf.mxu1  ;;  %v3128_v21 = vsel %vm1509_vm7, %v3096_v37, %v2727_v47 }
 0x627   : > { %v3323_v51 = vadd.f32 %v3674_v1, %v3322_v31  ;;  %v3160_v56 = vsel %vm1542_vm9, %v3128_v21, %v2817_v6 }
 0x628   : > { %v3192_v61 = vsel %vm1575_vm11, %v3160_v56, %v2907_v13  ;;  %v3678_v56 = vld [vmem:[%s3772_s17 + $0x10] sm:$0xff] }
 0x629   : > { %v3418_v54 = vmax.f32 %v3323_v51, 0.0  ;;  %3602 = vmatmul.msk.f32.gmra.mxu3 %vm1617_vm10, %v3192_v61 }
 0x62a   : > { %2644 = vrot.lane.b32.xlu2 %v2581_v40, %s3719_s22  ;;  %2706 = vrot.lane.b32.xlu1 %v8700_v11, %s3720_s23  ;;  %v8760_v11 = vld [vmem:[#allocation56_spill] sm:$0xff]  ;;  %v3676_v40 = vld [vmem:[%s3772_s17 + $0x8] sm:$0xff] }
 0x62b   : > { %3450 = vst.msk [vmem:[%s7397_s19] sm:$0xff] %vm1344_vm3, %v3418_v54 }
 0x62c   : > { %2798 = vrot.lane.b32.xlu0 %v8759_v50, %s3721_s24  ;;  %v2697_v6 = vpop.permute.xlu2 %2696  ;;  %v2873_v44 = vpop.permute.xlu1 %2872 }
 0x62d   : > { %v3175_v17 = vsel %vm1575_vm11, %v3143_v52, %v2873_v44  ;;  %v3113_v61 = vsel %vm1509_vm7, %v6926_v9, %v2697_v6  ;;  %v8766_v44 = vld [vmem:[#allocation163_spill] sm:$0xff]  ;;  %v8769_v9 = vld [vmem:[#allocation144_spill] sm:$0xff] }
 0x62e   : > { %v2785_v0 = vpop.permute.xlu0 %2784  ;;  %3585 = vmatmul.msk.f32.gmra.mxu1 %vm1617_vm10, %v3175_v17  ;;  %v2972_v52 = vsel %vm1344_vm3, %v8660_v25, %v8766_v44 }
 0x631   : > { %v3370_v48 = vpop.f32.mrf.mxu3 }
 0x632   : > { %v3371_v29 = vadd.f32 %v3675_v10, %v3370_v48  ;;  %2708 = vrot.lane.b32.xlu2 %v8713_v3, %s3720_s23  ;;  %2886 = vrot.lane.b32.xlu1 %v8760_v11, %s3722_s25  ;;  %v8767_v48 = vld [vmem:[#allocation191_spill] sm:$0xff] }
 0x633   : > { %v3002_v10 = vsel %vm1377_vm5, %v2972_v52, %v8767_v48  ;;  %v8768_v11 = vld [vmem:[#allocation103_spill] sm:$0xff] }
 0x634   : > { %v3434_v42 = vmax.f32 %v3371_v29, 0.0  ;;  %v2731_v19 = vpop.permute.xlu2 %2730  ;;  %v2695_v23 = vpop.permute.xlu1 %2694 }
 0x635   : > { %v3112_v2 = vsel %vm1509_vm7, %v6871_v38, %v2695_v23  ;;  %v8762_v38 = vld [vmem:[#allocation8_spill] sm:$0xff] }
 0x636   : > { %v2819_v16 = vpop.permute.xlu0 %2818  ;;  %v3325_v55 = vpop.f32.mrf.mxu1  ;;  %3466 = vst.msk [vmem:[%s7397_s19 + $0x80] sm:$0xff] %vm1344_vm3, %v3434_v42  ;;  %v3144_v63 = vsel %vm1542_vm9, %v3112_v2, %v2785_v0  ;;  %v2971_v62 = vsel %vm1344_vm3, %v8647_v43, %v8762_v38  ;;  %v3034_v42 = vsel %vm1410_vm4, %v3002_v10, %v8768_v11  ;;  %v3679_v2 = vld [vmem:[%s3772_s17 + $0x90] sm:$0xff]  ;;  %v3680_v38 = vld [vmem:[%s3772_s17 + $0x18] sm:$0xff]  ;;  %v3683_v11 = vld [vmem:[%s3772_s17 + $0xa0] sm:$0xff] }
 0x637   : > { %v3326_v39 = vadd.f32 %v3676_v40, %v3325_v55  ;;  %v3176_v3 = vsel %vm1575_vm11, %v3144_v63, %v2875_v20  ;;  %v3001_v60 = vsel %vm1377_vm5, %v2971_v62, %v8763_v15  ;;  %v3066_v6 = vsel %vm1443_vm6, %v3034_v42, %v8769_v9  ;;  %v8774_v9 = vld [vmem:[#allocation199_spill] sm:$0xff] }
 0x638   : > { %3586 = vmatmul.msk.f32.gmra.mxu1 %vm1617_vm10, %v3176_v3  ;;  %v3033_v57 = vsel %vm1410_vm4, %v3001_v60, %v8764_v8  ;;  %v8770_v60 = vld [vmem:[#allocation83_spill] sm:$0xff] }
 0x639   : > { %v3419_v59 = vmax.f32 %v3326_v39, 0.0  ;;  %v3065_v33 = vsel %vm1443_vm6, %v3033_v57, %v8765_v27  ;;  %v8772_v57 = vld [vmem:[#allocation32_spill] sm:$0xff] }
 0x63a   : > { %2888 = vrot.lane.b32.xlu1 %v8761_v24, %s3722_s25  ;;  %v3097_v49 = vsel %vm1476_vm8, %v3065_v33, %v7369_v58  ;;  %v8773_v33 = vld [vmem:[#allocation172_spill] sm:$0xff] }
 0x63b   : > { %3451 = vst.msk [vmem:[%s7397_s19 + $0x8] sm:$0xff] %vm1344_vm3, %v3419_v59 }
 0x63c   : > { %v2911_v47 = vpop.permute.xlu2 %2910  ;;  %v2729_v22 = vpop.permute.xlu1 %2728 }
 0x63d   : > { %v3129_v30 = vsel %vm1509_vm7, %v3097_v49, %v2729_v22 }
 0x63e   : > { %v2635_v12 = vpop.permute.xlu0 %2634  ;;  %v3161_v31 = vsel %vm1542_vm9, %v3129_v30, %v2819_v16 }
 0x63f   : > { %v3098_v25 = vsel %vm1476_vm8, %v3066_v6, %v2635_v12  ;;  %v8771_v12 = vld [vmem:[#allocation170_spill] sm:$0xff]  ;;  %v2974_v6 = vsel %vm1344_vm3, %v8680_v34, %v8774_v9  ;;  %v8785_v9 = vld [vmem:[#allocation17_spill] sm:$0xff] }
 0x640   : > { %v3130_v40 = vsel %vm1509_vm7, %v3098_v25, %v2731_v19  ;;  %v2973_v19 = vsel %vm1344_vm3, %v8669_v36, %v8770_v60 }
 0x641   : > { %v3373_v43 = vpop.f32.mrf.mxu3  ;;  %v3003_v8 = vsel %vm1377_vm5, %v2973_v19, %v8771_v12 }
 0x642   : > { %v3374_v20 = vadd.f32 %v3677_v4, %v3373_v43  ;;  %v3035_v27 = vsel %vm1410_vm4, %v3003_v8, %v8772_v57 }
 0x643   : > { %v3067_v49 = vsel %vm1443_vm6, %v3035_v27, %v8773_v33  ;;  %v3685_v33 = vld [vmem:[%s3772_s17 + $0xa8] sm:$0xff] }
 0x644   : > { %v3435_v14 = vmax.f32 %v3374_v20, 0.0  ;;  %v2789_v37 = vpop.permute.xlu2 %2788  ;;  %v2909_v13 = vpop.permute.xlu1 %2908 }
 0x645   : > { %v3193_v51 = vsel %vm1575_vm11, %v3161_v31, %v2909_v13 }
 0x646   : > { %v2877_v21 = vpop.permute.xlu0 %2876  ;;  %v3328_v1 = vpop.f32.mrf.mxu1  ;;  %3467 = vst.msk [vmem:[%s7397_s19 + $0x88] sm:$0xff] %vm1344_vm3, %v3435_v14  ;;  %3603 = vmatmul.msk.f32.gmra.mxu3 %vm1617_vm10, %v3193_v51 }
 0x647   : > { %v3329_v54 = vadd.f32 %v3678_v56, %v3328_v1 }
 0x649   : > { %v3420_v58 = vmax.f32 %v3329_v54, 0.0 }
 0x64b   : > { %3452 = vst.msk [vmem:[%s7397_s19 + $0x10] sm:$0xff] %vm1344_vm3, %v3420_v58 }
 0x64c   : > { %v2823_v32 = vpop.permute.xlu2 %2822  ;;  %v2787_v50 = vpop.permute.xlu1 %2786 }
 0x64d   : > { %v3145_v0 = vsel %vm1542_vm9, %v3113_v61, %v2787_v50  ;;  %v3682_v50 = vld [vmem:[%s3772_s17 + $0x20] sm:$0xff] }
 0x64e   : > { %v2699_v17 = vpop.permute.xlu0 %2698  ;;  %v3177_v29 = vsel %vm1575_vm11, %v3145_v0, %v2877_v21  ;;  %v3681_v21 = vld [vmem:[%s3772_s17 + $0x98] sm:$0xff] }
 0x64f   : > { %3587 = vmatmul.msk.f32.gmra.mxu1 %vm1617_vm10, %v3177_v29  ;;  %v3114_v13 = vsel %vm1509_vm7, %v7018_v26, %v2699_v17 }
 0x650   : > { %v3146_v54 = vsel %vm1542_vm9, %v3114_v13, %v2789_v37 }
 0x651   : > { %v3376_v23 = vpop.f32.mrf.mxu3 }
 0x652   : > { %v3377_v16 = vadd.f32 %v3679_v2, %v3376_v23  ;;  %v8775_v2 = vld [vmem:[#allocation179_spill] sm:$0xff] }
 0x654   : > { %v3436_v55 = vmax.f32 %v3377_v16, 0.0  ;;  %v2821_v39 = vpop.permute.xlu1 %2820  ;;  %v2639_v24 = vpop.permute.xlu2 %2638  ;;  %v3004_v16 = vsel %vm1377_vm5, %v2974_v6, %v8775_v2 }
 0x655   : > { %v3162_v63 = vsel %vm1542_vm9, %v3130_v40, %v2821_v39  ;;  %v8776_v39 = vld [vmem:[#allocation42_spill] sm:$0xff] }
 0x656   : > { %v2733_v3 = vpop.permute.xlu0 %2732  ;;  %v3331_v59 = vpop.f32.mrf.mxu1  ;;  %3468 = vst.msk [vmem:[%s7397_s19 + $0x90] sm:$0xff] %vm1344_vm3, %v3436_v55  ;;  %v3194_v22 = vsel %vm1575_vm11, %v3162_v63, %v2911_v47  ;;  %v3036_v63 = vsel %vm1410_vm4, %v3004_v16, %v8776_v39 }
 0x657   : > { %v3332_v62 = vadd.f32 %v3680_v38, %v3331_v59  ;;  %3604 = vmatmul.msk.f32.gmra.mxu3 %vm1617_vm10, %v3194_v22  ;;  %v8777_v38 = vld [vmem:[#allocation52_spill] sm:$0xff] }
 0x659   : > { %v3421_v15 = vmax.f32 %v3332_v62, 0.0  ;;  %v3068_v62 = vsel %vm1443_vm6, %v3036_v63, %v8777_v38  ;;  %v3687_v63 = vld [vmem:[%s3772_s17 + $0x30] sm:$0xff] }
 0x65a   : > { %v3100_v34 = vsel %vm1476_vm8, %v3068_v62, %v2639_v24  ;;  %v8789_v62 = vld [vmem:[#allocation45_spill] sm:$0xff] }
 0x65b   : > { %3453 = vst.msk [vmem:[%s7397_s19 + $0x18] sm:$0xff] %vm1344_vm3, %v3421_v15 }
 0x65c   : > { %v2637_v47 = vpop.permute.xlu1 %2636  ;;  %v2881_v20 = vpop.permute.xlu2 %2880 }
 0x65d   : > { %v3099_v30 = vsel %vm1476_vm8, %v3067_v49, %v2637_v47 }
 0x65e   : > { %v2913_v43 = vpop.permute.xlu0 %2912  ;;  %v3131_v4 = vsel %vm1509_vm7, %v3099_v30, %v2733_v3  ;;  %v3684_v3 = vld [vmem:[%s3772_s17 + $0x28] sm:$0xff] }
 0x65f   : > { %v3163_v36 = vsel %vm1542_vm9, %v3131_v4, %v2823_v32 }
 0x660   : > { %v3195_v14 = vsel %vm1575_vm11, %v3163_v36, %v2913_v43  ;;  %v8778_v43 = vld [vmem:[#allocation23_spill] sm:$0xff] }
 0x661   : > { %v3379_v31 = vpop.f32.mrf.mxu3  ;;  %3605 = vmatmul.msk.f32.gmra.mxu3 %vm1617_vm10, %v3195_v14  ;;  %v2975_v4 = vsel %vm1344_vm3, %v8704_v7, %v8778_v43  ;;  %v8779_v14 = vld [vmem:[#allocation119_spill] sm:$0xff] }
 0x662   : > { %v3380_v1 = vadd.f32 %v3681_v21, %v3379_v31  ;;  %v3005_v13 = vsel %vm1377_vm5, %v2975_v4, %v8779_v14  ;;  %v8780_v21 = vld [vmem:[#allocation123_spill] sm:$0xff] }
 0x664   : > { %v3437_v51 = vmax.f32 %v3380_v1, 0.0  ;;  %v2879_v56 = vpop.permute.xlu1 %2878  ;;  %v2703_v52 = vpop.permute.xlu2 %2702  ;;  %v3037_v1 = vsel %vm1410_vm4, %v3005_v13, %v8780_v21  ;;  %v3688_v13 = vld [vmem:[%s3772_s17 + $0xb8] sm:$0xff] }
 0x665   : > { %v3178_v32 = vsel %vm1575_vm11, %v3146_v54, %v2879_v56  ;;  %v3116_v24 = vsel %vm1509_vm7, %v6970_v45, %v2703_v52  ;;  %v8781_v45 = vld [vmem:[#allocation36_spill] sm:$0xff] }
 0x666   : > { %v2791_v58 = vpop.permute.xlu0 %2790  ;;  %v3334_v61 = vpop.f32.mrf.mxu1  ;;  %3469 = vst.msk [vmem:[%s7397_s19 + $0x98] sm:$0xff] %vm1344_vm3, %v3437_v51  ;;  %3588 = vmatmul.msk.f32.gmra.mxu1 %vm1617_vm10, %v3178_v32  ;;  %v3069_v51 = vsel %vm1443_vm6, %v3037_v1, %v8781_v45 }
 0x667   : > { %v3335_v44 = vadd.f32 %v3682_v50, %v3334_v61 }
 0x669   : > { %v3422_v26 = vmax.f32 %v3335_v44, 0.0 }
 0x66b   : > { %3454 = vst.msk [vmem:[%s7397_s19 + $0x20] sm:$0xff] %vm1344_vm3, %v3422_v26 }
 0x66c   : > { %v2701_v0 = vpop.permute.xlu1 %2700  ;;  %v2737_v25 = vpop.permute.xlu2 %2736 }
 0x66d   : > { %v3115_v17 = vsel %vm1509_vm7, %v6892_v18, %v2701_v0  ;;  %v8782_v0 = vld [vmem:[#allocation108_spill] sm:$0xff] }
 0x66e   : > { %v2825_v37 = vpop.permute.xlu0 %2824  ;;  %v3147_v48 = vsel %vm1542_vm9, %v3115_v17, %v2791_v58 }
 0x66f   : > { %v3179_v10 = vsel %vm1575_vm11, %v3147_v48, %v2881_v20 }
 0x670   : > { %3589 = vmatmul.msk.f32.gmra.mxu1 %vm1617_vm10, %v3179_v10  ;;  %v3686_v10 = vld [vmem:[%s3772_s17 + $0xb0] sm:$0xff] }
 0x671   : > { %v3382_v29 = vpop.f32.mrf.mxu3 }
 0x672   : > { %v3383_v42 = vadd.f32 %v3683_v11, %v3382_v29  ;;  %v8784_v11 = vld [vmem:[#allocation100_spill] sm:$0xff] }
 0x674   : > { %v3438_v23 = vmax.f32 %v3383_v42, 0.0  ;;  %v2735_v18 = vpop.permute.xlu1 %2734  ;;  %v2917_v57 = vpop.permute.xlu2 %2916  ;;  %v2977_v42 = vsel %vm1344_vm3, %v8726_v28, %v8784_v11  ;;  %v3692_v11 = vld [vmem:[%s3772_s17 + $0xc8] sm:$0xff] }
 0x675   : > { %v3132_v15 = vsel %vm1509_vm7, %v3100_v34, %v2735_v18  ;;  %v8790_v34 = vunpack.i.l.bf16 %v8789_v62 }
 0x676   : > { %v2641_v55 = vpop.permute.xlu0 %2640  ;;  %v3337_v40 = vpop.f32.mrf.mxu1  ;;  %3470 = vst.msk [vmem:[%s7397_s19 + $0xa0] sm:$0xff] %vm1344_vm3, %v3438_v23  ;;  %v3164_v19 = vsel %vm1542_vm9, %v3132_v15, %v2825_v37  ;;  %v8783_v37 = vld [vmem:[#allocation41_spill] sm:$0xff]  ;;  %v8786_v23 = vld [vmem:[#allocation196_spill] sm:$0xff] }
 0x677   : > { %v3338_v59 = vadd.f32 %v3684_v3, %v3337_v40  ;;  %v3101_v7 = vsel %vm1476_vm8, %v3069_v51, %v2641_v55  ;;  %v3007_v18 = vsel %vm1377_vm5, %v2977_v42, %v8786_v23  ;;  %v8787_v40 = vld [vmem:[#allocation171_spill] sm:$0xff] }
 0x678   : > { %v3133_v58 = vsel %vm1509_vm7, %v3101_v7, %v2737_v25  ;;  %v3039_v39 = vsel %vm1410_vm4, %v3007_v18, %v8787_v40 }
 0x679   : > { %v3423_v22 = vmax.f32 %v3338_v59, 0.0  ;;  %v8788_v59 = vld [vmem:[#allocation197_spill] sm:$0xff] }
 0x67a   : > { %v3071_v38 = vsel %vm1443_vm6, %v3039_v39, %v8788_v59  ;;  %v3695_v39 = vld [vmem:[%s3772_s17 + $0x50] sm:$0xff] }
 0x67b   : > { %3455 = vst.msk [vmem:[%s7397_s19 + $0x28] sm:$0xff] %vm1344_vm3, %v3423_v22 }
 0x67c   : > { %v2915_v60 = vpop.permute.xlu1 %2914  ;;  %v2795_v56 = vpop.permute.xlu2 %2794 }
 0x67d   : > { %v3196_v8 = vsel %vm1575_vm11, %v3164_v19, %v2915_v60  ;;  %v8791_v60 = vld [vmem:[#allocation203_spill] sm:$0xff] }
 0x67e   : > { %v2883_v12 = vpop.permute.xlu0 %2882  ;;  %3606 = vmatmul.msk.f32.gmra.mxu3 %vm1617_vm10, %v3196_v8  ;;  %v8792_v19 = vunpack.i.l.bf16 %v8791_v60  ;;  %v8793_v8 = vld [vmem:[#allocation50_spill] sm:$0xff] }
 0x67f   : > { %v8797_v4 = vunpack.i.h.bf16 %v8793_v8 }
 0x681   : > { %v3385_v27 = vpop.f32.mrf.mxu3 }
 0x682   : > { %v3386_v49 = vadd.f32 %v3685_v33, %v3385_v27  ;;  %v8795_v33 = vunpack.i.h.bf16 %v8789_v62 }
 0x684   : > { %v3439_v47 = vmax.f32 %v3386_v49, 0.0  ;;  %v2793_v30 = vpop.permute.xlu1 %2792  ;;  %v2645_v25 = vpop.permute.xlu2 %2644 }
 0x685   : > { %v3148_v36 = vsel %vm1542_vm9, %v3116_v24, %v2793_v30  ;;  %v3103_v22 = vsel %vm1476_vm8, %v3071_v38, %v2645_v25  ;;  %v3693_v25 = vld [vmem:[%s3772_s17 + $0x48] sm:$0xff] }
 0x686   : > { %v2705_v20 = vpop.permute.xlu0 %2704  ;;  %3471 = vst.msk [vmem:[%s7397_s19 + $0xa8] sm:$0xff] %vm1344_vm3, %v3439_v47  ;;  %v3180_v31 = vsel %vm1575_vm11, %v3148_v36, %v2883_v12  ;;  %v3135_v49 = vsel %vm1509_vm7, %v3103_v22, %v8795_v33  ;;  %v8796_v47 = vunpack.i.h.bf16 %v8791_v60 }
 0x687   : > { %3590 = vmatmul.msk.f32.gmra.mxu1 %vm1617_vm10, %v3180_v31  ;;  %v3117_v54 = vsel %vm1509_vm7, %v7045_v5, %v2705_v20  ;;  %v2976_v5 = vsel %vm1344_vm3, %v8717_v35, %v8782_v0 }
 0x688   : > { %v3149_v44 = vsel %vm1542_vm9, %v3117_v54, %v2795_v56  ;;  %v3006_v48 = vsel %vm1377_vm5, %v2976_v5, %v8783_v37  ;;  %v3167_v30 = vsel %vm1542_vm9, %v3135_v49, %v8796_v47  ;;  %v3691_v37 = vld [vmem:[%s3772_s17 + $0x40] sm:$0xff]  ;;  %v3700_v47 = vld [vmem:[%s3772_s17 + $0x68] sm:$0xff] }
 0x689   : > { %v3038_v6 = vsel %vm1410_vm4, %v3006_v48, %v8785_v9  ;;  %v3199_v36 = vsel %vm1575_vm11, %v3167_v30, %v8797_v4 }
 0x68a   : > { %v3070_v35 = vsel %vm1443_vm6, %v3038_v6, %v6868_v46 }
 0x68c   : > { %v2827_v61 = vpop.permute.xlu1 %2826  ;;  %v2709_v7 = vpop.permute.xlu2 %2708 }
 0x68d   : > { %v3165_v32 = vsel %vm1542_vm9, %v3133_v58, %v2827_v61  ;;  %v3119_v56 = vsel %vm1509_vm7, %v7024_v41, %v2709_v7  ;;  %v3689_v61 = vld [vmem:[%s3772_s17 + $0x38] sm:$0xff] }
 0x68e   : > { %v2885_v50 = vpop.permute.xlu0 %2884  ;;  %v3197_v26 = vsel %vm1575_vm11, %v3165_v32, %v2917_v57  ;;  %v8794_v57 = vunpack.i.l.bf16 %v8793_v8 }
 0x68f   : > { %v3181_v52 = vsel %vm1575_vm11, %v3149_v44, %v2885_v50  ;;  %3607 = vmatmul.msk.f32.gmra.mxu3 %vm1617_vm10, %v3197_v26  ;;  %v3690_v26 = vld [vmem:[%s3772_s17 + $0xc0] sm:$0xff] }
 0x690   : > { %3591 = vmatmul.msk.f32.gmra.mxu1 %vm1617_vm10, %v3181_v52 }
 0x691   : > { %v3388_v17 = vpop.f32.mrf.mxu3 }
 0x692   : > { %v3389_v29 = vadd.f32 %v3686_v10, %v3388_v17 }
 0x694   : > { %v3440_v2 = vmax.f32 %v3389_v29, 0.0  ;;  %v3340_v16 = vpop.f32.mrf.mxu1  ;;  %v2643_v55 = vpop.permute.xlu1 %2642 }
 0x695   : > { %v3341_v3 = vadd.f32 %v3687_v63, %v3340_v16  ;;  %v3102_v28 = vsel %vm1476_vm8, %v3070_v35, %v2643_v55 }
 0x696   : > { %3472 = vst.msk [vmem:[%s7397_s19 + $0xb0] sm:$0xff] %vm1344_vm3, %v3440_v2  ;;  %v3134_v46 = vsel %vm1509_vm7, %v3102_v28, %v8790_v34  ;;  %v2797_v43 = vpop.permute.xlu0 %2796  ;;  %v3694_v2 = vld [vmem:[%s3772_s17 + $0xd0] sm:$0xff]  ;;  %v3696_v28 = vld [vmem:[%s3772_s17 + $0xd8] sm:$0xff] }
 0x697   : > { %v3424_v15 = vmax.f32 %v3341_v3, 0.0  ;;  %v3166_v12 = vsel %vm1542_vm9, %v3134_v46, %v8792_v19  ;;  %v3697_v46 = vld [vmem:[%s3772_s17 + $0x58] sm:$0xff]  ;;  %v3698_v19 = vld [vmem:[%s3772_s17 + $0xe0] sm:$0xff] }
 0x698   : > { %v3198_v27 = vsel %vm1575_vm11, %v3166_v12, %v8794_v57 }
 0x699   : > { %3456 = vst.msk [vmem:[%s7397_s19 + $0x30] sm:$0xff] %vm1344_vm3, %v3424_v15  ;;  %3608 = vmatmul.msk.f32.gmra.mxu3 %vm1617_vm10, %v3198_v27  ;;  %v3699_v27 = vld [vmem:[%s3772_s17 + $0x60] sm:$0xff] }
 0x69c   : > { %v2707_v24 = vpop.permute.xlu1 %2706 }
 0x69d   : > { %v3118_v20 = vsel %vm1509_vm7, %v6923_v53, %v2707_v24 }
 0x69e   : > { %v3150_v1 = vsel %vm1542_vm9, %v3118_v20, %v2797_v43  ;;  %v2799_v53 = vpop.permute.xlu0 %2798 }
 0x69f   : > { %v3151_v58 = vsel %vm1542_vm9, %v3119_v56, %v2799_v53  ;;  %v3704_v56 = vld [vmem:[%s3772_s17 + $0xf8] sm:$0xff] }
 0x6a1   : > { %3609 = vmatmul.msk.f32.gmra.mxu3 %vm1617_vm10, %v3199_v36  ;;  %v3701_v36 = vld [vmem:[%s3772_s17 + $0xe8] sm:$0xff] }
 0x6a2   : > { %v3391_v14 = vpop.f32.mrf.mxu3 }
 0x6a3   : > { %v3392_v31 = vadd.f32 %v3688_v13, %v3391_v14 }
 0x6a4   : > { %v2887_v21 = vpop.permute.xlu1 %2886 }
 0x6a5   : > { %v3441_v45 = vmax.f32 %v3392_v31, 0.0  ;;  %v3182_v51 = vsel %vm1575_vm11, %v3150_v1, %v2887_v21  ;;  %v3702_v31 = vld [vmem:[%s3772_s17 + $0xf0] sm:$0xff] }
 0x6a6   : > { %3592 = vmatmul.msk.f32.gmra.mxu1 %vm1617_vm10, %v3182_v51  ;;  %v3703_v51 = vld [vmem:[%s3772_s17 + $0x70] sm:$0xff] }
 0x6a7   : > { %3473 = vst.msk [vmem:[%s7397_s19 + $0xb8] sm:$0xff] %vm1344_vm3, %v3441_v45 }
 0x6ab   : > { %v3343_v54 = vpop.f32.mrf.mxu1 }
 0x6ac   : > { %v3344_v32 = vadd.f32 %v3689_v61, %v3343_v54  ;;  %v3394_v50 = vpop.f32.mrf.mxu3  ;;  %v2889_v44 = vpop.permute.xlu1 %2888 }
 0x6ad   : > { %v3395_v52 = vadd.f32 %v3690_v26, %v3394_v50  ;;  %v3183_v0 = vsel %vm1575_vm11, %v3151_v58, %v2889_v44  ;;  %v3705_v50 = vld [vmem:[%s3772_s17 + $0x78] sm:$0xff] }
 0x6ae   : > { %v3425_v5 = vmax.f32 %v3344_v32, 0.0  ;;  %3593 = vmatmul.msk.f32.gmra.mxu1 %vm1617_vm10, %v3183_v0 }
 0x6af   : > { %v3442_v41 = vmax.f32 %v3395_v52, 0.0 }
 0x6b0   : > { %3457 = vst.msk [vmem:[%s7397_s19 + $0x38] sm:$0xff] %vm1344_vm3, %v3425_v5 }
 0x6b1   : > { %3474 = vst.msk [vmem:[%s7397_s19 + $0xc0] sm:$0xff] %vm1344_vm3, %v3442_v41 }
 0x6b5   : > { %v3346_v17 = vpop.f32.mrf.mxu1 }
 0x6b6   : > { %v3347_v48 = vadd.f32 %v3691_v37, %v3346_v17 }
 0x6b8   : > { %v3426_v10 = vmax.f32 %v3347_v48, 0.0 }
 0x6ba   : > { %3458 = vst.msk [vmem:[%s7397_s19 + $0x40] sm:$0xff] %vm1344_vm3, %v3426_v10 }
 0x6c9   : > { %v3397_v29 = vpop.f32.mrf.mxu3 }
 0x6ca   : > { %v3398_v42 = vadd.f32 %v3692_v11, %v3397_v29 }
 0x6cc   : > { %v3443_v9 = vmax.f32 %v3398_v42, 0.0  ;;  %v3349_v6 = vpop.f32.mrf.mxu1 }
 0x6cd   : > { %v3350_v23 = vadd.f32 %v3693_v25, %v3349_v6 }
 0x6ce   : > { %3475 = vst.msk [vmem:[%s7397_s19 + $0xc8] sm:$0xff] %vm1344_vm3, %v3443_v9 }
 0x6cf   : > { %v3427_v18 = vmax.f32 %v3350_v23, 0.0 }
 0x6d1   : > { %3459 = vst.msk [vmem:[%s7397_s19 + $0x48] sm:$0xff] %vm1344_vm3, %v3427_v18 }
 0x6da   : > { %v3400_v35 = vpop.f32.mrf.mxu3 }
 0x6db   : > { %v3401_v16 = vadd.f32 %v3694_v2, %v3400_v35 }
 0x6dd   : > { %v3444_v55 = vmax.f32 %v3401_v16, 0.0 }
 0x6df   : > { %3476 = vst.msk [vmem:[%s7397_s19 + $0xd0] sm:$0xff] %vm1344_vm3, %v3444_v55 }
 0x6e3   : > { %v3352_v40 = vpop.f32.mrf.mxu1 }
 0x6e4   : > { %v3353_v63 = vadd.f32 %v3695_v39, %v3352_v40  ;;  %v3403_v3 = vpop.f32.mrf.mxu3 }
 0x6e5   : > { %v3404_v59 = vadd.f32 %v3696_v28, %v3403_v3 }
 0x6e6   : > { %v3428_v38 = vmax.f32 %v3353_v63, 0.0 }
 0x6e7   : > { %v3445_v62 = vmax.f32 %v3404_v59, 0.0 }
 0x6e8   : > { %3460 = vst.msk [vmem:[%s7397_s19 + $0x50] sm:$0xff] %vm1344_vm3, %v3428_v38 }
 0x6e9   : > { %3477 = vst.msk [vmem:[%s7397_s19 + $0xd8] sm:$0xff] %vm1344_vm3, %v3445_v62 }
 0x6ed   : > { %v3355_v34 = vpop.f32.mrf.mxu1 }
 0x6ee   : > { %v3356_v22 = vadd.f32 %v3697_v46, %v3355_v34 }
 0x6f0   : > { %v3429_v15 = vmax.f32 %v3356_v22, 0.0 }
 0x6f2   : > { %3461 = vst.msk [vmem:[%s7397_s19 + $0x58] sm:$0xff] %vm1344_vm3, %v3429_v15 }
 0x701   : > { %v3406_v60 = vpop.f32.mrf.mxu3 }
 0x702   : > { %v3407_v12 = vadd.f32 %v3698_v19, %v3406_v60 }
 0x704   : > { %v3446_v8 = vmax.f32 %v3407_v12, 0.0  ;;  %v3358_v57 = vpop.f32.mrf.mxu1 }
 0x705   : > { %v3359_v33 = vadd.f32 %v3699_v27, %v3358_v57 }
 0x706   : > { %3478 = vst.msk [vmem:[%s7397_s19 + $0xe0] sm:$0xff] %vm1344_vm3, %v3446_v8 }
 0x707   : > { %v3430_v49 = vmax.f32 %v3359_v33, 0.0 }
 0x709   : > { %3462 = vst.msk [vmem:[%s7397_s19 + $0x60] sm:$0xff] %vm1344_vm3, %v3430_v49 }
 0x70d   : > { %v3361_v24 = vpop.f32.mrf.mxu1 }
 0x70e   : > { %v3362_v30 = vadd.f32 %v3700_v47, %v3361_v24 }
 0x710   : > { %v3431_v43 = vmax.f32 %v3362_v30, 0.0 }
 0x712   : > { %3463 = vst.msk [vmem:[%s7397_s19 + $0x68] sm:$0xff] %vm1344_vm3, %v3431_v43  ;;  %v3409_v4 = vpop.f32.mrf.mxu3 }
 0x713   : > { %v3410_v20 = vadd.f32 %v3701_v36, %v3409_v4 }
 0x715   : > { %v3447_v14 = vmax.f32 %v3410_v20, 0.0 }
 0x717   : > { %3479 = vst.msk [vmem:[%s7397_s19 + $0xe8] sm:$0xff] %vm1344_vm3, %v3447_v14 }
 0x71c   : > { %v3412_v13 = vpop.f32.mrf.mxu3 }
 0x71d   : > { %v3413_v21 = vadd.f32 %v3702_v31, %v3412_v13 }
 0x71f   : > { %v3448_v1 = vmax.f32 %v3413_v21, 0.0 }
 0x721   : > { %3480 = vst.msk [vmem:[%s7397_s19 + $0xf0] sm:$0xff] %vm1344_vm3, %v3448_v1 }
 0x723   : > { %v3364_v45 = vpop.f32.mrf.mxu1 }
 0x724   : > { %v3365_v7 = vadd.f32 %v3703_v51, %v3364_v45  ;;  %v3415_v53 = vpop.f32.mrf.mxu3 }
 0x725   : > { %v3416_v54 = vadd.f32 %v3704_v56, %v3415_v53 }
 0x726   : > { %v3432_v58 = vmax.f32 %v3365_v7, 0.0 }
 0x727   : > { %v3449_v61 = vmax.f32 %v3416_v54, 0.0 }
 0x728   : > { %3464 = vst.msk [vmem:[%s7397_s19 + $0x70] sm:$0xff] %vm1344_vm3, %v3432_v58 }
 0x729   : > { %3481 = vst.msk [vmem:[%s7397_s19 + $0xf8] sm:$0xff] %vm1344_vm3, %v3449_v61 }
 0x72b   : > { %v3367_v32 = vpop.f32.mrf.mxu1 }
 0x72c   : > { %v3368_v44 = vadd.f32 %v3705_v50, %v3367_v32 }
 0x72e   : > { %v3433_v26 = vmax.f32 %v3368_v44, 0.0 }
 0x730   : > { %3465 = vst.msk [vmem:[%s7397_s19 + $0x78] sm:$0xff] %vm1344_vm3, %v3433_v26 }
 0x731 PF: > { %s13_s12 = sadd.s32 1, %s3712_s12  }
 0x732   : > { %p10_p4 = scmp.ge.s32.totalorder %s13_s12, 4  }
 0x734   :  { %12 = sbr.rel (!%p10_p4) target bundleno = 1 (0x1), region = 62 }

</bundles_post_ra>
